<compile_context>
chip_gen: v7x
topology: tpu7x:2x2x1
jax: 0.10.0
libtpu: 0.0.40
codegen_flags: <defaults>
</compile_context>

<pallas_src>
import functools

import jax
import jax.numpy as jnp
from jax.experimental import pallas as pl
from jax.experimental.pallas import tpu as pltpu

NUM_BLOCKS = 6
_TB_ALIGN = 32  # keeps each half-tile a multiple of 16 sublanes (bf16 packing)


def _round_up(x, m):
    return ((x + m - 1) // m) * m


def _resnet_linear_kernel(x_ref, wb_ref, bb_ref, wh_ref, bh_ref, out_ref):
    """Fused ResNetLinear forward for one batch tile.

    x_ref  : (TB, D)    bf16  input activations (one batch tile)
    wb_ref : (NB, D, D) bf16  per-block weights, (in, out) layout  [resident]
    bb_ref : (NB, 1, D) f32   per-block biases                     [resident]
    wh_ref : (D, OP)    bf16  head weight, zero-padded lane-dense  [resident]
    bh_ref : (1, OP)    f32   head bias, zero-padded               [resident]
    out_ref: (TB, OP)   f32   padded logits (lane-dense store)

    The batch tile is split into two independent halves so the serial
    dot -> relu/add/cast dependency of one chain can overlap the other
    chain's MXU work.
    """
    tb = x_ref.shape[0]
    half = tb // 2  # TB is a multiple of 32 -> half is a multiple of 16

    # Carry the residual streams in f32; feed bf16 operands to the MXU.
    xa = x_ref[:half, :].astype(jnp.float32)
    xb = x_ref[half:, :].astype(jnp.float32)

    # num_blocks is small and static -> unrolled Python loop (static weight index).
    for i in range(NUM_BLOCKS):
        w = wb_ref[i]
        b = bb_ref[i]
        ha = jnp.maximum(xa, 0.0).astype(w.dtype)
        hb = jnp.maximum(xb, 0.0).astype(w.dtype)
        xa = xa + jnp.dot(ha, w, preferred_element_type=jnp.float32) + b
        xb = xb + jnp.dot(hb, w, preferred_element_type=jnp.float32) + b

    # classification head: activation then Linear(D -> OP), lane-dense store.
    wh = wh_ref[...]
    bh = bh_ref[...]
    ha = jnp.maximum(xa, 0.0).astype(wh.dtype)
    hb = jnp.maximum(xb, 0.0).astype(wh.dtype)
    out_ref[:half, :] = (jnp.dot(ha, wh, preferred_element_type=jnp.float32)
                         + bh).astype(out_ref.dtype)
    out_ref[half:, :] = (jnp.dot(hb, wh, preferred_element_type=jnp.float32)
                         + bh).astype(out_ref.dtype)


@functools.partial(jax.jit, static_argnames=("block_b",))
def resnet_linear_forward(x, w_blocks, b_blocks, w_head, b_head, *, block_b=256):
    B, D = x.shape
    NB = w_blocks.shape[0]
    O = w_head.shape[1]

    OP = _round_up(O, 128)                       # lane-dense padded output width

    # Batch tile: multiple of 32 (robust to arbitrary caller block_b), and
    # clamped so the "parallel" batch axis has >= 2 grid steps whenever the
    # batch allows it (v7x has 2 TensorCores per chip).
    blk = _round_up(max(block_b, _TB_ALIGN), _TB_ALIGN)
    b_pad_min = _round_up(B, _TB_ALIGN)
    TB = min(blk, b_pad_min)
    if b_pad_min >= 2 * _TB_ALIGN:
        TB = min(TB, _round_up(pl.cdiv(b_pad_min, 2), _TB_ALIGN))
    BP = _round_up(B, TB)                        # padded batch

    # bf16 operands (half the weight/activation DMA); biases stay f32.
    # Skip the extra pad/cast HBM pass when the input is already laid out.
    if BP == B and x.dtype == jnp.bfloat16:
        x_p = x
    else:
        x_p = jnp.zeros((BP, D), jnp.bfloat16).at[:B].set(x.astype(jnp.bfloat16))
    wb = w_blocks.astype(jnp.bfloat16)
    bb = b_blocks.astype(jnp.float32)
    wh = jnp.zeros((D, OP), jnp.bfloat16).at[:, :O].set(w_head.astype(jnp.bfloat16))
    bh = jnp.zeros((1, OP), jnp.float32).at[:, :O].set(b_head.astype(jnp.float32))

    # VMEM budget: resident weights single-buffered, x/out tiles double-buffered,
    # plus f32 residual-carry / relu / dot-result scratch inside the body.
    # Only ever raise the scoped default, never lower it.
    weight_bytes = wb.size * 2 + bb.size * 4 + wh.size * 2 + bh.size * 4
    io_bytes = 2 * (TB * D * 2 + TB * OP * 4)
    scratch_bytes = 4 * TB * D * 4
    vmem_limit = max(32 << 20, 2 * (weight_bytes + io_bytes + scratch_bytes))
    vmem_limit = min(int(vmem_limit), 128 << 20)
    # TODO(synk): weight-streaming fallback (2-D grid over (batch, block) with
    # (1, D, D) double-buffered weight tiles and a VMEM residual accumulator)
    # for D large enough that NB*D*D*2 bytes no longer fits resident in VMEM.

    flops = 2 * BP * D * D * NB + 2 * BP * D * OP
    bytes_accessed = (x_p.size * 2 + wb.size * 2 + bb.size * 4
                      + wh.size * 2 + bh.size * 4 + BP * OP * 4)

    out = pl.pallas_call(
        _resnet_linear_kernel,
        out_shape=jax.ShapeDtypeStruct((BP, OP), jnp.float32),
        grid=(BP // TB,),
        in_specs=[
            # x: tiled over batch, default double-buffered pipeline.
            pl.BlockSpec((TB, D), lambda i: (i, 0)),
            # Grid-invariant operands: constant index_map, single-buffered so
            # they are fetched once and don't double their VMEM footprint.
            pl.BlockSpec((NB, D, D), lambda i: (0, 0, 0),
                         pipeline_mode=pl.Buffered(1)),
            pl.BlockSpec((NB, 1, D), lambda i: (0, 0, 0),
                         pipeline_mode=pl.Buffered(1)),
            pl.BlockSpec((D, OP), lambda i: (0, 0),
                         pipeline_mode=pl.Buffered(1)),
            pl.BlockSpec((1, OP), lambda i: (0, 0),
                         pipeline_mode=pl.Buffered(1)),
        ],
        out_specs=pl.BlockSpec((TB, OP), lambda i: (i, 0)),
        compiler_params=pltpu.CompilerParams(
            dimension_semantics=("parallel",),
            vmem_limit_bytes=vmem_limit),
        cost_estimate=pl.CostEstimate(
            flops=flops, transcendentals=0, bytes_accessed=bytes_accessed),
    )(x_p, wb, bb, wh, bh)

    return out[:B, :O]


def init_params(key, num_blocks, input_size, output_size):
    """Deterministic parameter init mimicking torch.nn.Linear defaults
    (uniform(-1/sqrt(fan_in), 1/sqrt(fan_in)))."""
    keys = jax.random.split(key, 2 * num_blocks + 2)
    bound = 1.0 / jnp.sqrt(jnp.float32(input_size))
    w_blocks = jnp.stack([
        jax.random.uniform(keys[2 * i], (input_size, input_size),
                           jnp.float32, -bound, bound)
        for i in range(num_blocks)
    ])                                                   # (NB, D, D), (in, out) layout
    b_blocks = jnp.stack([
        jax.random.uniform(keys[2 * i + 1], (1, input_size),
                           jnp.float32, -bound, bound)
        for i in range(num_blocks)
    ])                                                   # (NB, 1, D)
    w_head = jax.random.uniform(keys[-2], (input_size, output_size),
                                jnp.float32, -bound, bound)   # (D, O)
    b_head = jax.random.uniform(keys[-1], (1, output_size),
                                jnp.float32, -bound, bound)   # (1, O)
    return w_blocks, b_blocks, w_head, b_head


def reference_forward(x, w_blocks, b_blocks, w_head, b_head):
    """Pure-JAX reference with the same bf16-operand / f32-accumulate numerics."""
    xf = x.astype(jnp.bfloat16).astype(jnp.float32)   # same initial rounding as kernel
    for i in range(w_blocks.shape[0]):
        h = jnp.maximum(xf, 0.0).astype(jnp.bfloat16)
        xf = xf + jnp.dot(h, w_blocks[i].astype(jnp.bfloat16),
                          preferred_element_type=jnp.float32) + b_blocks[i]
    h = jnp.maximum(xf, 0.0).astype(jnp.bfloat16)
    return jnp.dot(h, w_head.astype(jnp.bfloat16),
                   preferred_element_type=jnp.float32) + b_head


if __name__ == "__main__":
    # Shapes consistent with the module (flattened features, 10-way head);
    # B=256 / D=256 keeps the example small while giving the MXU real rows
    # and producing 2 grid steps on the parallel batch axis.
    B, D, O = 256, 256, 10
    key = jax.random.PRNGKey(0)
    k_x, k_p = jax.random.split(key)

    x = jax.random.normal(k_x, (B, D), dtype=jnp.float32)
    w_blocks, b_blocks, w_head, b_head = init_params(k_p, NUM_BLOCKS, D, O)

    out = resnet_linear_forward(x, w_blocks, b_blocks, w_head, b_head)
    out = jax.block_until_ready(out)

    ref = reference_forward(x, w_blocks, b_blocks, w_head, b_head)
    assert out.shape == (B, O)
    assert jnp.allclose(out, ref, rtol=1e-2, atol=1e-2), "mismatch vs JAX reference"

    # TODO(synk): with_norm=True path (BatchNorm1d) not implemented; default is with_norm=False.
    print("KERNEL_OK")
</pallas_src>

<mosaic_0001>
module attributes {stable_mosaic.version = 11 : i64} {
  func.func @_resnet_linear_kernel(%arg0: i32, %arg1: memref<128x256xbf16, #tpu.memory_space<vmem>>, %arg2: memref<6x256x256xbf16, #tpu.memory_space<vmem>>, %arg3: memref<6x1x256xf32, #tpu.memory_space<vmem>>, %arg4: memref<256x128xbf16, #tpu.memory_space<vmem>>, %arg5: memref<1x128xf32, #tpu.memory_space<vmem>>, %arg6: memref<128x128xf32, #tpu.memory_space<vmem>>) attributes {dimension_semantics = [#tpu.dimension_semantics<parallel>], iteration_bounds = array<i64: 2>, scalar_prefetch = 0 : i64, scratch_operands = 0 : i64, tpu.core_type = #tpu.core_type<tc>, window_params = [{transform_indices = @transform_0, window_bounds = array<i64: 128, 256>}, {pipeline_mode = #tpu.pipeline_mode<synchronous>, transform_indices = @transform_1, window_bounds = array<i64: 6, 256, 256>}, {pipeline_mode = #tpu.pipeline_mode<synchronous>, transform_indices = @transform_2, window_bounds = array<i64: 6, 1, 256>}, {pipeline_mode = #tpu.pipeline_mode<synchronous>, transform_indices = @transform_3, window_bounds = array<i64: 256, 128>}, {pipeline_mode = #tpu.pipeline_mode<synchronous>, transform_indices = @transform_4, window_bounds = array<i64: 1, 128>}, {transform_indices = @transform_5, window_bounds = array<i64: 128, 128>}]} {
    %c0 = arith.constant 0 : index
    %c0_0 = arith.constant 0 : index
    %0 = vector.load %arg1[%c0, %c0_0] : memref<128x256xbf16, #tpu.memory_space<vmem>>, vector<64x256xbf16>
    %1 = arith.extf %0 : vector<64x256xbf16> to vector<64x256xf32>
    %c64 = arith.constant 64 : index
    %c0_1 = arith.constant 0 : index
    %2 = vector.load %arg1[%c64, %c0_1] : memref<128x256xbf16, #tpu.memory_space<vmem>>, vector<64x256xbf16>
    %3 = arith.extf %2 : vector<64x256xbf16> to vector<64x256xf32>
    %c0_2 = arith.constant 0 : index
    %c0_3 = arith.constant 0 : index
    %c0_4 = arith.constant 0 : index
    %4 = vector.load %arg2[%c0_2, %c0_3, %c0_4] : memref<6x256x256xbf16, #tpu.memory_space<vmem>>, vector<1x256x256xbf16>
    %5 = vector.shape_cast %4 : vector<1x256x256xbf16> to vector<256x256xbf16>
    %c0_5 = arith.constant 0 : index
    %c0_6 = arith.constant 0 : index
    %c0_7 = arith.constant 0 : index
    %6 = vector.load %arg3[%c0_5, %c0_6, %c0_7] : memref<6x1x256xf32, #tpu.memory_space<vmem>>, vector<1x1x256xf32>
    %7 = vector.shape_cast %6 : vector<1x1x256xf32> to vector<1x256xf32>
    %cst = arith.constant 0.000000e+00 : f32
    %8 = vector.broadcast %cst : f32 to vector<64x256xf32>
    %9 = arith.maximumf %1, %8 : vector<64x256xf32>
    %10 = arith.truncf %9 : vector<64x256xf32> to vector<64x256xbf16>
    %cst_8 = arith.constant 0.000000e+00 : f32
    %11 = vector.broadcast %cst_8 : f32 to vector<64x256xf32>
    %12 = arith.maximumf %3, %11 : vector<64x256xf32>
    %13 = arith.truncf %12 : vector<64x256xf32> to vector<64x256xbf16>
    %cst_9 = arith.constant dense<0.000000e+00> : vector<64x256xf32>
    %14 = tpu.matmul %10, %5, %cst_9 {dimension_numbers = #tpu.dot_dimension_numbers<[1], [0], [0], [1], [0, 0, 1, 1], [], []>} : vector<64x256xbf16>, vector<256x256xbf16>, vector<64x256xf32> -> vector<64x256xf32>
    %15 = arith.addf %1, %14 : vector<64x256xf32>
    %16 = vector.broadcast %7 : vector<1x256xf32> to vector<64x256xf32>
    %17 = arith.addf %15, %16 : vector<64x256xf32>
    %cst_10 = arith.constant dense<0.000000e+00> : vector<64x256xf32>
    %18 = tpu.matmul %13, %5, %cst_10 {dimension_numbers = #tpu.dot_dimension_numbers<[1], [0], [0], [1], [0, 0, 1, 1], [], []>} : vector<64x256xbf16>, vector<256x256xbf16>, vector<64x256xf32> -> vector<64x256xf32>
    %19 = arith.addf %3, %18 : vector<64x256xf32>
    %20 = vector.broadcast %7 : vector<1x256xf32> to vector<64x256xf32>
    %21 = arith.addf %19, %20 : vector<64x256xf32>
    %c1 = arith.constant 1 : index
    %c0_11 = arith.constant 0 : index
    %c0_12 = arith.constant 0 : index
    %22 = vector.load %arg2[%c1, %c0_11, %c0_12] : memref<6x256x256xbf16, #tpu.memory_space<vmem>>, vector<1x256x256xbf16>
    %23 = vector.shape_cast %22 : vector<1x256x256xbf16> to vector<256x256xbf16>
    %c1_13 = arith.constant 1 : index
    %c0_14 = arith.constant 0 : index
    %c0_15 = arith.constant 0 : index
    %24 = vector.load %arg3[%c1_13, %c0_14, %c0_15] : memref<6x1x256xf32, #tpu.memory_space<vmem>>, vector<1x1x256xf32>
    %25 = vector.shape_cast %24 : vector<1x1x256xf32> to vector<1x256xf32>
    %cst_16 = arith.constant 0.000000e+00 : f32
    %26 = vector.broadcast %cst_16 : f32 to vector<64x256xf32>
    %27 = arith.maximumf %17, %26 : vector<64x256xf32>
    %28 = arith.truncf %27 : vector<64x256xf32> to vector<64x256xbf16>
    %cst_17 = arith.constant 0.000000e+00 : f32
    %29 = vector.broadcast %cst_17 : f32 to vector<64x256xf32>
    %30 = arith.maximumf %21, %29 : vector<64x256xf32>
    %31 = arith.truncf %30 : vector<64x256xf32> to vector<64x256xbf16>
    %cst_18 = arith.constant dense<0.000000e+00> : vector<64x256xf32>
    %32 = tpu.matmul %28, %23, %cst_18 {dimension_numbers = #tpu.dot_dimension_numbers<[1], [0], [0], [1], [0, 0, 1, 1], [], []>} : vector<64x256xbf16>, vector<256x256xbf16>, vector<64x256xf32> -> vector<64x256xf32>
    %33 = arith.addf %17, %32 : vector<64x256xf32>
    %34 = vector.broadcast %25 : vector<1x256xf32> to vector<64x256xf32>
    %35 = arith.addf %33, %34 : vector<64x256xf32>
    %cst_19 = arith.constant dense<0.000000e+00> : vector<64x256xf32>
    %36 = tpu.matmul %31, %23, %cst_19 {dimension_numbers = #tpu.dot_dimension_numbers<[1], [0], [0], [1], [0, 0, 1, 1], [], []>} : vector<64x256xbf16>, vector<256x256xbf16>, vector<64x256xf32> -> vector<64x256xf32>
    %37 = arith.addf %21, %36 : vector<64x256xf32>
    %38 = vector.broadcast %25 : vector<1x256xf32> to vector<64x256xf32>
    %39 = arith.addf %37, %38 : vector<64x256xf32>
    %c2 = arith.constant 2 : index
    %c0_20 = arith.constant 0 : index
    %c0_21 = arith.constant 0 : index
    %40 = vector.load %arg2[%c2, %c0_20, %c0_21] : memref<6x256x256xbf16, #tpu.memory_space<vmem>>, vector<1x256x256xbf16>
    %41 = vector.shape_cast %40 : vector<1x256x256xbf16> to vector<256x256xbf16>
    %c2_22 = arith.constant 2 : index
    %c0_23 = arith.constant 0 : index
    %c0_24 = arith.constant 0 : index
    %42 = vector.load %arg3[%c2_22, %c0_23, %c0_24] : memref<6x1x256xf32, #tpu.memory_space<vmem>>, vector<1x1x256xf32>
    %43 = vector.shape_cast %42 : vector<1x1x256xf32> to vector<1x256xf32>
    %cst_25 = arith.constant 0.000000e+00 : f32
    %44 = vector.broadcast %cst_25 : f32 to vector<64x256xf32>
    %45 = arith.maximumf %35, %44 : vector<64x256xf32>
    %46 = arith.truncf %45 : vector<64x256xf32> to vector<64x256xbf16>
    %cst_26 = arith.constant 0.000000e+00 : f32
    %47 = vector.broadcast %cst_26 : f32 to vector<64x256xf32>
    %48 = arith.maximumf %39, %47 : vector<64x256xf32>
    %49 = arith.truncf %48 : vector<64x256xf32> to vector<64x256xbf16>
    %cst_27 = arith.constant dense<0.000000e+00> : vector<64x256xf32>
    %50 = tpu.matmul %46, %41, %cst_27 {dimension_numbers = #tpu.dot_dimension_numbers<[1], [0], [0], [1], [0, 0, 1, 1], [], []>} : vector<64x256xbf16>, vector<256x256xbf16>, vector<64x256xf32> -> vector<64x256xf32>
    %51 = arith.addf %35, %50 : vector<64x256xf32>
    %52 = vector.broadcast %43 : vector<1x256xf32> to vector<64x256xf32>
    %53 = arith.addf %51, %52 : vector<64x256xf32>
    %cst_28 = arith.constant dense<0.000000e+00> : vector<64x256xf32>
    %54 = tpu.matmul %49, %41, %cst_28 {dimension_numbers = #tpu.dot_dimension_numbers<[1], [0], [0], [1], [0, 0, 1, 1], [], []>} : vector<64x256xbf16>, vector<256x256xbf16>, vector<64x256xf32> -> vector<64x256xf32>
    %55 = arith.addf %39, %54 : vector<64x256xf32>
    %56 = vector.broadcast %43 : vector<1x256xf32> to vector<64x256xf32>
    %57 = arith.addf %55, %56 : vector<64x256xf32>
    %c3 = arith.constant 3 : index
    %c0_29 = arith.constant 0 : index
    %c0_30 = arith.constant 0 : index
    %58 = vector.load %arg2[%c3, %c0_29, %c0_30] : memref<6x256x256xbf16, #tpu.memory_space<vmem>>, vector<1x256x256xbf16>
    %59 = vector.shape_cast %58 : vector<1x256x256xbf16> to vector<256x256xbf16>
    %c3_31 = arith.constant 3 : index
    %c0_32 = arith.constant 0 : index
    %c0_33 = arith.constant 0 : index
    %60 = vector.load %arg3[%c3_31, %c0_32, %c0_33] : memref<6x1x256xf32, #tpu.memory_space<vmem>>, vector<1x1x256xf32>
    %61 = vector.shape_cast %60 : vector<1x1x256xf32> to vector<1x256xf32>
    %cst_34 = arith.constant 0.000000e+00 : f32
    %62 = vector.broadcast %cst_34 : f32 to vector<64x256xf32>
    %63 = arith.maximumf %53, %62 : vector<64x256xf32>
    %64 = arith.truncf %63 : vector<64x256xf32> to vector<64x256xbf16>
    %cst_35 = arith.constant 0.000000e+00 : f32
    %65 = vector.broadcast %cst_35 : f32 to vector<64x256xf32>
    %66 = arith.maximumf %57, %65 : vector<64x256xf32>
    %67 = arith.truncf %66 : vector<64x256xf32> to vector<64x256xbf16>
    %cst_36 = arith.constant dense<0.000000e+00> : vector<64x256xf32>
    %68 = tpu.matmul %64, %59, %cst_36 {dimension_numbers = #tpu.dot_dimension_numbers<[1], [0], [0], [1], [0, 0, 1, 1], [], []>} : vector<64x256xbf16>, vector<256x256xbf16>, vector<64x256xf32> -> vector<64x256xf32>
    %69 = arith.addf %53, %68 : vector<64x256xf32>
    %70 = vector.broadcast %61 : vector<1x256xf32> to vector<64x256xf32>
    %71 = arith.addf %69, %70 : vector<64x256xf32>
    %cst_37 = arith.constant dense<0.000000e+00> : vector<64x256xf32>
    %72 = tpu.matmul %67, %59, %cst_37 {dimension_numbers = #tpu.dot_dimension_numbers<[1], [0], [0], [1], [0, 0, 1, 1], [], []>} : vector<64x256xbf16>, vector<256x256xbf16>, vector<64x256xf32> -> vector<64x256xf32>
    %73 = arith.addf %57, %72 : vector<64x256xf32>
    %74 = vector.broadcast %61 : vector<1x256xf32> to vector<64x256xf32>
    %75 = arith.addf %73, %74 : vector<64x256xf32>
    %c4 = arith.constant 4 : index
    %c0_38 = arith.constant 0 : index
    %c0_39 = arith.constant 0 : index
    %76 = vector.load %arg2[%c4, %c0_38, %c0_39] : memref<6x256x256xbf16, #tpu.memory_space<vmem>>, vector<1x256x256xbf16>
    %77 = vector.shape_cast %76 : vector<1x256x256xbf16> to vector<256x256xbf16>
    %c4_40 = arith.constant 4 : index
    %c0_41 = arith.constant 0 : index
    %c0_42 = arith.constant 0 : index
    %78 = vector.load %arg3[%c4_40, %c0_41, %c0_42] : memref<6x1x256xf32, #tpu.memory_space<vmem>>, vector<1x1x256xf32>
    %79 = vector.shape_cast %78 : vector<1x1x256xf32> to vector<1x256xf32>
    %cst_43 = arith.constant 0.000000e+00 : f32
    %80 = vector.broadcast %cst_43 : f32 to vector<64x256xf32>
    %81 = arith.maximumf %71, %80 : vector<64x256xf32>
    %82 = arith.truncf %81 : vector<64x256xf32> to vector<64x256xbf16>
    %cst_44 = arith.constant 0.000000e+00 : f32
    %83 = vector.broadcast %cst_44 : f32 to vector<64x256xf32>
    %84 = arith.maximumf %75, %83 : vector<64x256xf32>
    %85 = arith.truncf %84 : vector<64x256xf32> to vector<64x256xbf16>
    %cst_45 = arith.constant dense<0.000000e+00> : vector<64x256xf32>
    %86 = tpu.matmul %82, %77, %cst_45 {dimension_numbers = #tpu.dot_dimension_numbers<[1], [0], [0], [1], [0, 0, 1, 1], [], []>} : vector<64x256xbf16>, vector<256x256xbf16>, vector<64x256xf32> -> vector<64x256xf32>
    %87 = arith.addf %71, %86 : vector<64x256xf32>
    %88 = vector.broadcast %79 : vector<1x256xf32> to vector<64x256xf32>
    %89 = arith.addf %87, %88 : vector<64x256xf32>
    %cst_46 = arith.constant dense<0.000000e+00> : vector<64x256xf32>
    %90 = tpu.matmul %85, %77, %cst_46 {dimension_numbers = #tpu.dot_dimension_numbers<[1], [0], [0], [1], [0, 0, 1, 1], [], []>} : vector<64x256xbf16>, vector<256x256xbf16>, vector<64x256xf32> -> vector<64x256xf32>
    %91 = arith.addf %75, %90 : vector<64x256xf32>
    %92 = vector.broadcast %79 : vector<1x256xf32> to vector<64x256xf32>
    %93 = arith.addf %91, %92 : vector<64x256xf32>
    %c5 = arith.constant 5 : index
    %c0_47 = arith.constant 0 : index
    %c0_48 = arith.constant 0 : index
    %94 = vector.load %arg2[%c5, %c0_47, %c0_48] : memref<6x256x256xbf16, #tpu.memory_space<vmem>>, vector<1x256x256xbf16>
    %95 = vector.shape_cast %94 : vector<1x256x256xbf16> to vector<256x256xbf16>
    %c5_49 = arith.constant 5 : index
    %c0_50 = arith.constant 0 : index
    %c0_51 = arith.constant 0 : index
    %96 = vector.load %arg3[%c5_49, %c0_50, %c0_51] : memref<6x1x256xf32, #tpu.memory_space<vmem>>, vector<1x1x256xf32>
    %97 = vector.shape_cast %96 : vector<1x1x256xf32> to vector<1x256xf32>
    %cst_52 = arith.constant 0.000000e+00 : f32
    %98 = vector.broadcast %cst_52 : f32 to vector<64x256xf32>
    %99 = arith.maximumf %89, %98 : vector<64x256xf32>
    %100 = arith.truncf %99 : vector<64x256xf32> to vector<64x256xbf16>
    %cst_53 = arith.constant 0.000000e+00 : f32
    %101 = vector.broadcast %cst_53 : f32 to vector<64x256xf32>
    %102 = arith.maximumf %93, %101 : vector<64x256xf32>
    %103 = arith.truncf %102 : vector<64x256xf32> to vector<64x256xbf16>
    %cst_54 = arith.constant dense<0.000000e+00> : vector<64x256xf32>
    %104 = tpu.matmul %100, %95, %cst_54 {dimension_numbers = #tpu.dot_dimension_numbers<[1], [0], [0], [1], [0, 0, 1, 1], [], []>} : vector<64x256xbf16>, vector<256x256xbf16>, vector<64x256xf32> -> vector<64x256xf32>
    %105 = arith.addf %89, %104 : vector<64x256xf32>
    %106 = vector.broadcast %97 : vector<1x256xf32> to vector<64x256xf32>
    %107 = arith.addf %105, %106 : vector<64x256xf32>
    %cst_55 = arith.constant dense<0.000000e+00> : vector<64x256xf32>
    %108 = tpu.matmul %103, %95, %cst_55 {dimension_numbers = #tpu.dot_dimension_numbers<[1], [0], [0], [1], [0, 0, 1, 1], [], []>} : vector<64x256xbf16>, vector<256x256xbf16>, vector<64x256xf32> -> vector<64x256xf32>
    %109 = arith.addf %93, %108 : vector<64x256xf32>
    %110 = vector.broadcast %97 : vector<1x256xf32> to vector<64x256xf32>
    %111 = arith.addf %109, %110 : vector<64x256xf32>
    %c0_56 = arith.constant 0 : index
    %c0_57 = arith.constant 0 : index
    %112 = vector.load %arg4[%c0_56, %c0_57] : memref<256x128xbf16, #tpu.memory_space<vmem>>, vector<256x128xbf16>
    %c0_58 = arith.constant 0 : index
    %c0_59 = arith.constant 0 : index
    %113 = vector.load %arg5[%c0_58, %c0_59] : memref<1x128xf32, #tpu.memory_space<vmem>>, vector<1x128xf32>
    %cst_60 = arith.constant 0.000000e+00 : f32
    %114 = vector.broadcast %cst_60 : f32 to vector<64x256xf32>
    %115 = arith.maximumf %107, %114 : vector<64x256xf32>
    %116 = arith.truncf %115 : vector<64x256xf32> to vector<64x256xbf16>
    %cst_61 = arith.constant 0.000000e+00 : f32
    %117 = vector.broadcast %cst_61 : f32 to vector<64x256xf32>
    %118 = arith.maximumf %111, %117 : vector<64x256xf32>
    %119 = arith.truncf %118 : vector<64x256xf32> to vector<64x256xbf16>
    %cst_62 = arith.constant dense<0.000000e+00> : vector<64x128xf32>
    %120 = tpu.matmul %116, %112, %cst_62 {dimension_numbers = #tpu.dot_dimension_numbers<[1], [0], [0], [1], [0, 0, 1, 1], [], []>} : vector<64x256xbf16>, vector<256x128xbf16>, vector<64x128xf32> -> vector<64x128xf32>
    %121 = vector.broadcast %113 : vector<1x128xf32> to vector<64x128xf32>
    %122 = arith.addf %120, %121 : vector<64x128xf32>
    %c0_63 = arith.constant 0 : index
    %c0_64 = arith.constant 0 : index
    %123 = vector.load %arg6[%c0_63, %c0_64] : memref<128x128xf32, #tpu.memory_space<vmem>>, vector<64x128xf32>
    tpu.vector_store %arg6[%c0_63, %c0_64], %122 {strides = array<i32>} : memref<128x128xf32, #tpu.memory_space<vmem>>, vector<64x128xf32>,
    %cst_65 = arith.constant dense<0.000000e+00> : vector<64x128xf32>
    %124 = tpu.matmul %119, %112, %cst_65 {dimension_numbers = #tpu.dot_dimension_numbers<[1], [0], [0], [1], [0, 0, 1, 1], [], []>} : vector<64x256xbf16>, vector<256x128xbf16>, vector<64x128xf32> -> vector<64x128xf32>
    %125 = vector.broadcast %113 : vector<1x128xf32> to vector<64x128xf32>
    %126 = arith.addf %124, %125 : vector<64x128xf32>
    %c64_66 = arith.constant 64 : index
    %c0_67 = arith.constant 0 : index
    %127 = vector.load %arg6[%c64_66, %c0_67] : memref<128x128xf32, #tpu.memory_space<vmem>>, vector<64x128xf32>
    tpu.vector_store %arg6[%c64_66, %c0_67], %126 {strides = array<i32>} : memref<128x128xf32, #tpu.memory_space<vmem>>, vector<64x128xf32>,
    return
  }
  func.func @transform_0(%arg0: i32) -> (i32, i32) {
    %c0_i32 = arith.constant 0 : i32
    %c0_i32_0 = arith.constant 0 : i32
    return %arg0, %c0_i32 : i32, i32
  }
  func.func @transform_1(%arg0: i32) -> (i32, i32, i32) {
    %c0_i32 = arith.constant 0 : i32
    %c0_i32_0 = arith.constant 0 : i32
    %c0_i32_1 = arith.constant 0 : i32
    %c0_i32_2 = arith.constant 0 : i32
    return %c0_i32, %c0_i32_0, %c0_i32_1 : i32, i32, i32
  }
  func.func @transform_2(%arg0: i32) -> (i32, i32, i32) {
    %c0_i32 = arith.constant 0 : i32
    %c0_i32_0 = arith.constant 0 : i32
    %c0_i32_1 = arith.constant 0 : i32
    %c0_i32_2 = arith.constant 0 : i32
    return %c0_i32, %c0_i32_0, %c0_i32_1 : i32, i32, i32
  }
  func.func @transform_3(%arg0: i32) -> (i32, i32) {
    %c0_i32 = arith.constant 0 : i32
    %c0_i32_0 = arith.constant 0 : i32
    %c0_i32_1 = arith.constant 0 : i32
    return %c0_i32, %c0_i32_0 : i32, i32
  }
  func.func @transform_4(%arg0: i32) -> (i32, i32) {
    %c0_i32 = arith.constant 0 : i32
    %c0_i32_0 = arith.constant 0 : i32
    %c0_i32_1 = arith.constant 0 : i32
    return %c0_i32, %c0_i32_0 : i32, i32
  }
  func.func @transform_5(%arg0: i32) -> (i32, i32) {
    %c0_i32 = arith.constant 0 : i32
    %c0_i32_0 = arith.constant 0 : i32
    return %arg0, %c0_i32 : i32, i32
  }
}

</mosaic_0001>

<bundles_post_ra>
// kernel: resnet_linear_forward.1
= control target key start
LH: loop header
LB: loop body
LE: loop exit
PB: predicated region body
PF: predicated region fallthrough
CT: control target
= control target key end

     0   :  { %s4264_s18 = smov 0   ;;  %s6051_s0 = inlined_call_operand.vmem [shape: bf16[256,256], index: 0, kind: input, shape index: {}]   ;;  %s6052_s1 = inlined_call_operand.vmem [shape: bf16[6,256,256], index: 1, kind: input, shape index: {}]   ;;  %s6053_s2 = inlined_call_operand.vmem [shape: f32[6,1,256], index: 2, kind: input, shape index: {}]   ;;  %s6054_s3 = inlined_call_operand.vmem [shape: bf16[256,128], index: 3, kind: input, shape index: {}]   ;;  %s6055_s4 = inlined_call_operand.vmem [shape: f32[1,128], index: 4, kind: input, shape index: {}]   ;;  %s6056_s5 = inlined_call_operand.vmem [shape: f32[256,128], index: 5, kind: output, shape index: {}]  }
   0x1 LB: > { %s3447_s19 = sadd.s32 4294967295, %s4232_s18   ;;  %p3451_p0 = scmp.ge.s32.totalorder %s4232_s18, 1  ;;  %s4232_s18 = sphi %s4264_s18, %s15_s18  }
   0x2   : > { %p189_p1 = scmp.lt.s32.totalorder %s4232_s18, 3 }
   0x4   : > { %p190_p2 = pnand %p3451_p0, %p189_p1 }
   0x5   : > { %v3922_v0 = vld [vmem:[%s6052_s1 + $0x4] ss:$8 sps:$4 sm:$0xff] (!%p190_p2)   ;;  %v3924_v1 = vld [vmem:[%s6052_s1] ss:$8 sps:$4 sm:$0xff] (!%p190_p2)   ;;  %v3925_v2 = vld [vmem:[%s6052_s1 + $0x14] ss:$8 sps:$4 sm:$0xff] (!%p190_p2)  }
   0x6   : > { %193 = sbr.rel (%p190_p2) target bundleno = 1660 (0x67c), region = 40  ;;  %521 = vmatprep.subr.bf16.mxu0 (!%p190_p2), %v3922_v0  ;;  %637 = vmatprep.subr.bf16.mxu1 (!%p190_p2), %v3922_v0  ;;  %v3927_v3 = vld [vmem:[%s6052_s1 + $0x10] ss:$8 sps:$4 sm:$0xff] (!%p190_p2)   ;;  %v3928_v4 = vld [vmem:[%s6052_s1 + $0x24] ss:$8 sps:$4 sm:$0xff] (!%p190_p2)   ;;  %s3452_s30 = sshll.u32 (!%p190_p2), %s3447_s19, 4 }
   0x7   : > { %522 = vmatpush1.bf16.msra.mxu0 (!%p190_p2), %v3924_v1  ;;  %638 = vmatpush1.bf16.msra.mxu1 (!%p190_p2), %v3924_v1  ;;  %v3930_v5 = vld [vmem:[%s6052_s1 + $0x20] ss:$8 sps:$4 sm:$0xff] (!%p190_p2)   ;;  %p219_p3 = scmp.lt.s32.totalorder (!%p190_p2), %s3452_s30, 31  ;;  %v3931_v6 = vld [vmem:[%s6052_s1 + $0x34] ss:$8 sps:$4 sm:$0xff] (!%p190_p2)  }
   0x8   : > { %523 = vmatprep.subr.bf16.mxu0 (!%p190_p2), %v3925_v2  ;;  %639 = vmatprep.subr.bf16.mxu1 (!%p190_p2), %v3925_v2  ;;  %v3933_v7 = vld [vmem:[%s6052_s1 + $0x30] ss:$8 sps:$4 sm:$0xff] (!%p190_p2)   ;;  %v3934_v8 = vld [vmem:[%s6052_s1 + $0x44] ss:$8 sps:$4 sm:$0xff] (!%p190_p2)   ;;  %v3936_v9 = vld [vmem:[%s6052_s1 + $0x40] ss:$8 sps:$4 sm:$0xff] (!%p190_p2)  }
   0x9   : > { %v3937_v10 = vld [vmem:[%s6052_s1 + $0x54] ss:$8 sps:$4 sm:$0xff] (!%p190_p2)   ;;  %v3939_v11 = vld [vmem:[%s6052_s1 + $0x50] ss:$8 sps:$4 sm:$0xff] (!%p190_p2)   ;;  %v3940_v12 = vld [vmem:[%s6052_s1 + $0x64] ss:$8 sps:$4 sm:$0xff] (!%p190_p2)  }
   0xa   : > { %v3942_v19 = vld [vmem:[%s6052_s1 + $0x60] ss:$8 sps:$4 sm:$0xff] (!%p190_p2)   ;;  %v3943_v22 = vld [vmem:[%s6052_s1 + $0x74] ss:$8 sps:$4 sm:$0xff] (!%p190_p2)   ;;  %v3945_v28 = vld [vmem:[%s6052_s1 + $0x70] ss:$8 sps:$4 sm:$0xff] (!%p190_p2)  }
   0xb   : > { %524 = vmatpush1.bf16.msra.mxu0 (!%p190_p2), %v3927_v3  ;;  %640 = vmatpush1.bf16.msra.mxu1 (!%p190_p2), %v3927_v3  ;;  %v3946_v30 = vld [vmem:[%s6052_s1 + $0x84] ss:$8 sps:$4 sm:$0xff] (!%p190_p2)   ;;  %v3948_v31 = vld [vmem:[%s6052_s1 + $0x80] ss:$8 sps:$4 sm:$0xff] (!%p190_p2)   ;;  %v3949_v32 = vld [vmem:[%s6052_s1 + $0x94] ss:$8 sps:$4 sm:$0xff] (!%p190_p2)  }
   0xc   : > { %525 = vmatprep.subr.bf16.mxu0 (!%p190_p2), %v3928_v4  ;;  %641 = vmatprep.subr.bf16.mxu1 (!%p190_p2), %v3928_v4  ;;  %v3951_v33 = vld [vmem:[%s6052_s1 + $0x90] ss:$8 sps:$4 sm:$0xff] (!%p190_p2)   ;;  %v3952_v34 = vld [vmem:[%s6052_s1 + $0xa4] ss:$8 sps:$4 sm:$0xff] (!%p190_p2)   ;;  %v3954_v35 = vld [vmem:[%s6052_s1 + $0xa0] ss:$8 sps:$4 sm:$0xff] (!%p190_p2)  }
   0xd   : > { %s6068_s30 = smov (!%p219_p3, %s3452_s30), 31  ;;  %v3955_v36 = vld [vmem:[%s6052_s1 + $0xb4] ss:$8 sps:$4 sm:$0xff]   ;;  %v3957_v37 = vld [vmem:[%s6052_s1 + $0xb0] ss:$8 sps:$4 sm:$0xff]  }
   0xe   : > { %s3833_s16 = sshll.u32 %s6068_s30, 3  ;;  %v3958_v38 = vld [vmem:[%s6052_s1 + $0xc4] ss:$8 sps:$4 sm:$0xff]   ;;  %v3960_v39 = vld [vmem:[%s6052_s1 + $0xc0] ss:$8 sps:$4 sm:$0xff]  }
   0xf   : > { %526 = vmatpush1.bf16.msra.mxu0 %v3930_v5  ;;  %642 = vmatpush1.bf16.msra.mxu1 %v3930_v5  ;;  %s4313_s22 = scalar_lea.vmem %s6051_s0, %s3833_s16  ;;  %v3961_v40 = vld [vmem:[%s6052_s1 + $0xd4] ss:$8 sps:$4 sm:$0xff]   ;;  %v3963_v41 = vld [vmem:[%s6052_s1 + $0xd0] ss:$8 sps:$4 sm:$0xff]   ;;  %v3964_v43 = vld [vmem:[%s6052_s1 + $0xe4] ss:$8 sps:$4 sm:$0xff]   ;;  %s6014_s14 = scalar_lea.vmem %s6056_s5, %s3833_s16 }
  0x10   : > { %527 = vmatprep.subr.bf16.mxu0 %v3931_v6  ;;  %643 = vmatprep.subr.bf16.mxu1 %v3931_v6  ;;  %v4322_v13 = vld [vmem:[%s4313_s22] sm:$0xff]  ;;  %v4325_v14 = vld [vmem:[%s4313_s22 + $0x8] sm:$0xff]  ;;  %v4391_v42 = vld [vmem:[%s4313_s22 + $0x10] sm:$0xff] }
  0x11   : > { %v241_v15 = vunpack.c.h.bf16 %v4322_v13  ;;  %v243_v16 = vunpack.c.h.bf16 %v4325_v14  ;;  %v4330_v17 = vld [vmem:[%s4313_s22 + $0x40] sm:$0xff]  ;;  %v4333_v18 = vld [vmem:[%s4313_s22 + $0x48] sm:$0xff]  ;;  %v4397_v44 = vld [vmem:[%s4313_s22 + $0x18] sm:$0xff]  ;;  %v240_v48 = vunpack.c.l.bf16 %v4322_v13  ;;  %v242_v49 = vunpack.c.l.bf16 %v4325_v14 }
  0x12   : > { %v265_v20 = vunpack.c.h.bf16 %v4330_v17  ;;  %v267_v21 = vunpack.c.h.bf16 %v4333_v18  ;;  %v4400_v45 = vld [vmem:[%s4313_s22 + $0x50] sm:$0xff]  ;;  %v4403_v46 = vld [vmem:[%s4313_s22 + $0x58] sm:$0xff]  ;;  %v3966_v47 = vld [vmem:[%s6052_s1 + $0xe0] ss:$8 sps:$4 sm:$0xff]   ;;  %v264_v51 = vunpack.c.l.bf16 %v4330_v17  ;;  %v266_v52 = vunpack.c.l.bf16 %v4333_v18 }
  0x13   : > { %528 = vmatpush1.bf16.msra.mxu0 %v3933_v7  ;;  %644 = vmatpush1.bf16.msra.mxu1 %v3933_v7  ;;  %v314_v23 = vmax.f32 %v241_v15, 0.0  ;;  %v316_v24 = vmax.f32 %v243_v16, 0.0  ;;  %v3967_v50 = vld [vmem:[%s6052_s1 + $0xf4] ss:$8 sps:$4 sm:$0xff]   ;;  %v245_v53 = vunpack.c.h.bf16 %v4391_v42  ;;  %v247_v54 = vunpack.c.h.bf16 %v4397_v44  ;;  %v3969_v57 = vld [vmem:[%s6052_s1 + $0xf0] ss:$8 sps:$4 sm:$0xff]  }
  0x14   : > { %529 = vmatprep.subr.bf16.mxu0 %v3934_v8  ;;  %645 = vmatprep.subr.bf16.mxu1 %v3934_v8  ;;  %v338_v25 = vmax.f32 %v265_v20, 0.0  ;;  %v340_v26 = vmax.f32 %v267_v21, 0.0  ;;  %v269_v55 = vunpack.c.h.bf16 %v4400_v45  ;;  %v271_v56 = vunpack.c.h.bf16 %v4403_v46  ;;  %v4427_v60 = vld [vmem:[%s4313_s22 + $0x20] sm:$0xff]  ;;  %v4430_v61 = vld [vmem:[%s4313_s22 + $0x28] sm:$0xff] }
  0x15   : > { %v330_v27 = vpack.c.bf16 %v316_v24, %v314_v23  ;;  %v313_v58 = vmax.f32 %v240_v48, 0.0  ;;  %v315_v59 = vmax.f32 %v242_v49, 0.0  ;;  %v337_v62 = vmax.f32 %v264_v51, 0.0  ;;  %v4439_v1 = vld [vmem:[%s4313_s22 + $0x60] sm:$0xff]  ;;  %v4442_v2 = vld [vmem:[%s4313_s22 + $0x68] sm:$0xff] }
  0x16   : > { %v354_v29 = vpack.c.bf16 %v340_v26, %v338_v25  ;;  %v339_v63 = vmax.f32 %v266_v52, 0.0  ;;  %v318_v0 = vmax.f32 %v245_v53, 0.0  ;;  %v3972_v3 = vld [vmem:[%s6052_s1 + $0x104] ss:$8 sps:$4 sm:$0xff]   ;;  %v320_v4 = vmax.f32 %v247_v54, 0.0 }
  0x17   : > { %530 = vmatpush1.bf16.msra.mxu0 %v3936_v9  ;;  %646 = vmatpush1.bf16.msra.mxu1 %v3936_v9  ;;  %v342_v5 = vmax.f32 %v269_v55, 0.0  ;;  %v344_v6 = vmax.f32 %v271_v56, 0.0  ;;  %v244_v7 = vunpack.c.l.bf16 %v4391_v42  ;;  %v246_v8 = vunpack.c.l.bf16 %v4397_v44  ;;  %v3970_v23 = vld [vmem:[%s6052_s1 + $0x100] ss:$8 sps:$4 sm:$0xff]  }
  0x18   : > { %531 = vmatprep.subr.bf16.mxu0 %v3937_v10  ;;  %647 = vmatprep.subr.bf16.mxu1 %v3937_v10  ;;  %v268_v9 = vunpack.c.l.bf16 %v4400_v45  ;;  %v270_v10 = vunpack.c.l.bf16 %v4403_v46  ;;  %v332_v24 = vpack.c.bf16 %v320_v4, %v318_v0  ;;  %v273_v26 = vunpack.c.h.bf16 %v4439_v1  ;;  %v4021_v46 = vld [vmem:[%s6052_s1 + $0x210] ss:$8 sps:$4 sm:$0xff]  }
  0x19   : > { %553 = vmatprep.mubr.bf16.mxu0 %v330_v27  ;;  %669 = vmatprep.mubr.bf16.mxu1 %v354_v29  ;;  %v356_v25 = vpack.c.bf16 %v344_v6, %v342_v5  ;;  %v275_v27 = vunpack.c.h.bf16 %v4442_v2  ;;  %v317_v29 = vmax.f32 %v244_v7, 0.0 }
  0x1b   : > { %532 = vmatpush1.bf16.msra.mxu0 %v3939_v11  ;;  %648 = vmatpush1.bf16.msra.mxu1 %v3939_v11  ;;  %v329_v11 = vpack.c.bf16 %v315_v59, %v313_v58  ;;  %v250_v58 = vunpack.c.l.bf16 %v4430_v61 }
  0x1c   : > { %533 = vmatprep.subr.bf16.mxu0 %v3940_v12  ;;  %649 = vmatprep.subr.bf16.mxu1 %v3940_v12  ;;  %v353_v12 = vpack.c.bf16 %v339_v63, %v337_v62  ;;  %v272_v62 = vunpack.c.l.bf16 %v4439_v1  ;;  %v274_v63 = vunpack.c.l.bf16 %v4442_v2 }
  0x1f   : > { %534 = vmatpush1.bf16.msra.mxu0 %v3942_v19  ;;  %650 = vmatpush1.bf16.msra.mxu1 %v3942_v19  ;;  %v249_v19 = vunpack.c.h.bf16 %v4427_v60 }
  0x20   : > { %535 = vmatprep.subr.bf16.mxu0 %v3943_v22  ;;  %651 = vmatprep.subr.bf16.mxu1 %v3943_v22  ;;  %v251_v22 = vunpack.c.h.bf16 %v4430_v61 }
  0x23   : > { %536 = vmatpush1.bf16.msra.mxu0 %v3945_v28  ;;  %652 = vmatpush1.bf16.msra.mxu1 %v3945_v28  ;;  %v3975_v28 = vld [vmem:[%s6052_s1 + $0x114] ss:$8 sps:$4 sm:$0xff]  }
  0x24   : > { %537 = vmatprep.subr.bf16.mxu0 %v3946_v30  ;;  %653 = vmatprep.subr.bf16.mxu1 %v3946_v30  ;;  %v319_v30 = vmax.f32 %v246_v8, 0.0 }
  0x27   : > { %538 = vmatpush1.bf16.msra.mxu0 %v3948_v31  ;;  %654 = vmatpush1.bf16.msra.mxu1 %v3948_v31  ;;  %v341_v31 = vmax.f32 %v268_v9, 0.0 }
  0x28   : > { %539 = vmatprep.subr.bf16.mxu0 %v3949_v32  ;;  %655 = vmatprep.subr.bf16.mxu1 %v3949_v32  ;;  %v343_v32 = vmax.f32 %v270_v10, 0.0 }
  0x2b   : > { %540 = vmatpush1.bf16.msra.mxu0 %v3951_v33  ;;  %656 = vmatpush1.bf16.msra.mxu1 %v3951_v33  ;;  %v4476_v33 = vld [vmem:[%s4313_s22 + $0x30] sm:$0xff] }
  0x2c   : > { %541 = vmatprep.subr.bf16.mxu0 %v3952_v34  ;;  %657 = vmatprep.subr.bf16.mxu1 %v3952_v34  ;;  %v322_v34 = vmax.f32 %v249_v19, 0.0  ;;  %v253_v0 = vunpack.c.h.bf16 %v4476_v33 }
  0x2f   : > { %542 = vmatpush1.bf16.msra.mxu0 %v3954_v35  ;;  %658 = vmatpush1.bf16.msra.mxu1 %v3954_v35  ;;  %v324_v35 = vmax.f32 %v251_v22, 0.0 }
  0x30   : > { %543 = vmatprep.subr.bf16.mxu0 %v3955_v36  ;;  %659 = vmatprep.subr.bf16.mxu1 %v3955_v36  ;;  %v4483_v36 = vld [vmem:[%s4313_s22 + $0x38] sm:$0xff] }
  0x31   : > { %v334_v59 = vpack.c.bf16 %v324_v35, %v322_v34  ;;  %v6058_v5 = vunpack.c.h.bf16 %v4483_v36  ;;  %v3984_v35 = vld [vmem:[%s6052_s1 + $0x144] ss:$8 sps:$4 sm:$0xff]  }
  0x33   : > { %544 = vmatpush1.bf16.msra.mxu0 %v3957_v37  ;;  %660 = vmatpush1.bf16.msra.mxu1 %v3957_v37  ;;  %v4486_v37 = vld [vmem:[%s4313_s22 + $0x70] sm:$0xff] }
  0x34   : > { %545 = vmatprep.subr.bf16.mxu0 %v3958_v38  ;;  %661 = vmatprep.subr.bf16.mxu1 %v3958_v38  ;;  %v4489_v38 = vld [vmem:[%s4313_s22 + $0x78] sm:$0xff]  ;;  %v6061_v6 = vunpack.c.h.bf16 %v4486_v37 }
  0x37   : > { %546 = vmatpush1.bf16.msra.mxu0 %v3960_v39  ;;  %662 = vmatpush1.bf16.msra.mxu1 %v3960_v39  ;;  %v3973_v39 = vld [vmem:[%s6052_s1 + $0x110] ss:$8 sps:$4 sm:$0xff]  }
  0x38   : > { %547 = vmatprep.subr.bf16.mxu0 %v3961_v40  ;;  %663 = vmatprep.subr.bf16.mxu1 %v3961_v40  ;;  %v346_v40 = vmax.f32 %v273_v26, 0.0 }
  0x3b   : > { %548 = vmatpush1.bf16.msra.mxu0 %v3963_v41  ;;  %664 = vmatpush1.bf16.msra.mxu1 %v3963_v41  ;;  %v348_v41 = vmax.f32 %v275_v27, 0.0 }
  0x3c   : > { %549 = vmatprep.subr.bf16.mxu0 %v3964_v43  ;;  %665 = vmatprep.subr.bf16.mxu1 %v3964_v43  ;;  %v3978_v43 = vld [vmem:[%s6052_s1 + $0x124] ss:$8 sps:$4 sm:$0xff]  }
  0x3d   : > { %v358_v4 = vpack.c.bf16 %v348_v41, %v346_v40  ;;  %v252_v40 = vunpack.c.l.bf16 %v4476_v33 }
  0x3f   : > { %550 = vmatpush1.bf16.msra.mxu0 %v3966_v47  ;;  %666 = vmatpush1.bf16.msra.mxu1 %v3966_v47  ;;  %v331_v47 = vpack.c.bf16 %v319_v30, %v317_v29  ;;  %v326_v29 = vmax.f32 %v253_v0, 0.0  ;;  %v3979_v30 = vld [vmem:[%s6052_s1 + $0x130] ss:$8 sps:$4 sm:$0xff]  }
  0x40   : > { %551 = vmatprep.subr.bf16.mxu0 %v3967_v50  ;;  %667 = vmatprep.subr.bf16.mxu1 %v3967_v50  ;;  %v355_v50 = vpack.c.bf16 %v343_v32, %v341_v31  ;;  %v328_v31 = vmax.f32 %v6058_v5, 0.0  ;;  %v350_v32 = vmax.f32 %v6061_v6, 0.0 }
  0x43   : > { %552 = vmatpush1.bf16.msra.mxu0 %v3969_v57  ;;  %668 = vmatpush1.bf16.msra.mxu1 %v3969_v57  ;;  %v248_v57 = vunpack.c.l.bf16 %v4427_v60 }
  0x44   : > { %985 = vmatprep.subr.bf16.mxu0 %v3972_v3  ;;  %1101 = vmatprep.subr.bf16.mxu1 %v3972_v3  ;;  %v3976_v3 = vld [vmem:[%s6052_s1 + $0x120] ss:$8 sps:$4 sm:$0xff]  }
  0x46   : > { %554 = vmatmul.mubr.bf16.vlgmr.msra.gmra.mrb[0].mxu0 %v329_v11  ;;  %670 = vmatmul.mubr.bf16.vlgmr.msra.gmra.mrb[0].mxu1 %v353_v12  ;;  %v6057_v11 = vunpack.c.h.bf16 %v4489_v38  ;;  %v3981_v12 = vld [vmem:[%s6052_s1 + $0x134] ss:$8 sps:$4 sm:$0xff]  }
  0x47   : > { %563 = vmatprep.mubr.bf16.mxu0 %v332_v24  ;;  %679 = vmatprep.mubr.bf16.mxu1 %v356_v25  ;;  %v323_v24 = vmax.f32 %v250_v58, 0.0  ;;  %v345_v25 = vmax.f32 %v272_v62, 0.0 }
  0x48   : > { %986 = vmatpush1.bf16.msra.mxu0 %v3970_v23  ;;  %1102 = vmatpush1.bf16.msra.mxu1 %v3970_v23  ;;  %v321_v23 = vmax.f32 %v248_v57, 0.0  ;;  %v352_v34 = vmax.f32 %v6057_v11, 0.0 }
  0x49   : > { %987 = vmatprep.subr.bf16.mxu0 %v3975_v28  ;;  %1103 = vmatprep.subr.bf16.mxu1 %v3975_v28  ;;  %v347_v28 = vmax.f32 %v274_v63, 0.0 }
  0x4a   : > { %v360_v11 = vpack.c.bf16 %v352_v34, %v350_v32  ;;  %v3988_v32 = vld [vmem:[%s6052_s1 + $0x160] ss:$8 sps:$4 sm:$0xff]   ;;  %v3993_v34 = vld [vmem:[%s6052_s1 + $0x174] ss:$8 sps:$4 sm:$0xff]  }
  0x4b   : > { %v357_v41 = vpack.c.bf16 %v347_v28, %v345_v25  ;;  %v3985_v28 = vld [vmem:[%s6052_s1 + $0x150] ss:$8 sps:$4 sm:$0xff]  }
  0x4c   : > { %988 = vmatpush1.bf16.msra.mxu0 %v3973_v39  ;;  %1104 = vmatpush1.bf16.msra.mxu1 %v3973_v39  ;;  %v333_v39 = vpack.c.bf16 %v323_v24, %v321_v23 }
  0x4d   : > { %989 = vmatprep.subr.bf16.mxu0 %v3978_v43  ;;  %1105 = vmatprep.subr.bf16.mxu1 %v3978_v43  ;;  %v6060_v43 = vunpack.c.l.bf16 %v4483_v36 }
  0x4e   : > { %564 = vmatmul.mubr.bf16.gmra.mrb[4].mxu0 %v331_v47  ;;  %680 = vmatmul.mubr.bf16.gmra.mrb[4].mxu1 %v355_v50  ;;  %v276_v47 = vunpack.c.l.bf16 %v4486_v37  ;;  %v6059_v50 = vunpack.c.l.bf16 %v4489_v38 }
  0x4f   : > { %573 = vmatprep.mubr.bf16.mxu0 %v334_v59  ;;  %689 = vmatprep.mubr.bf16.mxu1 %v358_v4  ;;  %v3982_v59 = vld [vmem:[%s6052_s1 + $0x140] ss:$8 sps:$4 sm:$0xff]   ;;  %v336_v4 = vpack.c.bf16 %v328_v31, %v326_v29  ;;  %v327_v23 = vmax.f32 %v6060_v43, 0.0  ;;  %v3990_v29 = vld [vmem:[%s6052_s1 + $0x164] ss:$8 sps:$4 sm:$0xff]  }
  0x50   : > { %990 = vmatpush1.bf16.msra.mxu0 %v3976_v3  ;;  %1106 = vmatpush1.bf16.msra.mxu1 %v3976_v3  ;;  %v3987_v3 = vld [vmem:[%s6052_s1 + $0x154] ss:$8 sps:$4 sm:$0xff]   ;;  %v349_v24 = vmax.f32 %v276_v47, 0.0  ;;  %v351_v25 = vmax.f32 %v6059_v50, 0.0 }
  0x51   : > { %991 = vmatprep.subr.bf16.mxu0 %v3981_v12  ;;  %1107 = vmatprep.subr.bf16.mxu1 %v3981_v12  ;;  %v325_v12 = vmax.f32 %v252_v40, 0.0 }
  0x52   : > { %v359_v31 = vpack.c.bf16 %v351_v25, %v349_v24  ;;  %v4008_v24 = vld [vmem:[%s6052_s1 + $0x1c4] ss:$8 sps:$4 sm:$0xff]   ;;  %v4006_v25 = vld [vmem:[%s6052_s1 + $0x1c0] ss:$8 sps:$4 sm:$0xff]  }
  0x54   : > { %992 = vmatpush1.bf16.msra.mxu0 %v3979_v30  ;;  %1108 = vmatpush1.bf16.msra.mxu1 %v3979_v30  ;;  %v335_v30 = vpack.c.bf16 %v327_v23, %v325_v12  ;;  %v4005_v12 = vld [vmem:[%s6052_s1 + $0x1b4] ss:$8 sps:$4 sm:$0xff]   ;;  %v4003_v23 = vld [vmem:[%s6052_s1 + $0x1b0] ss:$8 sps:$4 sm:$0xff]  }
  0x55   : > { %993 = vmatprep.subr.bf16.mxu0 %v3984_v35  ;;  %1109 = vmatprep.subr.bf16.mxu1 %v3984_v35  ;;  %v3996_v35 = vld [vmem:[%s6052_s1 + $0x184] ss:$8 sps:$4 sm:$0xff]  }
  0x56   : > { %574 = vmatmul.mubr.bf16.gmra.mrb[8].mxu0 %v333_v39  ;;  %690 = vmatmul.mubr.bf16.gmra.mrb[8].mxu1 %v357_v41  ;;  %v3994_v39 = vld [vmem:[%s6052_s1 + $0x180] ss:$8 sps:$4 sm:$0xff]   ;;  %v3999_v41 = vld [vmem:[%s6052_s1 + $0x194] ss:$8 sps:$4 sm:$0xff]  }
  0x57   : > { %583 = vmatprep.mubr.bf16.mxu0 %v336_v4  ;;  %699 = vmatprep.mubr.bf16.mxu1 %v360_v11  ;;  %v3991_v11 = vld [vmem:[%s6052_s1 + $0x170] ss:$8 sps:$4 sm:$0xff]   ;;  %v4002_v4 = vld [vmem:[%s6052_s1 + $0x1a4] ss:$8 sps:$4 sm:$0xff]  }
  0x58   : > { %994 = vmatpush1.bf16.msra.mxu0 %v3982_v59  ;;  %1110 = vmatpush1.bf16.msra.mxu1 %v3982_v59  ;;  %v3997_v59 = vld [vmem:[%s6052_s1 + $0x190] ss:$8 sps:$4 sm:$0xff]  }
  0x59   : > { %995 = vmatprep.subr.bf16.mxu0 %v3987_v3  ;;  %1111 = vmatprep.subr.bf16.mxu1 %v3987_v3  ;;  %v4000_v3 = vld [vmem:[%s6052_s1 + $0x1a0] ss:$8 sps:$4 sm:$0xff]  }
  0x5c   : > { %996 = vmatpush1.bf16.msra.mxu0 %v3985_v28  ;;  %1112 = vmatpush1.bf16.msra.mxu1 %v3985_v28  ;;  %v4011_v28 = vld [vmem:[%s6052_s1 + $0x1d4] ss:$8 sps:$4 sm:$0xff]  }
  0x5d   : > { %997 = vmatprep.subr.bf16.mxu0 %v3990_v29  ;;  %1113 = vmatprep.subr.bf16.mxu1 %v3990_v29  ;;  %v4009_v29 = vld [vmem:[%s6052_s1 + $0x1d0] ss:$8 sps:$4 sm:$0xff]  }
  0x5e   : > { %584 = vmatmul.mubr.bf16.gmra.mrb[12].mxu0 %v335_v30  ;;  %700 = vmatmul.mubr.bf16.gmra.mrb[12].mxu1 %v359_v31  ;;  %v4014_v30 = vld [vmem:[%s6052_s1 + $0x1e4] ss:$8 sps:$4 sm:$0xff]   ;;  %v4012_v31 = vld [vmem:[%s6052_s1 + $0x1e0] ss:$8 sps:$4 sm:$0xff]  }
  0x60   : > { %998 = vmatpush1.bf16.msra.mxu0 %v3988_v32  ;;  %1114 = vmatpush1.bf16.msra.mxu1 %v3988_v32  ;;  %v4017_v32 = vld [vmem:[%s6052_s1 + $0x1f4] ss:$8 sps:$4 sm:$0xff]  }
  0x61   : > { %999 = vmatprep.subr.bf16.mxu0 %v3993_v34  ;;  %1115 = vmatprep.subr.bf16.mxu1 %v3993_v34  ;;  %v4015_v34 = vld [vmem:[%s6052_s1 + $0x1f0] ss:$8 sps:$4 sm:$0xff]  }
  0x64   : > { %1000 = vmatpush1.bf16.msra.mxu0 %v3991_v11  ;;  %1116 = vmatpush1.bf16.msra.mxu1 %v3991_v11  ;;  %v4020_v11 = vld [vmem:[%s6052_s1 + $0x204] ss:$8 sps:$4 sm:$0xff]  }
  0x65   : > { %1001 = vmatprep.subr.bf16.mxu0 %v3996_v35  ;;  %1117 = vmatprep.subr.bf16.mxu1 %v3996_v35  ;;  %v611_v35 = vlaneseq }
  0x68   : > { %1002 = vmatpush1.bf16.msra.mxu0 %v3994_v39  ;;  %1118 = vmatpush1.bf16.msra.mxu1 %v3994_v39  ;;  %v612_v39 = vshrl.u32 %v611_v35, 7 }
  0x69   : > { %1003 = vmatprep.subr.bf16.mxu0 %v3999_v41  ;;  %1119 = vmatprep.subr.bf16.mxu1 %v3999_v41 }
  0x6a   : > { %v4621_v41 = vsub.s32 0, %v612_v39 }
  0x6c   : > { %1004 = vmatpush1.bf16.msra.mxu0 %v3997_v59  ;;  %1120 = vmatpush1.bf16.msra.mxu1 %v3997_v59  ;;  %v312_v59 = vld [vmem:[%s6053_s2] sm:$0x3] }
  0x6d   : > { %1005 = vmatprep.subr.bf16.mxu0 %v4002_v4  ;;  %1121 = vmatprep.subr.bf16.mxu1 %v4002_v4  ;;  %v4626_v4 = vsub.s32 1, %v612_v39 }
  0x70   : > { %1006 = vmatpush1.bf16.msra.mxu0 %v4000_v3  ;;  %1122 = vmatpush1.bf16.msra.mxu1 %v4000_v3  ;;  %v4629_v3 = vrot.slane %v312_v59, %v4621_v41 }
  0x71   : > { %1007 = vmatprep.subr.bf16.mxu0 %v4005_v12  ;;  %1123 = vmatprep.subr.bf16.mxu1 %v4005_v12 }
  0x74   : > { %1008 = vmatpush1.bf16.msra.mxu0 %v4003_v23  ;;  %1124 = vmatpush1.bf16.msra.mxu1 %v4003_v23 }
  0x75   : > { %1009 = vmatprep.subr.bf16.mxu0 %v4008_v24  ;;  %1125 = vmatprep.subr.bf16.mxu1 %v4008_v24  ;;  %v4632_v24 = vrot.slane %v312_v59, %v4626_v4 }
  0x78   : > { %1010 = vmatpush1.bf16.msra.mxu0 %v4006_v25  ;;  %1126 = vmatpush1.bf16.msra.mxu1 %v4006_v25 }
  0x79   : > { %1011 = vmatprep.subr.bf16.mxu0 %v4011_v28  ;;  %1127 = vmatprep.subr.bf16.mxu1 %v4011_v28 }
  0x7c   : > { %1012 = vmatpush1.bf16.msra.mxu0 %v4009_v29  ;;  %1128 = vmatpush1.bf16.msra.mxu1 %v4009_v29 }
  0x7d   : > { %1013 = vmatprep.subr.bf16.mxu0 %v4014_v30  ;;  %1129 = vmatprep.subr.bf16.mxu1 %v4014_v30 }
  0x80   : > { %1014 = vmatpush1.bf16.msra.mxu0 %v4012_v31  ;;  %1130 = vmatpush1.bf16.msra.mxu1 %v4012_v31 }
  0x81   : > { %1015 = vmatprep.subr.bf16.mxu0 %v4017_v32  ;;  %1131 = vmatprep.subr.bf16.mxu1 %v4017_v32 }
  0x84   : > { %1016 = vmatpush1.bf16.msra.mxu0 %v4015_v34  ;;  %1132 = vmatpush1.bf16.msra.mxu1 %v4015_v34 }
  0x85   : > { %1449 = vmatprep.subr.bf16.mxu0 %v4020_v11  ;;  %1565 = vmatprep.subr.bf16.mxu1 %v4020_v11 }
 0x119   : > { %v555_v12 = vpop.f32.mrb[0].mxu0  ;;  %v671_v23 = vpop.f32.mrb[0].mxu1 }
 0x11a   : > { %v594_v25 = vadd.f32 %v555_v12, %v240_v48  ;;  %v710_v28 = vadd.f32 %v671_v23, %v264_v51  ;;  %v557_v29 = vpop.f32.mrb[1].mxu0  ;;  %v673_v30 = vpop.f32.mrb[1].mxu1 }
 0x11b   : > { %v595_v31 = vadd.f32 %v557_v29, %v241_v15  ;;  %v711_v32 = vadd.f32 %v673_v30, %v265_v20  ;;  %v559_v34 = vpop.f32.mrb[2].mxu0  ;;  %v675_v11 = vpop.f32.mrb[2].mxu1 }
 0x11c   : > { %v4643_v35 = vadd.f32 %v4629_v3, %v594_v25  ;;  %v596_v39 = vadd.f32 %v559_v34, %v242_v49  ;;  %v712_v48 = vadd.f32 %v675_v11, %v266_v52  ;;  %v561_v51 = vpop.f32.mrb[3].mxu0  ;;  %v677_v59 = vpop.f32.mrb[3].mxu1  ;;  %v4660_v20 = vadd.f32 %v710_v28, %v4629_v3 }
 0x11d   : > { %v4650_v12 = vadd.f32 %v4632_v24, %v595_v31  ;;  %v4653_v13 = vadd.f32 %v711_v32, %v4632_v24  ;;  %v597_v15 = vadd.f32 %v561_v51, %v243_v16  ;;  %v713_v17 = vadd.f32 %v677_v59, %v267_v21 }
 0x11e   : > { %v4663_v49 = vadd.f32 %v4629_v3, %v596_v39  ;;  %v4666_v52 = vadd.f32 %v712_v48, %v4629_v3  ;;  %v777_v14 = vmax.f32 %v4643_v35, 0.0  ;;  %v801_v34 = vmax.f32 %v4660_v20, 0.0 }
 0x11f   : > { %v4669_v23 = vadd.f32 %v4632_v24, %v597_v15  ;;  %v4672_v25 = vadd.f32 %v713_v17, %v4632_v24  ;;  %v778_v21 = vmax.f32 %v4650_v12, 0.0  ;;  %v802_v28 = vmax.f32 %v4653_v13, 0.0 }
 0x120   : > { %v779_v16 = vmax.f32 %v4663_v49, 0.0  ;;  %v803_v18 = vmax.f32 %v4666_v52, 0.0 }
 0x121   : > { %v780_v29 = vmax.f32 %v4669_v23, 0.0  ;;  %v804_v30 = vmax.f32 %v4672_v25, 0.0  ;;  %v565_v31 = vpop.f32.mrb[4].mxu0  ;;  %v681_v32 = vpop.f32.mrb[4].mxu1 }
 0x122   : > { %v793_v11 = vpack.c.bf16 %v779_v16, %v777_v14  ;;  %v598_v39 = vadd.f32 %v565_v31, %v244_v7  ;;  %v714_v48 = vadd.f32 %v681_v32, %v268_v9  ;;  %v567_v51 = vpop.f32.mrb[5].mxu0  ;;  %v683_v59 = vpop.f32.mrb[5].mxu1  ;;  %v4018_v14 = vld [vmem:[%s6052_s1 + $0x200] ss:$8 sps:$4 sm:$0xff]   ;;  %v817_v7 = vpack.c.bf16 %v803_v18, %v801_v34 }
 0x123   : > { %v599_v15 = vadd.f32 %v567_v51, %v245_v53  ;;  %v715_v17 = vadd.f32 %v683_v59, %v269_v55  ;;  %v569_v5 = vpop.f32.mrb[6].mxu0  ;;  %v685_v50 = vpop.f32.mrb[6].mxu1  ;;  %v794_v43 = vpack.c.bf16 %v780_v29, %v778_v21  ;;  %v818_v6 = vpack.c.bf16 %v804_v30, %v802_v28  ;;  %v4023_v55 = vld [vmem:[%s6052_s1 + $0x214] ss:$8 sps:$4 sm:$0xff]  }
 0x124   : > { %v4694_v16 = vadd.f32 %v4629_v3, %v598_v39  ;;  %v600_v9 = vadd.f32 %v569_v5, %v246_v8  ;;  %v716_v42 = vadd.f32 %v685_v50, %v270_v10  ;;  %v571_v45 = vpop.f32.mrb[7].mxu0  ;;  %v687_v53 = vpop.f32.mrb[7].mxu1  ;;  %v4714_v10 = vadd.f32 %v714_v48, %v4629_v3 }
 0x125   : > { %v4704_v21 = vadd.f32 %v4632_v24, %v599_v15  ;;  %v4707_v18 = vadd.f32 %v715_v17, %v4632_v24  ;;  %v601_v28 = vadd.f32 %v571_v45, %v247_v54  ;;  %v717_v8 = vadd.f32 %v687_v53, %v271_v56  ;;  %1017 = vmatprep.mubr.bf16.mxu0 %v794_v43 }
 0x126   : > { %v4717_v5 = vadd.f32 %v4629_v3, %v600_v9  ;;  %v4720_v50 = vadd.f32 %v716_v42, %v4629_v3  ;;  %1133 = vmatprep.mubr.bf16.mxu1 %v818_v6  ;;  %1018 = vmatmul.mubr.bf16.vlgmr.msra.gmra.mrb[16].mxu0 %v793_v11  ;;  %v781_v54 = vmax.f32 %v4694_v16, 0.0  ;;  %v805_v39 = vmax.f32 %v4714_v10, 0.0 }
 0x127   : > { %v4723_v29 = vadd.f32 %v4632_v24, %v601_v28  ;;  %v4726_v44 = vadd.f32 %v717_v8, %v4632_v24  ;;  %1134 = vmatmul.mubr.bf16.vlgmr.msra.gmra.mrb[16].mxu1 %v817_v7  ;;  %1450 = vmatpush1.bf16.msra.mxu0 %v4018_v14  ;;  %v782_v6 = vmax.f32 %v4704_v21, 0.0  ;;  %v806_v30 = vmax.f32 %v4707_v18, 0.0  ;;  %v4024_v28 = vld [vmem:[%s6052_s1 + $0x220] ss:$8 sps:$4 sm:$0xff]  }
 0x128   : > { %v783_v56 = vmax.f32 %v4717_v5, 0.0  ;;  %v807_v43 = vmax.f32 %v4720_v50, 0.0  ;;  %1566 = vmatpush1.bf16.msra.mxu1 %v4018_v14  ;;  %1451 = vmatprep.subr.bf16.mxu0 %v4023_v55 }
 0x129   : > { %v784_v31 = vmax.f32 %v4723_v29, 0.0  ;;  %v808_v32 = vmax.f32 %v4726_v44, 0.0  ;;  %v575_v34 = vpop.f32.mrb[8].mxu0  ;;  %v691_v11 = vpop.f32.mrb[8].mxu1  ;;  %1567 = vmatprep.subr.bf16.mxu1 %v4023_v55 }
 0x12a   : > { %v602_v48 = vadd.f32 %v575_v34, %v248_v57  ;;  %v718_v51 = vadd.f32 %v691_v11, %v272_v62  ;;  %v577_v59 = vpop.f32.mrb[9].mxu0  ;;  %v693_v15 = vpop.f32.mrb[9].mxu1  ;;  %v795_v17 = vpack.c.bf16 %v783_v56, %v781_v54  ;;  %v4026_v57 = vld [vmem:[%s6052_s1 + $0x224] ss:$8 sps:$4 sm:$0xff]  }
 0x12b   : > { %v603_v14 = vadd.f32 %v577_v59, %v249_v19  ;;  %v719_v7 = vadd.f32 %v693_v15, %v273_v26  ;;  %v579_v9 = vpop.f32.mrb[10].mxu0  ;;  %v695_v42 = vpop.f32.mrb[10].mxu1  ;;  %v796_v45 = vpack.c.bf16 %v784_v31, %v782_v6  ;;  %v820_v53 = vpack.c.bf16 %v808_v32, %v806_v30  ;;  %1452 = vmatpush1.bf16.msra.mxu0 %v4021_v46  ;;  %v4027_v30 = vld [vmem:[%s6052_s1 + $0x230] ss:$8 sps:$4 sm:$0xff]  }
 0x12c   : > { %v4751_v62 = vadd.f32 %v4629_v3, %v602_v48  ;;  %v604_v55 = vadd.f32 %v579_v9, %v250_v58  ;;  %v720_v60 = vadd.f32 %v695_v42, %v274_v63  ;;  %v581_v1 = vpop.f32.mrb[11].mxu0  ;;  %v697_v19 = vpop.f32.mrb[11].mxu1  ;;  %v819_v26 = vpack.c.bf16 %v807_v43, %v805_v39  ;;  %1568 = vmatpush1.bf16.msra.mxu1 %v4021_v46  ;;  %v4029_v46 = vld [vmem:[%s6052_s1 + $0x234] ss:$8 sps:$4 sm:$0xff]  }
 0x12d   : > { %v4761_v8 = vadd.f32 %v4632_v24, %v603_v14  ;;  %v4764_v54 = vadd.f32 %v719_v7, %v4632_v24  ;;  %v605_v58 = vadd.f32 %v581_v1, %v251_v22  ;;  %v721_v63 = vadd.f32 %v697_v19, %v275_v27  ;;  %1027 = vmatprep.mubr.bf16.mxu0 %v796_v45 }
 0x12e   : > { %v4774_v56 = vadd.f32 %v718_v51, %v4629_v3  ;;  %v4777_v43 = vadd.f32 %v4629_v3, %v604_v55  ;;  %v4780_v6 = vadd.f32 %v720_v60, %v4629_v3  ;;  %1143 = vmatprep.mubr.bf16.mxu1 %v820_v53  ;;  %1028 = vmatmul.mubr.bf16.gmra.mrb[20].mxu0 %v795_v17  ;;  %v785_v51 = vmax.f32 %v4751_v62, 0.0 }
 0x12f   : > { %v4783_v61 = vadd.f32 %v4632_v24, %v605_v58  ;;  %v4786_v2 = vadd.f32 %v721_v63, %v4632_v24  ;;  %1144 = vmatmul.mubr.bf16.gmra.mrb[20].mxu1 %v819_v26  ;;  %1453 = vmatprep.subr.bf16.mxu0 %v4026_v57  ;;  %v786_v31 = vmax.f32 %v4761_v8, 0.0  ;;  %v810_v32 = vmax.f32 %v4764_v54, 0.0 }
 0x130   : > { %v787_v22 = vmax.f32 %v4777_v43, 0.0  ;;  %v811_v27 = vmax.f32 %v4780_v6, 0.0  ;;  %1569 = vmatprep.subr.bf16.mxu1 %v4026_v57  ;;  %1454 = vmatpush1.bf16.msra.mxu0 %v4024_v28  ;;  %v809_v59 = vmax.f32 %v4774_v56, 0.0  ;;  %v6062_v42 = vunpack.c.h.bf16 %v4486_v37  ;;  %v4030_v37 = vld [vmem:[%s6052_s1 + $0x240] ss:$8 sps:$4 sm:$0xff]  }
 0x131   : > { %v788_v34 = vmax.f32 %v4783_v61, 0.0  ;;  %v812_v11 = vmax.f32 %v4786_v2, 0.0  ;;  %v585_v39 = vpop.f32.mrb[12].mxu0  ;;  %v701_v48 = vpop.f32.mrb[12].mxu1  ;;  %1570 = vmatpush1.bf16.msra.mxu1 %v4024_v28  ;;  %1455 = vmatprep.subr.bf16.mxu0 %v4029_v46  ;;  %v6063_v1 = vunpack.c.l.bf16 %v4483_v36  ;;  %v6064_v19 = vunpack.c.l.bf16 %v4489_v38 }
 0x132   : > { %v606_v15 = vadd.f32 %v585_v39, %v252_v40  ;;  %v722_v17 = vadd.f32 %v701_v48, %v276_v47  ;;  %v587_v14 = vpop.f32.mrb[13].mxu0  ;;  %v703_v7 = vpop.f32.mrb[13].mxu1  ;;  %1571 = vmatprep.subr.bf16.mxu1 %v4029_v46  ;;  %v4032_v40 = vld [vmem:[%s6052_s1 + $0x244] ss:$8 sps:$4 sm:$0xff]   ;;  %v821_v58 = vpack.c.bf16 %v811_v27, %v809_v59 }
 0x133   : > { %v607_v9 = vadd.f32 %v587_v14, %v253_v0  ;;  %v723_v45 = vadd.f32 %v703_v7, %v6062_v42  ;;  %v589_v53 = vpop.f32.mrb[14].mxu0  ;;  %v705_v57 = vpop.f32.mrb[14].mxu1  ;;  %v798_v55 = vpack.c.bf16 %v788_v34, %v786_v31  ;;  %v822_v60 = vpack.c.bf16 %v812_v11, %v810_v32  ;;  %v4033_v14 = vld [vmem:[%s6052_s1 + $0x250] ss:$8 sps:$4 sm:$0xff]  }
 0x134   : > { %v608_v47 = vadd.f32 %v589_v53, %v6063_v1  ;;  %v724_v26 = vadd.f32 %v705_v57, %v6064_v19  ;;  %v591_v28 = vpop.f32.mrb[15].mxu0  ;;  %v707_v33 = vpop.f32.mrb[15].mxu1  ;;  %v797_v0 = vpack.c.bf16 %v787_v22, %v785_v51  ;;  %1456 = vmatpush1.bf16.msra.mxu0 %v4027_v30  ;;  %v6065_v31 = vunpack.c.h.bf16 %v4483_v36  ;;  %v4035_v22 = vld [vmem:[%s6052_s1 + $0x254] ss:$8 sps:$4 sm:$0xff]   ;;  %v4038_v53 = vld [vmem:[%s6052_s1 + $0x264] ss:$8 sps:$4 sm:$0xff]  }
 0x135   : > { %v4818_v63 = vadd.f32 %v4632_v24, %v607_v9  ;;  %v4821_v46 = vadd.f32 %v723_v45, %v4632_v24  ;;  %v6066_v34 = vunpack.c.h.bf16 %v4489_v38  ;;  %1037 = vmatprep.mubr.bf16.mxu0 %v798_v55  ;;  %v4831_v27 = vadd.f32 %v4629_v3, %v606_v15  ;;  %1153 = vmatprep.mubr.bf16.mxu1 %v822_v60  ;;  %v4036_v55 = vld [vmem:[%s6052_s1 + $0x260] ss:$8 sps:$4 sm:$0xff]   ;;  %v4039_v1 = vld [vmem:[%s6052_s1 + $0x270] ss:$8 sps:$4 sm:$0xff]  }
 0x136   : > { %v609_v32 = vadd.f32 %v591_v28, %v6065_v31  ;;  %v4834_v39 = vadd.f32 %v4629_v3, %v608_v47  ;;  %v4837_v48 = vadd.f32 %v724_v26, %v4629_v3  ;;  %1038 = vmatmul.mubr.bf16.gmra.mrb[24].mxu0 %v797_v0  ;;  %v4840_v36 = vadd.f32 %v722_v17, %v4629_v3  ;;  %v4044_v47 = vld [vmem:[%s6052_s1 + $0x284] ss:$8 sps:$4 sm:$0xff]   ;;  %v4042_v19 = vld [vmem:[%s6052_s1 + $0x280] ss:$8 sps:$4 sm:$0xff]   ;;  %v4047_v26 = vld [vmem:[%s6052_s1 + $0x294] ss:$8 sps:$4 sm:$0xff]  }
 0x137   : > { %v725_v11 = vadd.f32 %v707_v33, %v6066_v34  ;;  %1154 = vmatmul.mubr.bf16.gmra.mrb[24].mxu1 %v821_v58  ;;  %1457 = vmatprep.subr.bf16.mxu0 %v4032_v40  ;;  %v790_v59 = vmax.f32 %v4818_v63, 0.0  ;;  %v814_v3 = vmax.f32 %v4821_v46, 0.0  ;;  %v789_v9 = vmax.f32 %v4831_v27, 0.0  ;;  %v4045_v28 = vld [vmem:[%s6052_s1 + $0x290] ss:$8 sps:$4 sm:$0xff]  }
 0x138   : > { %v4843_v38 = vadd.f32 %v4632_v24, %v609_v32  ;;  %v791_v15 = vmax.f32 %v4834_v39, 0.0  ;;  %1572 = vmatpush1.bf16.msra.mxu1 %v4027_v30  ;;  %1458 = vmatpush1.bf16.msra.mxu0 %v4030_v37  ;;  %v815_v17 = vmax.f32 %v4837_v48, 0.0  ;;  %v813_v42 = vmax.f32 %v4840_v36, 0.0  ;;  %v4050_v33 = vld [vmem:[%s6052_s1 + $0x2a4] ss:$8 sps:$4 sm:$0xff]  }
 0x139   : > { %v4846_v51 = vadd.f32 %v725_v11, %v4632_v24  ;;  %1573 = vmatprep.subr.bf16.mxu1 %v4032_v40  ;;  %1459 = vmatprep.subr.bf16.mxu0 %v4035_v22  ;;  %v4041_v40 = vld [vmem:[%s6052_s1 + $0x274] ss:$8 sps:$4 sm:$0xff]   ;;  %v4048_v0 = vld [vmem:[%s6052_s1 + $0x2a0] ss:$8 sps:$4 sm:$0xff]   ;;  %v4056_v31 = vld [vmem:[%s6052_s1 + $0x2c4] ss:$8 sps:$4 sm:$0xff]  }
 0x13a   : > { %v792_v7 = vmax.f32 %v4843_v38, 0.0  ;;  %v799_v57 = vpack.c.bf16 %v791_v15, %v789_v9  ;;  %v823_v60 = vpack.c.bf16 %v815_v17, %v813_v42  ;;  %v4053_v58 = vld [vmem:[%s6052_s1 + $0x2b4] ss:$8 sps:$4 sm:$0xff]   ;;  %v4054_v32 = vld [vmem:[%s6052_s1 + $0x2c0] ss:$8 sps:$4 sm:$0xff]  }
 0x13b   : > { %v816_v24 = vmax.f32 %v4846_v51, 0.0  ;;  %v4059_v34 = vld [vmem:[%s6052_s1 + $0x2d4] ss:$8 sps:$4 sm:$0xff]   ;;  %v4057_v11 = vld [vmem:[%s6052_s1 + $0x2d0] ss:$8 sps:$4 sm:$0xff]  }
 0x13c   : > { %v800_v30 = vpack.c.bf16 %v792_v7, %v790_v59  ;;  %1574 = vmatpush1.bf16.msra.mxu1 %v4030_v37  ;;  %1460 = vmatpush1.bf16.msra.mxu0 %v4033_v14  ;;  %v4051_v37 = vld [vmem:[%s6052_s1 + $0x2b0] ss:$8 sps:$4 sm:$0xff]   ;;  %v4060_v59 = vld [vmem:[%s6052_s1 + $0x2e0] ss:$8 sps:$4 sm:$0xff]   ;;  %v4065_v15 = vld [vmem:[%s6052_s1 + $0x2f4] ss:$8 sps:$4 sm:$0xff]  }
 0x13d   : > { %v824_v45 = vpack.c.bf16 %v816_v24, %v814_v3  ;;  %1575 = vmatprep.subr.bf16.mxu1 %v4035_v22  ;;  %1461 = vmatprep.subr.bf16.mxu0 %v4038_v53  ;;  %v4062_v22 = vld [vmem:[%s6052_s1 + $0x2e4] ss:$8 sps:$4 sm:$0xff]   ;;  %v3521_v17 = vld [vmem:[%s6053_s2 + $0x2] sm:$0x3] }
 0x13e   : > { %1047 = vmatprep.mubr.bf16.mxu0 %v800_v30  ;;  %v4068_v3 = vld [vmem:[%s6052_s1 + $0x304] ss:$8 sps:$4 sm:$0xff]   ;;  %v4926_v7 = vrot.slane %v3521_v17, %v4621_v41  ;;  %v4929_v9 = vrot.slane %v3521_v17, %v4626_v4 }
 0x13f   : > { %1163 = vmatprep.mubr.bf16.mxu1 %v824_v45  ;;  %1048 = vmatmul.mubr.bf16.gmra.mrb[28].mxu0 %v799_v57 }
 0x140   : > { %1164 = vmatmul.mubr.bf16.gmra.mrb[28].mxu1 %v823_v60  ;;  %1462 = vmatpush1.bf16.msra.mxu0 %v4036_v55 }
 0x141   : > { %1576 = vmatpush1.bf16.msra.mxu1 %v4033_v14  ;;  %1463 = vmatprep.subr.bf16.mxu0 %v4041_v40  ;;  %v4063_v14 = vld [vmem:[%s6052_s1 + $0x2f0] ss:$8 sps:$4 sm:$0xff]  }
 0x142   : > { %1577 = vmatprep.subr.bf16.mxu1 %v4038_v53 }
 0x144   : > { %1464 = vmatpush1.bf16.msra.mxu0 %v4039_v1 }
 0x145   : > { %1578 = vmatpush1.bf16.msra.mxu1 %v4036_v55  ;;  %1465 = vmatprep.subr.bf16.mxu0 %v4044_v47 }
 0x146   : > { %1579 = vmatprep.subr.bf16.mxu1 %v4041_v40 }
 0x148   : > { %1466 = vmatpush1.bf16.msra.mxu0 %v4042_v19 }
 0x149   : > { %1580 = vmatpush1.bf16.msra.mxu1 %v4039_v1  ;;  %1467 = vmatprep.subr.bf16.mxu0 %v4047_v26 }
 0x14a   : > { %1581 = vmatprep.subr.bf16.mxu1 %v4044_v47 }
 0x14c   : > { %1468 = vmatpush1.bf16.msra.mxu0 %v4045_v28 }
 0x14d   : > { %1582 = vmatpush1.bf16.msra.mxu1 %v4042_v19  ;;  %1469 = vmatprep.subr.bf16.mxu0 %v4050_v33 }
 0x14e   : > { %1583 = vmatprep.subr.bf16.mxu1 %v4047_v26 }
 0x150   : > { %1470 = vmatpush1.bf16.msra.mxu0 %v4048_v0 }
 0x151   : > { %1584 = vmatpush1.bf16.msra.mxu1 %v4045_v28  ;;  %1471 = vmatprep.subr.bf16.mxu0 %v4053_v58 }
 0x152   : > { %1585 = vmatprep.subr.bf16.mxu1 %v4050_v33 }
 0x154   : > { %1472 = vmatpush1.bf16.msra.mxu0 %v4051_v37 }
 0x155   : > { %1586 = vmatpush1.bf16.msra.mxu1 %v4048_v0  ;;  %1473 = vmatprep.subr.bf16.mxu0 %v4056_v31 }
 0x156   : > { %1587 = vmatprep.subr.bf16.mxu1 %v4053_v58 }
 0x158   : > { %1474 = vmatpush1.bf16.msra.mxu0 %v4054_v32 }
 0x159   : > { %1588 = vmatpush1.bf16.msra.mxu1 %v4051_v37  ;;  %1475 = vmatprep.subr.bf16.mxu0 %v4059_v34 }
 0x15a   : > { %1589 = vmatprep.subr.bf16.mxu1 %v4056_v31 }
 0x15c   : > { %1476 = vmatpush1.bf16.msra.mxu0 %v4057_v11 }
 0x15d   : > { %1590 = vmatpush1.bf16.msra.mxu1 %v4054_v32  ;;  %1477 = vmatprep.subr.bf16.mxu0 %v4062_v22 }
 0x15e   : > { %1591 = vmatprep.subr.bf16.mxu1 %v4059_v34 }
 0x160   : > { %1478 = vmatpush1.bf16.msra.mxu0 %v4060_v59 }
 0x161   : > { %1592 = vmatpush1.bf16.msra.mxu1 %v4057_v11  ;;  %1479 = vmatprep.subr.bf16.mxu0 %v4065_v15 }
 0x162   : > { %1593 = vmatprep.subr.bf16.mxu1 %v4062_v22 }
 0x164   : > { %1480 = vmatpush1.bf16.msra.mxu0 %v4063_v14 }
 0x165   : > { %1594 = vmatpush1.bf16.msra.mxu1 %v4060_v59  ;;  %1913 = vmatprep.subr.bf16.mxu0 %v4068_v3 }
 0x166   : > { %1595 = vmatprep.subr.bf16.mxu1 %v4065_v15 }
 0x169   : > { %1596 = vmatpush1.bf16.msra.mxu1 %v4063_v14 }
 0x16a   : > { %2029 = vmatprep.subr.bf16.mxu1 %v4068_v3 }
 0x1f9   : > { %v1019_v24 = vpop.f32.mrb[16].mxu0 }
 0x1fa   : > { %v1058_v42 = vadd.f32 %v1019_v24, %v4643_v35  ;;  %v1135_v30 = vpop.f32.mrb[16].mxu1  ;;  %v1021_v45 = vpop.f32.mrb[17].mxu0 }
 0x1fb   : > { %v1174_v53 = vadd.f32 %v1135_v30, %v4660_v20  ;;  %v1059_v57 = vadd.f32 %v1021_v45, %v4650_v12  ;;  %v1137_v55 = vpop.f32.mrb[17].mxu1  ;;  %v1023_v60 = vpop.f32.mrb[18].mxu0 }
 0x1fc   : > { %v4935_v40 = vadd.f32 %v4926_v7, %v1058_v42  ;;  %v1175_v1 = vadd.f32 %v1137_v55, %v4653_v13  ;;  %v1060_v47 = vadd.f32 %v1023_v60, %v4663_v49  ;;  %v1139_v19 = vpop.f32.mrb[18].mxu1  ;;  %v1025_v26 = vpop.f32.mrb[19].mxu0  ;;  %v4066_v60 = vld [vmem:[%s6052_s1 + $0x300] ss:$8 sps:$4 sm:$0xff]  }
 0x1fd   : > { %v4940_v28 = vadd.f32 %v1174_v53, %v4926_v7  ;;  %v4943_v35 = vadd.f32 %v4929_v9, %v1059_v57  ;;  %v1176_v20 = vadd.f32 %v1139_v19, %v4666_v52  ;;  %v1061_v12 = vadd.f32 %v1025_v26, %v4669_v23  ;;  %v1141_v33 = vpop.f32.mrb[19].mxu1 }
 0x1fe   : > { %v4948_v0 = vadd.f32 %v1175_v1, %v4929_v9  ;;  %v4951_v13 = vadd.f32 %v4926_v7, %v1060_v47  ;;  %v1177_v49 = vadd.f32 %v1141_v33, %v4672_v25  ;;  %v1241_v31 = vmax.f32 %v4935_v40, 0.0 }
 0x1ff   : > { %v4955_v58 = vadd.f32 %v1176_v20, %v4926_v7  ;;  %v4958_v37 = vadd.f32 %v4929_v9, %v1061_v12  ;;  %v1265_v32 = vmax.f32 %v4940_v28, 0.0  ;;  %v1242_v34 = vmax.f32 %v4943_v35, 0.0 }
 0x200   : > { %v1243_v52 = vmax.f32 %v4951_v13, 0.0  ;;  %v4963_v23 = vadd.f32 %v1177_v49, %v4929_v9  ;;  %v1266_v59 = vmax.f32 %v4948_v0, 0.0 }
 0x201   : > { %v1267_v11 = vmax.f32 %v4955_v58, 0.0  ;;  %v1244_v25 = vmax.f32 %v4958_v37, 0.0  ;;  %v1029_v22 = vpop.f32.mrb[20].mxu0 }
 0x202   : > { %v1257_v15 = vpack.c.bf16 %v1243_v52, %v1241_v31  ;;  %v1268_v14 = vmax.f32 %v4963_v23, 0.0  ;;  %v1062_v3 = vadd.f32 %v1029_v22, %v4694_v16  ;;  %v1145_v17 = vpop.f32.mrb[20].mxu1  ;;  %v1031_v24 = vpop.f32.mrb[21].mxu0 }
 0x203   : > { %v1281_v42 = vpack.c.bf16 %v1267_v11, %v1265_v32  ;;  %v1178_v30 = vadd.f32 %v1145_v17, %v4714_v10  ;;  %v1063_v45 = vadd.f32 %v1031_v24, %v4704_v21  ;;  %v1147_v53 = vpop.f32.mrb[21].mxu1  ;;  %v1033_v57 = vpop.f32.mrb[22].mxu0  ;;  %v1258_v55 = vpack.c.bf16 %v1244_v25, %v1242_v34  ;;  %v4071_v21 = vld [vmem:[%s6052_s1 + $0x314] ss:$8 sps:$4 sm:$0xff]  }
 0x204   : > { %v4978_v1 = vadd.f32 %v4926_v7, %v1062_v3  ;;  %v1179_v47 = vadd.f32 %v1147_v53, %v4707_v18  ;;  %v1064_v16 = vadd.f32 %v1033_v57, %v4717_v5  ;;  %v1149_v19 = vpop.f32.mrb[22].mxu1  ;;  %v1035_v26 = vpop.f32.mrb[23].mxu0  ;;  %v1282_v20 = vpack.c.bf16 %v1268_v14, %v1266_v59 }
 0x205   : > { %v4986_v10 = vadd.f32 %v1178_v30, %v4926_v7  ;;  %v4989_v12 = vadd.f32 %v4929_v9, %v1063_v45  ;;  %v1180_v33 = vadd.f32 %v1149_v19, %v4720_v50  ;;  %v1065_v49 = vadd.f32 %v1035_v26, %v4723_v29  ;;  %v1151_v18 = vpop.f32.mrb[23].mxu1  ;;  %1481 = vmatprep.mubr.bf16.mxu0 %v1258_v55  ;;  %v4069_v50 = vld [vmem:[%s6052_s1 + $0x310] ss:$8 sps:$4 sm:$0xff]   ;;  %v4074_v19 = vld [vmem:[%s6052_s1 + $0x324] ss:$8 sps:$4 sm:$0xff]  }
 0x206   : > { %v4994_v5 = vadd.f32 %v1179_v47, %v4929_v9  ;;  %v4997_v31 = vadd.f32 %v4926_v7, %v1064_v16  ;;  %v1181_v52 = vadd.f32 %v1151_v18, %v4726_v44  ;;  %1597 = vmatprep.mubr.bf16.mxu1 %v1282_v20  ;;  %1482 = vmatmul.mubr.bf16.vlgmr.msra.gmra.mrb[32].mxu0 %v1257_v15  ;;  %v1245_v29 = vmax.f32 %v4978_v1, 0.0 }
 0x207   : > { %v5001_v32 = vadd.f32 %v1180_v33, %v4926_v7  ;;  %v5004_v34 = vadd.f32 %v4929_v9, %v1065_v49  ;;  %1598 = vmatmul.mubr.bf16.vlgmr.msra.gmra.mrb[32].mxu1 %v1281_v42  ;;  %1914 = vmatpush1.bf16.msra.mxu0 %v4066_v60  ;;  %v1269_v25 = vmax.f32 %v4986_v10, 0.0  ;;  %v1246_v22 = vmax.f32 %v4989_v12, 0.0 }
 0x208   : > { %v1247_v11 = vmax.f32 %v4997_v31, 0.0  ;;  %v5012_v44 = vadd.f32 %v1181_v52, %v4929_v9  ;;  %2030 = vmatpush1.bf16.msra.mxu1 %v4066_v60  ;;  %1915 = vmatprep.subr.bf16.mxu0 %v4071_v21  ;;  %v1270_v3 = vmax.f32 %v4994_v5, 0.0 }
 0x209   : > { %v1271_v59 = vmax.f32 %v5001_v32, 0.0  ;;  %v1248_v15 = vmax.f32 %v5004_v34, 0.0  ;;  %v1039_v14 = vpop.f32.mrb[24].mxu0  ;;  %2031 = vmatprep.subr.bf16.mxu1 %v4071_v21 }
 0x20a   : > { %v1272_v17 = vmax.f32 %v5012_v44, 0.0  ;;  %v1066_v24 = vadd.f32 %v1039_v14, %v4751_v62  ;;  %v1155_v42 = vpop.f32.mrb[24].mxu1  ;;  %v1041_v30 = vpop.f32.mrb[25].mxu0  ;;  %v1259_v45 = vpack.c.bf16 %v1247_v11, %v1245_v29 }
 0x20b   : > { %v1182_v53 = vadd.f32 %v1155_v42, %v4774_v56  ;;  %v1067_v57 = vadd.f32 %v1041_v30, %v4761_v8  ;;  %v1157_v55 = vpop.f32.mrb[25].mxu1  ;;  %v1043_v60 = vpop.f32.mrb[26].mxu0  ;;  %v1260_v47 = vpack.c.bf16 %v1248_v15, %v1246_v22  ;;  %v1283_v16 = vpack.c.bf16 %v1271_v59, %v1269_v25  ;;  %1916 = vmatpush1.bf16.msra.mxu0 %v4069_v50  ;;  %v4072_v8 = vld [vmem:[%s6052_s1 + $0x320] ss:$8 sps:$4 sm:$0xff]  }
 0x20c   : > { %v5027_v26 = vadd.f32 %v4926_v7, %v1066_v24  ;;  %v1183_v62 = vadd.f32 %v1157_v55, %v4764_v54  ;;  %v1068_v20 = vadd.f32 %v1043_v60, %v4777_v43  ;;  %v1159_v21 = vpop.f32.mrb[26].mxu1  ;;  %v1045_v56 = vpop.f32.mrb[27].mxu0  ;;  %v1284_v33 = vpack.c.bf16 %v1272_v17, %v1270_v3  ;;  %2032 = vmatpush1.bf16.msra.mxu1 %v4069_v50  ;;  %v4077_v43 = vld [vmem:[%s6052_s1 + $0x334] ss:$8 sps:$4 sm:$0xff]  }
 0x20d   : > { %v5035_v49 = vadd.f32 %v1182_v53, %v4926_v7  ;;  %v5038_v18 = vadd.f32 %v4929_v9, %v1067_v57  ;;  %v1184_v52 = vadd.f32 %v1159_v21, %v4780_v6  ;;  %v1069_v54 = vadd.f32 %v1045_v56, %v4783_v61  ;;  %v1161_v29 = vpop.f32.mrb[27].mxu1  ;;  %1491 = vmatprep.mubr.bf16.mxu0 %v1260_v47  ;;  %v4080_v21 = vld [vmem:[%s6052_s1 + $0x344] ss:$8 sps:$4 sm:$0xff]  }
 0x20e   : > { %v5046_v50 = vadd.f32 %v1183_v62, %v4929_v9  ;;  %v5049_v11 = vadd.f32 %v4926_v7, %v1068_v20  ;;  %v1185_v25 = vadd.f32 %v1161_v29, %v4786_v2  ;;  %1607 = vmatprep.mubr.bf16.mxu1 %v1284_v33  ;;  %1492 = vmatmul.mubr.bf16.gmra.mrb[36].mxu0 %v1259_v45  ;;  %v4075_v2 = vld [vmem:[%s6052_s1 + $0x330] ss:$8 sps:$4 sm:$0xff]   ;;  %v1249_v15 = vmax.f32 %v5027_v26, 0.0 }
 0x20f   : > { %v5053_v6 = vadd.f32 %v1184_v52, %v4926_v7  ;;  %v5056_v61 = vadd.f32 %v4929_v9, %v1069_v54  ;;  %1608 = vmatmul.mubr.bf16.gmra.mrb[36].mxu1 %v1283_v16  ;;  %1917 = vmatprep.subr.bf16.mxu0 %v4074_v19  ;;  %v1250_v14 = vmax.f32 %v5038_v18, 0.0  ;;  %v1273_v42 = vmax.f32 %v5035_v49, 0.0 }
 0x210   : > { %v1251_v22 = vmax.f32 %v5049_v11, 0.0  ;;  %v5060_v59 = vadd.f32 %v1185_v25, %v4929_v9  ;;  %2033 = vmatprep.subr.bf16.mxu1 %v4074_v19  ;;  %1918 = vmatpush1.bf16.msra.mxu0 %v4072_v8  ;;  %v1274_v30 = vmax.f32 %v5046_v50, 0.0  ;;  %v4083_v25 = vld [vmem:[%s6052_s1 + $0x354] ss:$8 sps:$4 sm:$0xff]  }
 0x211   : > { %v1275_v3 = vmax.f32 %v5053_v6, 0.0  ;;  %v1252_v17 = vmax.f32 %v5056_v61, 0.0  ;;  %2034 = vmatpush1.bf16.msra.mxu1 %v4072_v8  ;;  %1919 = vmatprep.subr.bf16.mxu0 %v4077_v43 }
 0x212   : > { %v1049_v24 = vpop.f32.mrb[28].mxu0  ;;  %v1276_v45 = vmax.f32 %v5060_v59, 0.0  ;;  %2035 = vmatprep.subr.bf16.mxu1 %v4077_v43  ;;  %v1261_v20 = vpack.c.bf16 %v1251_v22, %v1249_v15 }
 0x213   : > { %v1070_v53 = vadd.f32 %v1049_v24, %v4831_v27  ;;  %v1165_v57 = vpop.f32.mrb[28].mxu1  ;;  %v1051_v55 = vpop.f32.mrb[29].mxu0  ;;  %v1262_v62 = vpack.c.bf16 %v1252_v17, %v1250_v14  ;;  %v1285_v54 = vpack.c.bf16 %v1275_v3, %v1273_v42 }
 0x214   : > { %v1186_v60 = vadd.f32 %v1165_v57, %v4840_v36  ;;  %v1071_v47 = vadd.f32 %v1051_v55, %v4818_v63  ;;  %v1167_v16 = vpop.f32.mrb[29].mxu1  ;;  %v1053_v19 = vpop.f32.mrb[30].mxu0  ;;  %v1286_v52 = vpack.c.bf16 %v1276_v45, %v1274_v30  ;;  %1920 = vmatpush1.bf16.msra.mxu0 %v4075_v2  ;;  %v4078_v63 = vld [vmem:[%s6052_s1 + $0x340] ss:$8 sps:$4 sm:$0xff]   ;;  %v4086_v55 = vld [vmem:[%s6052_s1 + $0x364] ss:$8 sps:$4 sm:$0xff]  }
 0x215   : > { %v1187_v56 = vadd.f32 %v1167_v16, %v4821_v46  ;;  %v1072_v33 = vadd.f32 %v1053_v19, %v4834_v39  ;;  %v1169_v27 = vpop.f32.mrb[30].mxu1  ;;  %v1055_v8 = vpop.f32.mrb[31].mxu0  ;;  %v5084_v36 = vadd.f32 %v4926_v7, %v1070_v53  ;;  %1501 = vmatprep.mubr.bf16.mxu0 %v1262_v62  ;;  %1921 = vmatprep.subr.bf16.mxu0 %v4080_v21  ;;  %v4084_v16 = vld [vmem:[%s6052_s1 + $0x360] ss:$8 sps:$4 sm:$0xff]   ;;  %v4089_v62 = vld [vmem:[%s6052_s1 + $0x374] ss:$8 sps:$4 sm:$0xff]  }
 0x216   : > { %v5087_v29 = vadd.f32 %v4929_v9, %v1071_v47  ;;  %v1188_v43 = vadd.f32 %v1169_v27, %v4837_v48  ;;  %v1073_v46 = vadd.f32 %v1055_v8, %v4843_v38  ;;  %v1171_v39 = vpop.f32.mrb[31].mxu1  ;;  %1617 = vmatprep.mubr.bf16.mxu1 %v1286_v52  ;;  %1502 = vmatmul.mubr.bf16.gmra.mrb[40].mxu0 %v1261_v20  ;;  %v4087_v20 = vld [vmem:[%s6052_s1 + $0x370] ss:$8 sps:$4 sm:$0xff]   ;;  %v4098_v8 = vld [vmem:[%s6052_s1 + $0x3a4] ss:$8 sps:$4 sm:$0xff]  }
 0x217   : > { %v5095_v22 = vadd.f32 %v1187_v56, %v4929_v9  ;;  %v5098_v15 = vadd.f32 %v4926_v7, %v1072_v33  ;;  %v1189_v14 = vadd.f32 %v1171_v39, %v4846_v51  ;;  %v5102_v48 = vadd.f32 %v1186_v60, %v4926_v7  ;;  %1618 = vmatmul.mubr.bf16.gmra.mrb[40].mxu1 %v1285_v54  ;;  %v4081_v51 = vld [vmem:[%s6052_s1 + $0x350] ss:$8 sps:$4 sm:$0xff]   ;;  %v4090_v56 = vld [vmem:[%s6052_s1 + $0x380] ss:$8 sps:$4 sm:$0xff]   ;;  %v4095_v33 = vld [vmem:[%s6052_s1 + $0x394] ss:$8 sps:$4 sm:$0xff]  }
 0x218   : > { %v5105_v38 = vadd.f32 %v1188_v43, %v4926_v7  ;;  %v5108_v3 = vadd.f32 %v4929_v9, %v1073_v46  ;;  %2036 = vmatpush1.bf16.msra.mxu1 %v4075_v2  ;;  %1922 = vmatpush1.bf16.msra.mxu0 %v4078_v63  ;;  %v1254_v42 = vmax.f32 %v5087_v29, 0.0  ;;  %v1253_v45 = vmax.f32 %v5084_v36, 0.0  ;;  %v4093_v27 = vld [vmem:[%s6052_s1 + $0x390] ss:$8 sps:$4 sm:$0xff]   ;;  %v4096_v52 = vld [vmem:[%s6052_s1 + $0x3a0] ss:$8 sps:$4 sm:$0xff]  }
 0x219   : > { %v1255_v17 = vmax.f32 %v5098_v15, 0.0  ;;  %v5112_v24 = vadd.f32 %v1189_v14, %v4929_v9  ;;  %2037 = vmatprep.subr.bf16.mxu1 %v4080_v21  ;;  %1923 = vmatprep.subr.bf16.mxu0 %v4083_v25  ;;  %v1278_v53 = vmax.f32 %v5095_v22, 0.0  ;;  %v1277_v2 = vmax.f32 %v5102_v48, 0.0  ;;  %v4092_v21 = vld [vmem:[%s6052_s1 + $0x384] ss:$8 sps:$4 sm:$0xff]  }
 0x21a   : > { %v1279_v7 = vmax.f32 %v5105_v38, 0.0  ;;  %v1256_v30 = vmax.f32 %v5108_v3, 0.0  ;;  %v4101_v54 = vld [vmem:[%s6052_s1 + $0x3b4] ss:$8 sps:$4 sm:$0xff]   ;;  %v4104_v43 = vld [vmem:[%s6052_s1 + $0x3c4] ss:$8 sps:$4 sm:$0xff]  }
 0x21b   : > { %v1280_v9 = vmax.f32 %v5112_v24, 0.0  ;;  %v1263_v47 = vpack.c.bf16 %v1255_v17, %v1253_v45  ;;  %v4102_v46 = vld [vmem:[%s6052_s1 + $0x3c0] ss:$8 sps:$4 sm:$0xff]   ;;  %v4107_v39 = vld [vmem:[%s6052_s1 + $0x3d4] ss:$8 sps:$4 sm:$0xff]  }
 0x21c   : > { %v1264_v57 = vpack.c.bf16 %v1256_v30, %v1254_v42  ;;  %2038 = vmatpush1.bf16.msra.mxu1 %v4078_v63  ;;  %1924 = vmatpush1.bf16.msra.mxu0 %v4081_v51  ;;  %v1287_v19 = vpack.c.bf16 %v1279_v7, %v1277_v2  ;;  %v4099_v63 = vld [vmem:[%s6052_s1 + $0x3b0] ss:$8 sps:$4 sm:$0xff]   ;;  %v4110_v14 = vld [vmem:[%s6052_s1 + $0x3e4] ss:$8 sps:$4 sm:$0xff]   ;;  %v4108_v17 = vld [vmem:[%s6052_s1 + $0x3e0] ss:$8 sps:$4 sm:$0xff]  }
 0x21d   : > { %v1288_v60 = vpack.c.bf16 %v1280_v9, %v1278_v53  ;;  %2039 = vmatprep.subr.bf16.mxu1 %v4083_v25  ;;  %1925 = vmatprep.subr.bf16.mxu0 %v4086_v55  ;;  %v4105_v25 = vld [vmem:[%s6052_s1 + $0x3d0] ss:$8 sps:$4 sm:$0xff]   ;;  %v4116_v7 = vld [vmem:[%s6052_s1 + $0x404] ss:$8 sps:$4 sm:$0xff]  }
 0x21e   : > { %1511 = vmatprep.mubr.bf16.mxu0 %v1264_v57  ;;  %v4111_v42 = vld [vmem:[%s6052_s1 + $0x3f0] ss:$8 sps:$4 sm:$0xff]   ;;  %v3586_v30 = vld [vmem:[%s6053_s2 + $0x4] sm:$0x3] }
 0x21f   : > { %1627 = vmatprep.mubr.bf16.mxu1 %v1288_v60  ;;  %1512 = vmatmul.mubr.bf16.gmra.mrb[44].mxu0 %v1263_v47  ;;  %v5191_v45 = vrot.slane %v3586_v30, %v4621_v41  ;;  %v5194_v9 = vrot.slane %v3586_v30, %v4626_v4 }
 0x220   : > { %1628 = vmatmul.mubr.bf16.gmra.mrb[44].mxu1 %v1287_v19  ;;  %1926 = vmatpush1.bf16.msra.mxu0 %v4084_v16 }
 0x221   : > { %2040 = vmatpush1.bf16.msra.mxu1 %v4081_v51  ;;  %1927 = vmatprep.subr.bf16.mxu0 %v4089_v62  ;;  %v4113_v51 = vld [vmem:[%s6052_s1 + $0x3f4] ss:$8 sps:$4 sm:$0xff]  }
 0x222   : > { %2041 = vmatprep.subr.bf16.mxu1 %v4086_v55 }
 0x224   : > { %1928 = vmatpush1.bf16.msra.mxu0 %v4087_v20 }
 0x225   : > { %2042 = vmatpush1.bf16.msra.mxu1 %v4084_v16  ;;  %1929 = vmatprep.subr.bf16.mxu0 %v4092_v21 }
 0x226   : > { %2043 = vmatprep.subr.bf16.mxu1 %v4089_v62 }
 0x228   : > { %1930 = vmatpush1.bf16.msra.mxu0 %v4090_v56 }
 0x229   : > { %2044 = vmatpush1.bf16.msra.mxu1 %v4087_v20  ;;  %1931 = vmatprep.subr.bf16.mxu0 %v4095_v33 }
 0x22a   : > { %2045 = vmatprep.subr.bf16.mxu1 %v4092_v21 }
 0x22c   : > { %1932 = vmatpush1.bf16.msra.mxu0 %v4093_v27 }
 0x22d   : > { %2046 = vmatpush1.bf16.msra.mxu1 %v4090_v56  ;;  %1933 = vmatprep.subr.bf16.mxu0 %v4098_v8 }
 0x22e   : > { %2047 = vmatprep.subr.bf16.mxu1 %v4095_v33 }
 0x230   : > { %1934 = vmatpush1.bf16.msra.mxu0 %v4096_v52 }
 0x231   : > { %2048 = vmatpush1.bf16.msra.mxu1 %v4093_v27  ;;  %1935 = vmatprep.subr.bf16.mxu0 %v4101_v54 }
 0x232   : > { %2049 = vmatprep.subr.bf16.mxu1 %v4098_v8 }
 0x234   : > { %1936 = vmatpush1.bf16.msra.mxu0 %v4099_v63 }
 0x235   : > { %2050 = vmatpush1.bf16.msra.mxu1 %v4096_v52  ;;  %1937 = vmatprep.subr.bf16.mxu0 %v4104_v43 }
 0x236   : > { %2051 = vmatprep.subr.bf16.mxu1 %v4101_v54 }
 0x238   : > { %1938 = vmatpush1.bf16.msra.mxu0 %v4102_v46 }
 0x239   : > { %2052 = vmatpush1.bf16.msra.mxu1 %v4099_v63  ;;  %1939 = vmatprep.subr.bf16.mxu0 %v4107_v39 }
 0x23a   : > { %2053 = vmatprep.subr.bf16.mxu1 %v4104_v43 }
 0x23c   : > { %1940 = vmatpush1.bf16.msra.mxu0 %v4105_v25 }
 0x23d   : > { %2054 = vmatpush1.bf16.msra.mxu1 %v4102_v46  ;;  %1941 = vmatprep.subr.bf16.mxu0 %v4110_v14 }
 0x23e   : > { %2055 = vmatprep.subr.bf16.mxu1 %v4107_v39 }
 0x240   : > { %1942 = vmatpush1.bf16.msra.mxu0 %v4108_v17 }
 0x241   : > { %2056 = vmatpush1.bf16.msra.mxu1 %v4105_v25  ;;  %1943 = vmatprep.subr.bf16.mxu0 %v4113_v51 }
 0x242   : > { %2057 = vmatprep.subr.bf16.mxu1 %v4110_v14 }
 0x244   : > { %1944 = vmatpush1.bf16.msra.mxu0 %v4111_v42 }
 0x245   : > { %2058 = vmatpush1.bf16.msra.mxu1 %v4108_v17  ;;  %2377 = vmatprep.subr.bf16.mxu0 %v4116_v7 }
 0x246   : > { %2059 = vmatprep.subr.bf16.mxu1 %v4113_v51 }
 0x249   : > { %2060 = vmatpush1.bf16.msra.mxu1 %v4111_v42 }
 0x24a   : > { %2493 = vmatprep.subr.bf16.mxu1 %v4116_v7 }
 0x2d9   : > { %v1483_v53 = vpop.f32.mrb[32].mxu0 }
 0x2da   : > { %v1522_v2 = vadd.f32 %v1483_v53, %v4935_v40  ;;  %v1599_v57 = vpop.f32.mrb[32].mxu1  ;;  %v1485_v55 = vpop.f32.mrb[33].mxu0 }
 0x2db   : > { %v1638_v60 = vadd.f32 %v1599_v57, %v4940_v28  ;;  %v1523_v47 = vadd.f32 %v1485_v55, %v4943_v35  ;;  %v1601_v16 = vpop.f32.mrb[33].mxu1  ;;  %v1487_v19 = vpop.f32.mrb[34].mxu0 }
 0x2dc   : > { %v5200_v62 = vadd.f32 %v5191_v45, %v1522_v2  ;;  %v1639_v20 = vadd.f32 %v1601_v16, %v4948_v0  ;;  %v1524_v21 = vadd.f32 %v1487_v19, %v4951_v13  ;;  %v1603_v56 = vpop.f32.mrb[34].mxu1  ;;  %v1489_v33 = vpop.f32.mrb[35].mxu0  ;;  %v4114_v19 = vld [vmem:[%s6052_s1 + $0x400] ss:$8 sps:$4 sm:$0xff]  }
 0x2dd   : > { %v5205_v27 = vadd.f32 %v1638_v60, %v5191_v45  ;;  %v5208_v40 = vadd.f32 %v5194_v9, %v1523_v47  ;;  %v1640_v28 = vadd.f32 %v1603_v56, %v4955_v58  ;;  %v1525_v35 = vadd.f32 %v1489_v33, %v4958_v37  ;;  %v1605_v8 = vpop.f32.mrb[35].mxu1 }
 0x2de   : > { %v5213_v52 = vadd.f32 %v1639_v20, %v5194_v9  ;;  %v5216_v0 = vadd.f32 %v5191_v45, %v1524_v21  ;;  %v1641_v13 = vadd.f32 %v1605_v8, %v4963_v23  ;;  %v1705_v43 = vmax.f32 %v5200_v62, 0.0 }
 0x2df   : > { %v5220_v54 = vadd.f32 %v1640_v28, %v5191_v45  ;;  %v5223_v63 = vadd.f32 %v5194_v9, %v1525_v35  ;;  %v1729_v46 = vmax.f32 %v5205_v27, 0.0  ;;  %v1706_v39 = vmax.f32 %v5208_v40, 0.0 }
 0x2e0   : > { %v1707_v58 = vmax.f32 %v5216_v0, 0.0  ;;  %v5228_v37 = vadd.f32 %v1641_v13, %v5194_v9  ;;  %v1730_v17 = vmax.f32 %v5213_v52, 0.0 }
 0x2e1   : > { %v1731_v25 = vmax.f32 %v5220_v54, 0.0  ;;  %v1708_v23 = vmax.f32 %v5223_v63, 0.0  ;;  %v1493_v14 = vpop.f32.mrb[36].mxu0 }
 0x2e2   : > { %v1721_v51 = vpack.c.bf16 %v1707_v58, %v1705_v43  ;;  %v1732_v42 = vmax.f32 %v5228_v37, 0.0  ;;  %v1526_v7 = vadd.f32 %v1493_v14, %v4978_v1  ;;  %v1609_v30 = vpop.f32.mrb[36].mxu1  ;;  %v1495_v53 = vpop.f32.mrb[37].mxu0 }
 0x2e3   : > { %v1745_v2 = vpack.c.bf16 %v1731_v25, %v1729_v46  ;;  %v1642_v57 = vadd.f32 %v1609_v30, %v4986_v10  ;;  %v1527_v55 = vadd.f32 %v1495_v53, %v4989_v12  ;;  %v1611_v60 = vpop.f32.mrb[37].mxu1  ;;  %v1497_v47 = vpop.f32.mrb[38].mxu0  ;;  %v1722_v16 = vpack.c.bf16 %v1708_v23, %v1706_v39  ;;  %v4119_v10 = vld [vmem:[%s6052_s1 + $0x414] ss:$8 sps:$4 sm:$0xff]  }
 0x2e4   : > { %v5243_v20 = vadd.f32 %v5191_v45, %v1526_v7  ;;  %v1643_v21 = vadd.f32 %v1611_v60, %v4994_v5  ;;  %v1528_v1 = vadd.f32 %v1497_v47, %v4997_v31  ;;  %v1613_v56 = vpop.f32.mrb[38].mxu1  ;;  %v1499_v33 = vpop.f32.mrb[39].mxu0  ;;  %v1746_v28 = vpack.c.bf16 %v1732_v42, %v1730_v17 }
 0x2e5   : > { %v5251_v12 = vadd.f32 %v1642_v57, %v5191_v45  ;;  %v5254_v35 = vadd.f32 %v5194_v9, %v1527_v55  ;;  %v1644_v8 = vadd.f32 %v1613_v56, %v5001_v32  ;;  %v1529_v13 = vadd.f32 %v1499_v33, %v5004_v34  ;;  %v1615_v5 = vpop.f32.mrb[39].mxu1  ;;  %1945 = vmatprep.mubr.bf16.mxu0 %v1722_v16  ;;  %v4117_v32 = vld [vmem:[%s6052_s1 + $0x410] ss:$8 sps:$4 sm:$0xff]   ;;  %v4122_v56 = vld [vmem:[%s6052_s1 + $0x424] ss:$8 sps:$4 sm:$0xff]  }
 0x2e6   : > { %v5259_v31 = vadd.f32 %v1643_v21, %v5194_v9  ;;  %v5262_v43 = vadd.f32 %v5191_v45, %v1528_v1  ;;  %v1645_v58 = vadd.f32 %v1615_v5, %v5012_v44  ;;  %2061 = vmatprep.mubr.bf16.mxu1 %v1746_v28  ;;  %1946 = vmatmul.mubr.bf16.vlgmr.msra.gmra.mrb[48].mxu0 %v1721_v51  ;;  %v1709_v34 = vmax.f32 %v5243_v20, 0.0 }
 0x2e7   : > { %v5266_v46 = vadd.f32 %v1644_v8, %v5191_v45  ;;  %v5269_v39 = vadd.f32 %v5194_v9, %v1529_v13  ;;  %2062 = vmatmul.mubr.bf16.vlgmr.msra.gmra.mrb[48].mxu1 %v1745_v2  ;;  %2378 = vmatpush1.bf16.msra.mxu0 %v4114_v19  ;;  %v1733_v23 = vmax.f32 %v5251_v12, 0.0  ;;  %v1710_v14 = vmax.f32 %v5254_v35, 0.0 }
 0x2e8   : > { %v1711_v25 = vmax.f32 %v5262_v43, 0.0  ;;  %v5277_v44 = vadd.f32 %v1645_v58, %v5194_v9  ;;  %2494 = vmatpush1.bf16.msra.mxu1 %v4114_v19  ;;  %2379 = vmatprep.subr.bf16.mxu0 %v4119_v10  ;;  %v1734_v7 = vmax.f32 %v5259_v31, 0.0 }
 0x2e9   : > { %v1735_v17 = vmax.f32 %v5266_v46, 0.0  ;;  %v1712_v51 = vmax.f32 %v5269_v39, 0.0  ;;  %v1503_v42 = vpop.f32.mrb[40].mxu0  ;;  %2495 = vmatprep.subr.bf16.mxu1 %v4119_v10 }
 0x2ea   : > { %v1736_v30 = vmax.f32 %v5277_v44, 0.0  ;;  %v1530_v53 = vadd.f32 %v1503_v42, %v5027_v26  ;;  %v1619_v2 = vpop.f32.mrb[40].mxu1  ;;  %v1505_v57 = vpop.f32.mrb[41].mxu0  ;;  %v1723_v55 = vpack.c.bf16 %v1711_v25, %v1709_v34 }
 0x2eb   : > { %v1646_v60 = vadd.f32 %v1619_v2, %v5035_v49  ;;  %v1531_v47 = vadd.f32 %v1505_v57, %v5038_v18  ;;  %v1621_v16 = vpop.f32.mrb[41].mxu1  ;;  %v1507_v19 = vpop.f32.mrb[42].mxu0  ;;  %v1724_v21 = vpack.c.bf16 %v1712_v51, %v1710_v14  ;;  %v1747_v1 = vpack.c.bf16 %v1735_v17, %v1733_v23  ;;  %2380 = vmatpush1.bf16.msra.mxu0 %v4117_v32  ;;  %v4120_v18 = vld [vmem:[%s6052_s1 + $0x420] ss:$8 sps:$4 sm:$0xff]  }
 0x2ec   : > { %v5292_v33 = vadd.f32 %v5191_v45, %v1530_v53  ;;  %v1647_v26 = vadd.f32 %v1621_v16, %v5046_v50  ;;  %v1532_v28 = vadd.f32 %v1507_v19, %v5049_v11  ;;  %v1623_v10 = vpop.f32.mrb[42].mxu1  ;;  %v1509_v49 = vpop.f32.mrb[43].mxu0  ;;  %v1748_v8 = vpack.c.bf16 %v1736_v30, %v1734_v7  ;;  %2496 = vmatpush1.bf16.msra.mxu1 %v4117_v32  ;;  %v4125_v11 = vld [vmem:[%s6052_s1 + $0x434] ss:$8 sps:$4 sm:$0xff]  }
 0x2ed   : > { %v5300_v13 = vadd.f32 %v1646_v60, %v5191_v45  ;;  %v5303_v5 = vadd.f32 %v5194_v9, %v1531_v47  ;;  %v1648_v58 = vadd.f32 %v1623_v10, %v5053_v6  ;;  %v1533_v50 = vadd.f32 %v1509_v49, %v5056_v61  ;;  %v1625_v34 = vpop.f32.mrb[43].mxu1  ;;  %1955 = vmatprep.mubr.bf16.mxu0 %v1724_v21  ;;  %v4128_v10 = vld [vmem:[%s6052_s1 + $0x444] ss:$8 sps:$4 sm:$0xff]  }
 0x2ee   : > { %v5311_v32 = vadd.f32 %v1647_v26, %v5194_v9  ;;  %v5314_v25 = vadd.f32 %v5191_v45, %v1532_v28  ;;  %v1649_v23 = vadd.f32 %v1625_v34, %v5060_v59  ;;  %2071 = vmatprep.mubr.bf16.mxu1 %v1748_v8  ;;  %1956 = vmatmul.mubr.bf16.gmra.mrb[52].mxu0 %v1723_v55  ;;  %v4123_v59 = vld [vmem:[%s6052_s1 + $0x430] ss:$8 sps:$4 sm:$0xff]   ;;  %v1713_v51 = vmax.f32 %v5292_v33, 0.0 }
 0x2ef   : > { %v5318_v6 = vadd.f32 %v1648_v58, %v5191_v45  ;;  %v5321_v61 = vadd.f32 %v5194_v9, %v1533_v50  ;;  %2072 = vmatmul.mubr.bf16.gmra.mrb[52].mxu1 %v1747_v1  ;;  %2381 = vmatprep.subr.bf16.mxu0 %v4122_v56  ;;  %v1714_v42 = vmax.f32 %v5303_v5, 0.0  ;;  %v1737_v2 = vmax.f32 %v5300_v13, 0.0 }
 0x2f0   : > { %v1715_v14 = vmax.f32 %v5314_v25, 0.0  ;;  %v5325_v17 = vadd.f32 %v1649_v23, %v5194_v9  ;;  %2497 = vmatprep.subr.bf16.mxu1 %v4122_v56  ;;  %2382 = vmatpush1.bf16.msra.mxu0 %v4120_v18  ;;  %v1738_v57 = vmax.f32 %v5311_v32, 0.0  ;;  %v4131_v23 = vld [vmem:[%s6052_s1 + $0x454] ss:$8 sps:$4 sm:$0xff]  }
 0x2f1   : > { %v1739_v7 = vmax.f32 %v5318_v6, 0.0  ;;  %v1716_v30 = vmax.f32 %v5321_v61, 0.0  ;;  %2498 = vmatpush1.bf16.msra.mxu1 %v4120_v18  ;;  %2383 = vmatprep.subr.bf16.mxu0 %v4125_v11 }
 0x2f2   : > { %v1513_v53 = vpop.f32.mrb[44].mxu0  ;;  %v1740_v55 = vmax.f32 %v5325_v17, 0.0  ;;  %2499 = vmatprep.subr.bf16.mxu1 %v4125_v11  ;;  %v1725_v28 = vpack.c.bf16 %v1715_v14, %v1713_v51 }
 0x2f3   : > { %v1534_v60 = vadd.f32 %v1513_v53, %v5084_v36  ;;  %v1629_v47 = vpop.f32.mrb[44].mxu1  ;;  %v1515_v16 = vpop.f32.mrb[45].mxu0  ;;  %v1726_v26 = vpack.c.bf16 %v1716_v30, %v1714_v42  ;;  %v1749_v50 = vpack.c.bf16 %v1739_v7, %v1737_v2 }
 0x2f4   : > { %v1650_v19 = vadd.f32 %v1629_v47, %v5102_v48  ;;  %v1535_v21 = vadd.f32 %v1515_v16, %v5087_v29  ;;  %v1631_v1 = vpop.f32.mrb[45].mxu1  ;;  %v1517_v56 = vpop.f32.mrb[46].mxu0  ;;  %v1750_v58 = vpack.c.bf16 %v1740_v55, %v1738_v57  ;;  %2384 = vmatpush1.bf16.msra.mxu0 %v4123_v59  ;;  %v4126_v29 = vld [vmem:[%s6052_s1 + $0x440] ss:$8 sps:$4 sm:$0xff]   ;;  %v4134_v16 = vld [vmem:[%s6052_s1 + $0x464] ss:$8 sps:$4 sm:$0xff]  }
 0x2f5   : > { %v1651_v49 = vadd.f32 %v1631_v1, %v5095_v22  ;;  %v1536_v8 = vadd.f32 %v1517_v56, %v5098_v15  ;;  %v1633_v36 = vpop.f32.mrb[46].mxu1  ;;  %v1519_v18 = vpop.f32.mrb[47].mxu0  ;;  %v5349_v48 = vadd.f32 %v5191_v45, %v1534_v60  ;;  %1965 = vmatprep.mubr.bf16.mxu0 %v1726_v26  ;;  %2385 = vmatprep.subr.bf16.mxu0 %v4128_v10  ;;  %v4132_v1 = vld [vmem:[%s6052_s1 + $0x460] ss:$8 sps:$4 sm:$0xff]   ;;  %v4137_v26 = vld [vmem:[%s6052_s1 + $0x474] ss:$8 sps:$4 sm:$0xff]  }
 0x2f6   : > { %v5352_v34 = vadd.f32 %v5194_v9, %v1535_v21  ;;  %v1652_v11 = vadd.f32 %v1633_v36, %v5105_v38  ;;  %v1537_v22 = vadd.f32 %v1519_v18, %v5108_v3  ;;  %v1635_v15 = vpop.f32.mrb[47].mxu1  ;;  %2081 = vmatprep.mubr.bf16.mxu1 %v1750_v58  ;;  %1966 = vmatmul.mubr.bf16.gmra.mrb[56].mxu0 %v1725_v28  ;;  %v4135_v28 = vld [vmem:[%s6052_s1 + $0x470] ss:$8 sps:$4 sm:$0xff]   ;;  %v4146_v18 = vld [vmem:[%s6052_s1 + $0x4a4] ss:$8 sps:$4 sm:$0xff]  }
 0x2f7   : > { %v5360_v14 = vadd.f32 %v1651_v49, %v5194_v9  ;;  %v5363_v51 = vadd.f32 %v5191_v45, %v1536_v8  ;;  %v1653_v42 = vadd.f32 %v1635_v15, %v5112_v24  ;;  %v5367_v38 = vadd.f32 %v1650_v19, %v5191_v45  ;;  %2082 = vmatmul.mubr.bf16.gmra.mrb[56].mxu1 %v1749_v50  ;;  %v4129_v24 = vld [vmem:[%s6052_s1 + $0x450] ss:$8 sps:$4 sm:$0xff]   ;;  %v4138_v49 = vld [vmem:[%s6052_s1 + $0x480] ss:$8 sps:$4 sm:$0xff]   ;;  %v4143_v8 = vld [vmem:[%s6052_s1 + $0x494] ss:$8 sps:$4 sm:$0xff]  }
 0x2f8   : > { %v5370_v3 = vadd.f32 %v1652_v11, %v5191_v45  ;;  %v5373_v7 = vadd.f32 %v5194_v9, %v1537_v22  ;;  %2500 = vmatpush1.bf16.msra.mxu1 %v4123_v59  ;;  %2386 = vmatpush1.bf16.msra.mxu0 %v4126_v29  ;;  %v1718_v2 = vmax.f32 %v5352_v34, 0.0  ;;  %v1717_v55 = vmax.f32 %v5349_v48, 0.0  ;;  %v4141_v36 = vld [vmem:[%s6052_s1 + $0x490] ss:$8 sps:$4 sm:$0xff]   ;;  %v4144_v58 = vld [vmem:[%s6052_s1 + $0x4a0] ss:$8 sps:$4 sm:$0xff]  }
 0x2f9   : > { %v1719_v30 = vmax.f32 %v5363_v51, 0.0  ;;  %v5377_v53 = vadd.f32 %v1653_v42, %v5194_v9  ;;  %2501 = vmatprep.subr.bf16.mxu1 %v4128_v10  ;;  %2387 = vmatprep.subr.bf16.mxu0 %v4131_v23  ;;  %v1742_v60 = vmax.f32 %v5360_v14, 0.0  ;;  %v1741_v59 = vmax.f32 %v5367_v38, 0.0  ;;  %v4140_v10 = vld [vmem:[%s6052_s1 + $0x484] ss:$8 sps:$4 sm:$0xff]  }
 0x2fa   : > { %v1743_v45 = vmax.f32 %v5370_v3, 0.0  ;;  %v1720_v57 = vmax.f32 %v5373_v7, 0.0  ;;  %v4149_v50 = vld [vmem:[%s6052_s1 + $0x4b4] ss:$8 sps:$4 sm:$0xff]   ;;  %v4152_v11 = vld [vmem:[%s6052_s1 + $0x4c4] ss:$8 sps:$4 sm:$0xff]  }
 0x2fb   : > { %v1744_v9 = vmax.f32 %v5377_v53, 0.0  ;;  %v1727_v21 = vpack.c.bf16 %v1719_v30, %v1717_v55  ;;  %v4150_v22 = vld [vmem:[%s6052_s1 + $0x4c0] ss:$8 sps:$4 sm:$0xff]   ;;  %v4155_v15 = vld [vmem:[%s6052_s1 + $0x4d4] ss:$8 sps:$4 sm:$0xff]  }
 0x2fc   : > { %v1728_v47 = vpack.c.bf16 %v1720_v57, %v1718_v2  ;;  %2502 = vmatpush1.bf16.msra.mxu1 %v4126_v29  ;;  %2388 = vmatpush1.bf16.msra.mxu0 %v4129_v24  ;;  %v1751_v56 = vpack.c.bf16 %v1743_v45, %v1741_v59  ;;  %v4147_v29 = vld [vmem:[%s6052_s1 + $0x4b0] ss:$8 sps:$4 sm:$0xff]   ;;  %v4158_v42 = vld [vmem:[%s6052_s1 + $0x4e4] ss:$8 sps:$4 sm:$0xff]   ;;  %v4156_v30 = vld [vmem:[%s6052_s1 + $0x4e0] ss:$8 sps:$4 sm:$0xff]  }
 0x2fd   : > { %v1752_v19 = vpack.c.bf16 %v1744_v9, %v1742_v60  ;;  %2503 = vmatprep.subr.bf16.mxu1 %v4131_v23  ;;  %2389 = vmatprep.subr.bf16.mxu0 %v4134_v16  ;;  %v4153_v23 = vld [vmem:[%s6052_s1 + $0x4d0] ss:$8 sps:$4 sm:$0xff]   ;;  %v4164_v45 = vld [vmem:[%s6052_s1 + $0x504] ss:$8 sps:$4 sm:$0xff]  }
 0x2fe   : > { %1975 = vmatprep.mubr.bf16.mxu0 %v1728_v47  ;;  %v4159_v2 = vld [vmem:[%s6052_s1 + $0x4f0] ss:$8 sps:$4 sm:$0xff]   ;;  %v3651_v57 = vld [vmem:[%s6053_s2 + $0x6] sm:$0x3] }
 0x2ff   : > { %2091 = vmatprep.mubr.bf16.mxu1 %v1752_v19  ;;  %1976 = vmatmul.mubr.bf16.gmra.mrb[60].mxu0 %v1727_v21  ;;  %v5456_v55 = vrot.slane %v3651_v57, %v4621_v41  ;;  %v5459_v9 = vrot.slane %v3651_v57, %v4626_v4 }
 0x300   : > { %2092 = vmatmul.mubr.bf16.gmra.mrb[60].mxu1 %v1751_v56  ;;  %2390 = vmatpush1.bf16.msra.mxu0 %v4132_v1 }
 0x301   : > { %2504 = vmatpush1.bf16.msra.mxu1 %v4129_v24  ;;  %2391 = vmatprep.subr.bf16.mxu0 %v4137_v26  ;;  %v4161_v24 = vld [vmem:[%s6052_s1 + $0x4f4] ss:$8 sps:$4 sm:$0xff]  }
 0x302   : > { %2505 = vmatprep.subr.bf16.mxu1 %v4134_v16 }
 0x304   : > { %2392 = vmatpush1.bf16.msra.mxu0 %v4135_v28 }
 0x305   : > { %2506 = vmatpush1.bf16.msra.mxu1 %v4132_v1  ;;  %2393 = vmatprep.subr.bf16.mxu0 %v4140_v10 }
 0x306   : > { %2507 = vmatprep.subr.bf16.mxu1 %v4137_v26 }
 0x308   : > { %2394 = vmatpush1.bf16.msra.mxu0 %v4138_v49 }
 0x309   : > { %2508 = vmatpush1.bf16.msra.mxu1 %v4135_v28  ;;  %2395 = vmatprep.subr.bf16.mxu0 %v4143_v8 }
 0x30a   : > { %2509 = vmatprep.subr.bf16.mxu1 %v4140_v10 }
 0x30c   : > { %2396 = vmatpush1.bf16.msra.mxu0 %v4141_v36 }
 0x30d   : > { %2510 = vmatpush1.bf16.msra.mxu1 %v4138_v49  ;;  %2397 = vmatprep.subr.bf16.mxu0 %v4146_v18 }
 0x30e   : > { %2511 = vmatprep.subr.bf16.mxu1 %v4143_v8 }
 0x310   : > { %2398 = vmatpush1.bf16.msra.mxu0 %v4144_v58 }
 0x311   : > { %2512 = vmatpush1.bf16.msra.mxu1 %v4141_v36  ;;  %2399 = vmatprep.subr.bf16.mxu0 %v4149_v50 }
 0x312   : > { %2513 = vmatprep.subr.bf16.mxu1 %v4146_v18 }
 0x314   : > { %2400 = vmatpush1.bf16.msra.mxu0 %v4147_v29 }
 0x315   : > { %2514 = vmatpush1.bf16.msra.mxu1 %v4144_v58  ;;  %2401 = vmatprep.subr.bf16.mxu0 %v4152_v11 }
 0x316   : > { %2515 = vmatprep.subr.bf16.mxu1 %v4149_v50 }
 0x318   : > { %2402 = vmatpush1.bf16.msra.mxu0 %v4150_v22 }
 0x319   : > { %2516 = vmatpush1.bf16.msra.mxu1 %v4147_v29  ;;  %2403 = vmatprep.subr.bf16.mxu0 %v4155_v15 }
 0x31a   : > { %2517 = vmatprep.subr.bf16.mxu1 %v4152_v11 }
 0x31c   : > { %2404 = vmatpush1.bf16.msra.mxu0 %v4153_v23 }
 0x31d   : > { %2518 = vmatpush1.bf16.msra.mxu1 %v4150_v22  ;;  %2405 = vmatprep.subr.bf16.mxu0 %v4158_v42 }
 0x31e   : > { %2519 = vmatprep.subr.bf16.mxu1 %v4155_v15 }
 0x320   : > { %2406 = vmatpush1.bf16.msra.mxu0 %v4156_v30 }
 0x321   : > { %2520 = vmatpush1.bf16.msra.mxu1 %v4153_v23  ;;  %2407 = vmatprep.subr.bf16.mxu0 %v4161_v24 }
 0x322   : > { %2521 = vmatprep.subr.bf16.mxu1 %v4158_v42 }
 0x324   : > { %2408 = vmatpush1.bf16.msra.mxu0 %v4159_v2 }
 0x325   : > { %2522 = vmatpush1.bf16.msra.mxu1 %v4156_v30  ;;  %2841 = vmatprep.subr.bf16.mxu0 %v4164_v45 }
 0x326   : > { %2523 = vmatprep.subr.bf16.mxu1 %v4161_v24 }
 0x329   : > { %2524 = vmatpush1.bf16.msra.mxu1 %v4159_v2 }
 0x32a   : > { %2957 = vmatprep.subr.bf16.mxu1 %v4164_v45 }
 0x3b9   : > { %v1947_v60 = vpop.f32.mrb[48].mxu0 }
 0x3ba   : > { %v1986_v59 = vadd.f32 %v1947_v60, %v5200_v62  ;;  %v2063_v47 = vpop.f32.mrb[48].mxu1  ;;  %v1949_v16 = vpop.f32.mrb[49].mxu0 }
 0x3bb   : > { %v2102_v19 = vadd.f32 %v2063_v47, %v5205_v27  ;;  %v1987_v21 = vadd.f32 %v1949_v16, %v5208_v40  ;;  %v2065_v1 = vpop.f32.mrb[49].mxu1  ;;  %v1951_v56 = vpop.f32.mrb[50].mxu0 }
 0x3bc   : > { %v5465_v26 = vadd.f32 %v5456_v55, %v1986_v59  ;;  %v2103_v28 = vadd.f32 %v2065_v1, %v5213_v52  ;;  %v1988_v10 = vadd.f32 %v1951_v56, %v5216_v0  ;;  %v2067_v49 = vpop.f32.mrb[50].mxu1  ;;  %v1953_v8 = vpop.f32.mrb[51].mxu0  ;;  %v4162_v56 = vld [vmem:[%s6052_s1 + $0x500] ss:$8 sps:$4 sm:$0xff]  }
 0x3bd   : > { %v5470_v36 = vadd.f32 %v2102_v19, %v5456_v55  ;;  %v5473_v62 = vadd.f32 %v5459_v9, %v1987_v21  ;;  %v2104_v27 = vadd.f32 %v2067_v49, %v5220_v54  ;;  %v1989_v40 = vadd.f32 %v1953_v8, %v5223_v63  ;;  %v2069_v18 = vpop.f32.mrb[51].mxu1 }
 0x3be   : > { %v5478_v58 = vadd.f32 %v2103_v28, %v5459_v9  ;;  %v5481_v52 = vadd.f32 %v5456_v55, %v1988_v10  ;;  %v2105_v0 = vadd.f32 %v2069_v18, %v5228_v37  ;;  %v2169_v11 = vmax.f32 %v5465_v26, 0.0 }
 0x3bf   : > { %v5485_v50 = vadd.f32 %v2104_v27, %v5456_v55  ;;  %v5488_v29 = vadd.f32 %v5459_v9, %v1989_v40  ;;  %v2193_v22 = vmax.f32 %v5470_v36, 0.0  ;;  %v2170_v15 = vmax.f32 %v5473_v62, 0.0 }
 0x3c0   : > { %v2171_v54 = vmax.f32 %v5481_v52, 0.0  ;;  %v5493_v63 = vadd.f32 %v2105_v0, %v5459_v9  ;;  %v2194_v30 = vmax.f32 %v5478_v58, 0.0 }
 0x3c1   : > { %v2195_v23 = vmax.f32 %v5485_v50, 0.0  ;;  %v2172_v37 = vmax.f32 %v5488_v29, 0.0  ;;  %v1957_v42 = vpop.f32.mrb[52].mxu0 }
 0x3c2   : > { %v2185_v24 = vpack.c.bf16 %v2171_v54, %v2169_v11  ;;  %v2196_v2 = vmax.f32 %v5493_v63, 0.0  ;;  %v1990_v45 = vadd.f32 %v1957_v42, %v5243_v20  ;;  %v2073_v57 = vpop.f32.mrb[52].mxu1  ;;  %v1959_v60 = vpop.f32.mrb[53].mxu0 }
 0x3c3   : > { %v2209_v59 = vpack.c.bf16 %v2195_v23, %v2193_v22  ;;  %v2106_v47 = vadd.f32 %v2073_v57, %v5251_v12  ;;  %v1991_v16 = vadd.f32 %v1959_v60, %v5254_v35  ;;  %v2075_v19 = vpop.f32.mrb[53].mxu1  ;;  %v1961_v21 = vpop.f32.mrb[54].mxu0  ;;  %v2186_v1 = vpack.c.bf16 %v2172_v37, %v2170_v15  ;;  %v4167_v12 = vld [vmem:[%s6052_s1 + $0x514] ss:$8 sps:$4 sm:$0xff]  }
 0x3c4   : > { %v5508_v28 = vadd.f32 %v5456_v55, %v1990_v45  ;;  %v2107_v10 = vadd.f32 %v2075_v19, %v5259_v31  ;;  %v1992_v20 = vadd.f32 %v1961_v21, %v5262_v43  ;;  %v2077_v49 = vpop.f32.mrb[54].mxu1  ;;  %v1963_v8 = vpop.f32.mrb[55].mxu0  ;;  %v2210_v27 = vpack.c.bf16 %v2196_v2, %v2194_v30 }
 0x3c5   : > { %v5516_v35 = vadd.f32 %v2106_v47, %v5456_v55  ;;  %v5519_v40 = vadd.f32 %v5459_v9, %v1991_v16  ;;  %v2108_v18 = vadd.f32 %v2077_v49, %v5266_v46  ;;  %v1993_v0 = vadd.f32 %v1963_v8, %v5269_v39  ;;  %v2079_v31 = vpop.f32.mrb[55].mxu1  ;;  %2409 = vmatprep.mubr.bf16.mxu0 %v2186_v1  ;;  %v4165_v46 = vld [vmem:[%s6052_s1 + $0x510] ss:$8 sps:$4 sm:$0xff]   ;;  %v4170_v49 = vld [vmem:[%s6052_s1 + $0x524] ss:$8 sps:$4 sm:$0xff]  }
 0x3c6   : > { %v5524_v43 = vadd.f32 %v2107_v10, %v5459_v9  ;;  %v5527_v11 = vadd.f32 %v5456_v55, %v1992_v20  ;;  %v2109_v54 = vadd.f32 %v2079_v31, %v5277_v44  ;;  %2525 = vmatprep.mubr.bf16.mxu1 %v2210_v27  ;;  %2410 = vmatmul.mubr.bf16.vlgmr.msra.gmra.mrb[64].mxu0 %v2185_v24  ;;  %v2173_v39 = vmax.f32 %v5508_v28, 0.0 }
 0x3c7   : > { %v5531_v22 = vadd.f32 %v2108_v18, %v5456_v55  ;;  %v5534_v15 = vadd.f32 %v5459_v9, %v1993_v0  ;;  %2526 = vmatmul.mubr.bf16.vlgmr.msra.gmra.mrb[64].mxu1 %v2209_v59  ;;  %2842 = vmatpush1.bf16.msra.mxu0 %v4162_v56  ;;  %v2197_v37 = vmax.f32 %v5516_v35, 0.0  ;;  %v2174_v42 = vmax.f32 %v5519_v40, 0.0 }
 0x3c8   : > { %v2175_v23 = vmax.f32 %v5527_v11, 0.0  ;;  %v5542_v44 = vadd.f32 %v2109_v54, %v5459_v9  ;;  %2958 = vmatpush1.bf16.msra.mxu1 %v4162_v56  ;;  %2843 = vmatprep.subr.bf16.mxu0 %v4167_v12  ;;  %v2198_v45 = vmax.f32 %v5524_v43, 0.0 }
 0x3c9   : > { %v2199_v30 = vmax.f32 %v5531_v22, 0.0  ;;  %v2176_v24 = vmax.f32 %v5534_v15, 0.0  ;;  %v1967_v2 = vpop.f32.mrb[56].mxu0  ;;  %2959 = vmatprep.subr.bf16.mxu1 %v4167_v12 }
 0x3ca   : > { %v2200_v57 = vmax.f32 %v5542_v44, 0.0  ;;  %v1994_v60 = vadd.f32 %v1967_v2, %v5292_v33  ;;  %v2083_v59 = vpop.f32.mrb[56].mxu1  ;;  %v1969_v47 = vpop.f32.mrb[57].mxu0  ;;  %v2187_v16 = vpack.c.bf16 %v2175_v23, %v2173_v39 }
 0x3cb   : > { %v2110_v19 = vadd.f32 %v2083_v59, %v5300_v13  ;;  %v1995_v21 = vadd.f32 %v1969_v47, %v5303_v5  ;;  %v2085_v1 = vpop.f32.mrb[57].mxu1  ;;  %v1971_v56 = vpop.f32.mrb[58].mxu0  ;;  %v2188_v10 = vpack.c.bf16 %v2176_v24, %v2174_v42  ;;  %v2211_v20 = vpack.c.bf16 %v2199_v30, %v2197_v37  ;;  %2844 = vmatpush1.bf16.msra.mxu0 %v4165_v46  ;;  %v4168_v5 = vld [vmem:[%s6052_s1 + $0x520] ss:$8 sps:$4 sm:$0xff]  }
 0x3cc   : > { %v5557_v8 = vadd.f32 %v5456_v55, %v1994_v60  ;;  %v2111_v33 = vadd.f32 %v2085_v1, %v5311_v32  ;;  %v1996_v27 = vadd.f32 %v1971_v56, %v5314_v25  ;;  %v2087_v12 = vpop.f32.mrb[58].mxu1  ;;  %v1973_v13 = vpop.f32.mrb[59].mxu0  ;;  %v2212_v18 = vpack.c.bf16 %v2200_v57, %v2198_v45  ;;  %2960 = vmatpush1.bf16.msra.mxu1 %v4165_v46  ;;  %v4173_v25 = vld [vmem:[%s6052_s1 + $0x534] ss:$8 sps:$4 sm:$0xff]  }
 0x3cd   : > { %v5565_v0 = vadd.f32 %v2110_v19, %v5456_v55  ;;  %v5568_v31 = vadd.f32 %v5459_v9, %v1995_v21  ;;  %v2112_v54 = vadd.f32 %v2087_v12, %v5318_v6  ;;  %v1997_v32 = vadd.f32 %v1973_v13, %v5321_v61  ;;  %v2089_v39 = vpop.f32.mrb[59].mxu1  ;;  %2419 = vmatprep.mubr.bf16.mxu0 %v2188_v10  ;;  %v4176_v12 = vld [vmem:[%s6052_s1 + $0x544] ss:$8 sps:$4 sm:$0xff]  }
 0x3ce   : > { %v5576_v46 = vadd.f32 %v2111_v33, %v5459_v9  ;;  %v5579_v23 = vadd.f32 %v5456_v55, %v1996_v27  ;;  %v2113_v37 = vadd.f32 %v2089_v39, %v5325_v17  ;;  %2535 = vmatprep.mubr.bf16.mxu1 %v2212_v18  ;;  %2420 = vmatmul.mubr.bf16.gmra.mrb[68].mxu0 %v2187_v16  ;;  %v4171_v17 = vld [vmem:[%s6052_s1 + $0x530] ss:$8 sps:$4 sm:$0xff]   ;;  %v2177_v24 = vmax.f32 %v5557_v8, 0.0 }
 0x3cf   : > { %v5583_v6 = vadd.f32 %v2112_v54, %v5456_v55  ;;  %v5586_v61 = vadd.f32 %v5459_v9, %v1997_v32  ;;  %2536 = vmatmul.mubr.bf16.gmra.mrb[68].mxu1 %v2211_v20  ;;  %2845 = vmatprep.subr.bf16.mxu0 %v4170_v49  ;;  %v2178_v2 = vmax.f32 %v5568_v31, 0.0  ;;  %v2201_v59 = vmax.f32 %v5565_v0, 0.0 }
 0x3d0   : > { %v2179_v42 = vmax.f32 %v5579_v23, 0.0  ;;  %v5590_v30 = vadd.f32 %v2113_v37, %v5459_v9  ;;  %2961 = vmatprep.subr.bf16.mxu1 %v4170_v49  ;;  %2846 = vmatpush1.bf16.msra.mxu0 %v4168_v5  ;;  %v2202_v47 = vmax.f32 %v5576_v46, 0.0  ;;  %v4179_v37 = vld [vmem:[%s6052_s1 + $0x554] ss:$8 sps:$4 sm:$0xff]  }
 0x3d1   : > { %v2203_v45 = vmax.f32 %v5583_v6, 0.0  ;;  %v2180_v57 = vmax.f32 %v5586_v61, 0.0  ;;  %2962 = vmatpush1.bf16.msra.mxu1 %v4168_v5  ;;  %2847 = vmatprep.subr.bf16.mxu0 %v4173_v25 }
 0x3d2   : > { %v1977_v60 = vpop.f32.mrb[60].mxu0  ;;  %v2204_v16 = vmax.f32 %v5590_v30, 0.0  ;;  %2963 = vmatprep.subr.bf16.mxu1 %v4173_v25  ;;  %v2189_v27 = vpack.c.bf16 %v2179_v42, %v2177_v24 }
 0x3d3   : > { %v1998_v19 = vadd.f32 %v1977_v60, %v5349_v48  ;;  %v2093_v21 = vpop.f32.mrb[60].mxu1  ;;  %v1979_v1 = vpop.f32.mrb[61].mxu0  ;;  %v2190_v33 = vpack.c.bf16 %v2180_v57, %v2178_v2  ;;  %v2213_v32 = vpack.c.bf16 %v2203_v45, %v2201_v59 }
 0x3d4   : > { %v2114_v56 = vadd.f32 %v2093_v21, %v5367_v38  ;;  %v1999_v10 = vadd.f32 %v1979_v1, %v5352_v34  ;;  %v2095_v20 = vpop.f32.mrb[61].mxu1  ;;  %v1981_v49 = vpop.f32.mrb[62].mxu0  ;;  %v2214_v54 = vpack.c.bf16 %v2204_v16, %v2202_v47  ;;  %2848 = vmatpush1.bf16.msra.mxu0 %v4171_v17  ;;  %v4174_v34 = vld [vmem:[%s6052_s1 + $0x540] ss:$8 sps:$4 sm:$0xff]   ;;  %v4182_v1 = vld [vmem:[%s6052_s1 + $0x564] ss:$8 sps:$4 sm:$0xff]  }
 0x3d5   : > { %v2115_v13 = vadd.f32 %v2095_v20, %v5360_v14  ;;  %v2000_v18 = vadd.f32 %v1981_v49, %v5363_v51  ;;  %v2097_v48 = vpop.f32.mrb[62].mxu1  ;;  %v1983_v5 = vpop.f32.mrb[63].mxu0  ;;  %v5614_v38 = vadd.f32 %v5456_v55, %v1998_v19  ;;  %2429 = vmatprep.mubr.bf16.mxu0 %v2190_v33  ;;  %2849 = vmatprep.subr.bf16.mxu0 %v4176_v12  ;;  %v4180_v20 = vld [vmem:[%s6052_s1 + $0x560] ss:$8 sps:$4 sm:$0xff]   ;;  %v4185_v33 = vld [vmem:[%s6052_s1 + $0x574] ss:$8 sps:$4 sm:$0xff]  }
 0x3d6   : > { %v5617_v39 = vadd.f32 %v5459_v9, %v1999_v10  ;;  %v2116_v25 = vadd.f32 %v2097_v48, %v5370_v3  ;;  %v2001_v14 = vadd.f32 %v1983_v5, %v5373_v7  ;;  %v2099_v51 = vpop.f32.mrb[63].mxu1  ;;  %2545 = vmatprep.mubr.bf16.mxu1 %v2214_v54  ;;  %2430 = vmatmul.mubr.bf16.gmra.mrb[72].mxu0 %v2189_v27  ;;  %v4183_v27 = vld [vmem:[%s6052_s1 + $0x570] ss:$8 sps:$4 sm:$0xff]   ;;  %v4194_v5 = vld [vmem:[%s6052_s1 + $0x5a4] ss:$8 sps:$4 sm:$0xff]  }
 0x3d7   : > { %v5625_v42 = vadd.f32 %v2115_v13, %v5459_v9  ;;  %v5628_v24 = vadd.f32 %v5456_v55, %v2000_v18  ;;  %v2117_v2 = vadd.f32 %v2099_v51, %v5377_v53  ;;  %v5632_v3 = vadd.f32 %v2114_v56, %v5456_v55  ;;  %2546 = vmatmul.mubr.bf16.gmra.mrb[72].mxu1 %v2213_v32  ;;  %v4177_v53 = vld [vmem:[%s6052_s1 + $0x550] ss:$8 sps:$4 sm:$0xff]   ;;  %v4186_v13 = vld [vmem:[%s6052_s1 + $0x580] ss:$8 sps:$4 sm:$0xff]   ;;  %v4191_v18 = vld [vmem:[%s6052_s1 + $0x594] ss:$8 sps:$4 sm:$0xff]  }
 0x3d8   : > { %v5635_v7 = vadd.f32 %v2116_v25, %v5456_v55  ;;  %v5638_v45 = vadd.f32 %v5459_v9, %v2001_v14  ;;  %2964 = vmatpush1.bf16.msra.mxu1 %v4171_v17  ;;  %2850 = vmatpush1.bf16.msra.mxu0 %v4174_v34  ;;  %v2182_v59 = vmax.f32 %v5617_v39, 0.0  ;;  %v2181_v16 = vmax.f32 %v5614_v38, 0.0  ;;  %v4189_v48 = vld [vmem:[%s6052_s1 + $0x590] ss:$8 sps:$4 sm:$0xff]   ;;  %v4192_v54 = vld [vmem:[%s6052_s1 + $0x5a0] ss:$8 sps:$4 sm:$0xff]  }
 0x3d9   : > { %v2183_v57 = vmax.f32 %v5628_v24, 0.0  ;;  %v5642_v60 = vadd.f32 %v2117_v2, %v5459_v9  ;;  %2965 = vmatprep.subr.bf16.mxu1 %v4176_v12  ;;  %2851 = vmatprep.subr.bf16.mxu0 %v4179_v37  ;;  %v2206_v19 = vmax.f32 %v5625_v42, 0.0  ;;  %v2205_v17 = vmax.f32 %v5632_v3, 0.0  ;;  %v4188_v12 = vld [vmem:[%s6052_s1 + $0x584] ss:$8 sps:$4 sm:$0xff]  }
 0x3da   : > { %v2207_v55 = vmax.f32 %v5635_v7, 0.0  ;;  %v2184_v47 = vmax.f32 %v5638_v45, 0.0  ;;  %v4197_v32 = vld [vmem:[%s6052_s1 + $0x5b4] ss:$8 sps:$4 sm:$0xff]   ;;  %v4200_v25 = vld [vmem:[%s6052_s1 + $0x5c4] ss:$8 sps:$4 sm:$0xff]  }
 0x3db   : > { %v2208_v9 = vmax.f32 %v5642_v60, 0.0  ;;  %v2191_v10 = vpack.c.bf16 %v2183_v57, %v2181_v16  ;;  %v4198_v14 = vld [vmem:[%s6052_s1 + $0x5c0] ss:$8 sps:$4 sm:$0xff]   ;;  %v4203_v51 = vld [vmem:[%s6052_s1 + $0x5d4] ss:$8 sps:$4 sm:$0xff]  }
 0x3dc   : > { %v2192_v21 = vpack.c.bf16 %v2184_v47, %v2182_v59  ;;  %2966 = vmatpush1.bf16.msra.mxu1 %v4174_v34  ;;  %2852 = vmatpush1.bf16.msra.mxu0 %v4177_v53  ;;  %v2215_v49 = vpack.c.bf16 %v2207_v55, %v2205_v17  ;;  %v4195_v34 = vld [vmem:[%s6052_s1 + $0x5b0] ss:$8 sps:$4 sm:$0xff]   ;;  %v4206_v2 = vld [vmem:[%s6052_s1 + $0x5e4] ss:$8 sps:$4 sm:$0xff]   ;;  %v4204_v57 = vld [vmem:[%s6052_s1 + $0x5e0] ss:$8 sps:$4 sm:$0xff]  }
 0x3dd   : > { %v2216_v56 = vpack.c.bf16 %v2208_v9, %v2206_v19  ;;  %2967 = vmatprep.subr.bf16.mxu1 %v4179_v37  ;;  %2853 = vmatprep.subr.bf16.mxu0 %v4182_v1  ;;  %v4201_v37 = vld [vmem:[%s6052_s1 + $0x5d0] ss:$8 sps:$4 sm:$0xff]   ;;  %v4210_v55 = vld [vmem:[%s6054_s3 + $0x40] sm:$0xff]   ;;  %v3716_v47 = vld [vmem:[%s6053_s2 + $0x8] sm:$0x3] }
 0x3de   : > { %2439 = vmatprep.mubr.bf16.mxu0 %v2192_v21  ;;  %v4207_v59 = vld [vmem:[%s6052_s1 + $0x5f0] ss:$8 sps:$4 sm:$0xff]   ;;  %v5721_v16 = vrot.slane %v3716_v47, %v4621_v41  ;;  %v5724_v9 = vrot.slane %v3716_v47, %v4626_v4 }
 0x3df   : > { %2555 = vmatprep.mubr.bf16.mxu1 %v2216_v56  ;;  %2440 = vmatmul.mubr.bf16.gmra.mrb[76].mxu0 %v2191_v10 }
 0x3e0   : > { %2556 = vmatmul.mubr.bf16.gmra.mrb[76].mxu1 %v2215_v49  ;;  %2854 = vmatpush1.bf16.msra.mxu0 %v4180_v20 }
 0x3e1   : > { %2968 = vmatpush1.bf16.msra.mxu1 %v4177_v53  ;;  %2855 = vmatprep.subr.bf16.mxu0 %v4185_v33  ;;  %v4209_v53 = vld [vmem:[%s6052_s1 + $0x5f4] ss:$8 sps:$4 sm:$0xff]  }
 0x3e2   : > { %2969 = vmatprep.subr.bf16.mxu1 %v4182_v1 }
 0x3e4   : > { %2856 = vmatpush1.bf16.msra.mxu0 %v4183_v27 }
 0x3e5   : > { %2970 = vmatpush1.bf16.msra.mxu1 %v4180_v20  ;;  %2857 = vmatprep.subr.bf16.mxu0 %v4188_v12 }
 0x3e6   : > { %2971 = vmatprep.subr.bf16.mxu1 %v4185_v33 }
 0x3e8   : > { %2858 = vmatpush1.bf16.msra.mxu0 %v4186_v13 }
 0x3e9   : > { %2972 = vmatpush1.bf16.msra.mxu1 %v4183_v27  ;;  %2859 = vmatprep.subr.bf16.mxu0 %v4191_v18 }
 0x3ea   : > { %2973 = vmatprep.subr.bf16.mxu1 %v4188_v12 }
 0x3ec   : > { %2860 = vmatpush1.bf16.msra.mxu0 %v4189_v48 }
 0x3ed   : > { %2974 = vmatpush1.bf16.msra.mxu1 %v4186_v13  ;;  %2861 = vmatprep.subr.bf16.mxu0 %v4194_v5 }
 0x3ee   : > { %2975 = vmatprep.subr.bf16.mxu1 %v4191_v18 }
 0x3f0   : > { %2862 = vmatpush1.bf16.msra.mxu0 %v4192_v54 }
 0x3f1   : > { %2976 = vmatpush1.bf16.msra.mxu1 %v4189_v48  ;;  %2863 = vmatprep.subr.bf16.mxu0 %v4197_v32 }
 0x3f2   : > { %2977 = vmatprep.subr.bf16.mxu1 %v4194_v5 }
 0x3f4   : > { %2864 = vmatpush1.bf16.msra.mxu0 %v4195_v34 }
 0x3f5   : > { %2978 = vmatpush1.bf16.msra.mxu1 %v4192_v54  ;;  %2865 = vmatprep.subr.bf16.mxu0 %v4200_v25 }
 0x3f6   : > { %2979 = vmatprep.subr.bf16.mxu1 %v4197_v32 }
 0x3f8   : > { %2866 = vmatpush1.bf16.msra.mxu0 %v4198_v14 }
 0x3f9   : > { %2980 = vmatpush1.bf16.msra.mxu1 %v4195_v34  ;;  %2867 = vmatprep.subr.bf16.mxu0 %v4203_v51 }
 0x3fa   : > { %2981 = vmatprep.subr.bf16.mxu1 %v4200_v25 }
 0x3fc   : > { %2868 = vmatpush1.bf16.msra.mxu0 %v4201_v37 }
 0x3fd   : > { %2982 = vmatpush1.bf16.msra.mxu1 %v4198_v14  ;;  %2869 = vmatprep.subr.bf16.mxu0 %v4206_v2 }
 0x3fe   : > { %2983 = vmatprep.subr.bf16.mxu1 %v4203_v51 }
 0x400   : > { %2870 = vmatpush1.bf16.msra.mxu0 %v4204_v57 }
 0x401   : > { %2984 = vmatpush1.bf16.msra.mxu1 %v4201_v37  ;;  %2871 = vmatprep.subr.bf16.mxu0 %v4209_v53 }
 0x402   : > { %2985 = vmatprep.subr.bf16.mxu1 %v4206_v2 }
 0x404   : > { %2872 = vmatpush1.bf16.msra.mxu0 %v4207_v59 }
 0x405   : > { %2986 = vmatpush1.bf16.msra.mxu1 %v4204_v57  ;;  %3834 = vmatprep.subr.bf16.mxu0 %v4210_v55 }
 0x406   : > { %2987 = vmatprep.subr.bf16.mxu1 %v4209_v53 }
 0x409   : > { %2988 = vmatpush1.bf16.msra.mxu1 %v4207_v59 }
 0x40a   : > { %3874 = vmatprep.subr.bf16.mxu1 %v4210_v55 }
 0x499   : > { %v2411_v19 = vpop.f32.mrb[64].mxu0 }
 0x49a   : > { %v2450_v17 = vadd.f32 %v2411_v19, %v5465_v26  ;;  %v2527_v21 = vpop.f32.mrb[64].mxu1  ;;  %v2413_v1 = vpop.f32.mrb[65].mxu0 }
 0x49b   : > { %v2566_v56 = vadd.f32 %v2527_v21, %v5470_v36  ;;  %v2451_v10 = vadd.f32 %v2413_v1, %v5473_v62  ;;  %v2529_v20 = vpop.f32.mrb[65].mxu1  ;;  %v2415_v49 = vpop.f32.mrb[66].mxu0 }
 0x49c   : > { %v5730_v33 = vadd.f32 %v5721_v16, %v2450_v17  ;;  %v2567_v27 = vadd.f32 %v2529_v20, %v5478_v58  ;;  %v2452_v12 = vadd.f32 %v2415_v49, %v5481_v52  ;;  %v2531_v13 = vpop.f32.mrb[66].mxu1  ;;  %v2417_v18 = vpop.f32.mrb[67].mxu0  ;;  %v4211_v49 = vld [vmem:[%s6054_s3] sm:$0xff]  }
 0x49d   : > { %v5735_v48 = vadd.f32 %v2566_v56, %v5721_v16  ;;  %v5738_v26 = vadd.f32 %v5724_v9, %v2451_v10  ;;  %v2568_v36 = vadd.f32 %v2531_v13, %v5485_v50  ;;  %v2453_v62 = vadd.f32 %v2417_v18, %v5488_v29  ;;  %v2533_v5 = vpop.f32.mrb[67].mxu1 }
 0x49e   : > { %v5743_v54 = vadd.f32 %v2567_v27, %v5724_v9  ;;  %v5746_v58 = vadd.f32 %v5721_v16, %v2452_v12  ;;  %v2569_v52 = vadd.f32 %v2533_v5, %v5493_v63  ;;  %v2633_v25 = vmax.f32 %v5730_v33, 0.0 }
 0x49f   : > { %v5750_v32 = vadd.f32 %v2568_v36, %v5721_v16  ;;  %v5753_v34 = vadd.f32 %v5724_v9, %v2453_v62  ;;  %v2657_v14 = vmax.f32 %v5735_v48, 0.0  ;;  %v2634_v51 = vmax.f32 %v5738_v26, 0.0 }
 0x4a0   : > { %v2635_v50 = vmax.f32 %v5746_v58, 0.0  ;;  %v5758_v29 = vadd.f32 %v2569_v52, %v5724_v9  ;;  %v2658_v57 = vmax.f32 %v5743_v54, 0.0 }
 0x4a1   : > { %v2659_v37 = vmax.f32 %v5750_v32, 0.0  ;;  %v2636_v63 = vmax.f32 %v5753_v34, 0.0  ;;  %v2421_v2 = vpop.f32.mrb[68].mxu0 }
 0x4a2   : > { %v2649_v53 = vpack.c.bf16 %v2635_v50, %v2633_v25  ;;  %v2660_v59 = vmax.f32 %v5758_v29, 0.0  ;;  %v2454_v55 = vadd.f32 %v2421_v2, %v5508_v28  ;;  %v2537_v47 = vpop.f32.mrb[68].mxu1  ;;  %v2423_v19 = vpop.f32.mrb[69].mxu0 }
 0x4a3   : > { %v2673_v17 = vpack.c.bf16 %v2659_v37, %v2657_v14  ;;  %v2570_v21 = vadd.f32 %v2537_v47, %v5516_v35  ;;  %v2455_v1 = vadd.f32 %v2423_v19, %v5519_v40  ;;  %v2539_v56 = vpop.f32.mrb[69].mxu1  ;;  %v2425_v10 = vpop.f32.mrb[70].mxu0  ;;  %v2650_v20 = vpack.c.bf16 %v2636_v63, %v2634_v51  ;;  %v4212_v35 = vld [vmem:[%s6054_s3 + $0x48] sm:$0xff]  }
 0x4a4   : > { %v5773_v27 = vadd.f32 %v5721_v16, %v2454_v55  ;;  %v2571_v12 = vadd.f32 %v2539_v56, %v5524_v43  ;;  %v2456_v28 = vadd.f32 %v2425_v10, %v5527_v11  ;;  %v2541_v13 = vpop.f32.mrb[70].mxu1  ;;  %v2427_v18 = vpop.f32.mrb[71].mxu0  ;;  %v2674_v36 = vpack.c.bf16 %v2660_v59, %v2658_v57 }
 0x4a5   : > { %v5781_v40 = vadd.f32 %v2570_v21, %v5721_v16  ;;  %v5784_v62 = vadd.f32 %v5724_v9, %v2455_v1  ;;  %v2572_v5 = vadd.f32 %v2541_v13, %v5531_v22  ;;  %v2457_v52 = vadd.f32 %v2427_v18, %v5534_v15  ;;  %v2543_v43 = vpop.f32.mrb[71].mxu1  ;;  %2873 = vmatprep.mubr.bf16.mxu0 %v2650_v20  ;;  %v4213_v22 = vld [vmem:[%s6054_s3 + $0x8] sm:$0xff]   ;;  %v4214_v13 = vld [vmem:[%s6054_s3 + $0x50] sm:$0xff]  }
 0x4a6   : > { %v5789_v11 = vadd.f32 %v2571_v12, %v5724_v9  ;;  %v5792_v25 = vadd.f32 %v5721_v16, %v2456_v28  ;;  %v2573_v50 = vadd.f32 %v2543_v43, %v5542_v44  ;;  %2989 = vmatprep.mubr.bf16.mxu1 %v2674_v36  ;;  %2874 = vmatmul.mubr.bf16.vlgmr.msra.gmra.mrb[80].mxu0 %v2649_v53  ;;  %v2637_v15 = vmax.f32 %v5773_v27, 0.0 }
 0x4a7   : > { %v5796_v14 = vadd.f32 %v2572_v5, %v5721_v16  ;;  %v5799_v51 = vadd.f32 %v5724_v9, %v2457_v52  ;;  %2990 = vmatmul.mubr.bf16.vlgmr.msra.gmra.mrb[80].mxu1 %v2673_v17  ;;  %3835 = vmatpush3.bf16.msra.mxu0 %v4211_v49  ;;  %v2661_v63 = vmax.f32 %v5781_v40, 0.0  ;;  %v2638_v2 = vmax.f32 %v5784_v62, 0.0 }
 0x4a8   : > { %v2639_v37 = vmax.f32 %v5792_v25, 0.0  ;;  %v5807_v44 = vadd.f32 %v2573_v50, %v5724_v9  ;;  %3875 = vmatpush3.bf16.msra.mxu1 %v4211_v49  ;;  %3836 = vmatprep.subr.bf16.mxu0 %v4212_v35  ;;  %v2662_v55 = vmax.f32 %v5789_v11, 0.0 }
 0x4a9   : > { %v2663_v57 = vmax.f32 %v5796_v14, 0.0  ;;  %v2640_v53 = vmax.f32 %v5799_v51, 0.0  ;;  %v2431_v59 = vpop.f32.mrb[72].mxu0  ;;  %3876 = vmatprep.subr.bf16.mxu1 %v4212_v35 }
 0x4aa   : > { %v2664_v47 = vmax.f32 %v5807_v44, 0.0  ;;  %v2458_v19 = vadd.f32 %v2431_v59, %v5557_v8  ;;  %v2547_v17 = vpop.f32.mrb[72].mxu1  ;;  %v2433_v21 = vpop.f32.mrb[73].mxu0  ;;  %v2651_v1 = vpack.c.bf16 %v2639_v37, %v2637_v15 }
 0x4ab   : > { %v2574_v56 = vadd.f32 %v2547_v17, %v5565_v0  ;;  %v2459_v10 = vadd.f32 %v2433_v21, %v5568_v31  ;;  %v2549_v20 = vpop.f32.mrb[73].mxu1  ;;  %v2435_v49 = vpop.f32.mrb[74].mxu0  ;;  %v2652_v12 = vpack.c.bf16 %v2640_v53, %v2638_v2  ;;  %v2675_v28 = vpack.c.bf16 %v2663_v57, %v2661_v63  ;;  %3837 = vmatpush3.bf16.msra.mxu0 %v4213_v22  ;;  %v4215_v31 = vld [vmem:[%s6054_s3 + $0x10] sm:$0xff]  }
 0x4ac   : > { %v5822_v18 = vadd.f32 %v5721_v16, %v2458_v19  ;;  %v2575_v8 = vadd.f32 %v2549_v20, %v5576_v46  ;;  %v2460_v36 = vadd.f32 %v2435_v49, %v5579_v23  ;;  %v2551_v35 = vpop.f32.mrb[74].mxu1  ;;  %v2437_v0 = vpop.f32.mrb[75].mxu0  ;;  %v2676_v5 = vpack.c.bf16 %v2664_v47, %v2662_v55  ;;  %3877 = vmatpush3.bf16.msra.mxu1 %v4213_v22  ;;  %v4216_v23 = vld [vmem:[%s6054_s3 + $0x58] sm:$0xff]  }
 0x4ad   : > { %v5830_v52 = vadd.f32 %v2574_v56, %v5721_v16  ;;  %v5833_v43 = vadd.f32 %v5724_v9, %v2459_v10  ;;  %v2576_v50 = vadd.f32 %v2551_v35, %v5583_v6  ;;  %v2461_v46 = vadd.f32 %v2437_v0, %v5586_v61  ;;  %v2553_v15 = vpop.f32.mrb[75].mxu1  ;;  %2883 = vmatprep.mubr.bf16.mxu0 %v2652_v12  ;;  %v4218_v35 = vld [vmem:[%s6054_s3 + $0x60] sm:$0xff]  }
 0x4ae   : > { %v5841_v22 = vadd.f32 %v2575_v8, %v5724_v9  ;;  %v5844_v37 = vadd.f32 %v5721_v16, %v2460_v36  ;;  %v2577_v63 = vadd.f32 %v2553_v15, %v5590_v30  ;;  %2999 = vmatprep.mubr.bf16.mxu1 %v2676_v5  ;;  %2884 = vmatmul.mubr.bf16.gmra.mrb[84].mxu0 %v2651_v1  ;;  %v4217_v30 = vld [vmem:[%s6054_s3 + $0x18] sm:$0xff]   ;;  %v2641_v53 = vmax.f32 %v5822_v18, 0.0 }
 0x4af   : > { %v5848_v6 = vadd.f32 %v2576_v50, %v5721_v16  ;;  %v5851_v61 = vadd.f32 %v5724_v9, %v2461_v46  ;;  %3000 = vmatmul.mubr.bf16.gmra.mrb[84].mxu1 %v2675_v28  ;;  %3838 = vmatprep.subr.bf16.mxu0 %v4214_v13  ;;  %v2642_v59 = vmax.f32 %v5833_v43, 0.0  ;;  %v2665_v17 = vmax.f32 %v5830_v52, 0.0 }
 0x4b0   : > { %v2643_v2 = vmax.f32 %v5844_v37, 0.0  ;;  %v5855_v57 = vadd.f32 %v2577_v63, %v5724_v9  ;;  %3878 = vmatprep.subr.bf16.mxu1 %v4214_v13  ;;  %3839 = vmatpush3.bf16.msra.mxu0 %v4215_v31  ;;  %v2666_v21 = vmax.f32 %v5841_v22, 0.0 }
 0x4b1   : > { %v2667_v55 = vmax.f32 %v5848_v6, 0.0  ;;  %v2644_v47 = vmax.f32 %v5851_v61, 0.0  ;;  %3879 = vmatpush3.bf16.msra.mxu1 %v4215_v31  ;;  %3840 = vmatprep.subr.bf16.mxu0 %v4216_v23 }
 0x4b2   : > { %v2441_v19 = vpop.f32.mrb[76].mxu0  ;;  %v2668_v1 = vmax.f32 %v5855_v57, 0.0  ;;  %3880 = vmatprep.subr.bf16.mxu1 %v4216_v23  ;;  %v2653_v36 = vpack.c.bf16 %v2643_v2, %v2641_v53 }
 0x4b3   : > { %v2462_v56 = vadd.f32 %v2441_v19, %v5614_v38  ;;  %v2557_v10 = vpop.f32.mrb[76].mxu1  ;;  %v2443_v20 = vpop.f32.mrb[77].mxu0  ;;  %v2654_v8 = vpack.c.bf16 %v2644_v47, %v2642_v59  ;;  %v2677_v46 = vpack.c.bf16 %v2667_v55, %v2665_v17 }
 0x4b4   : > { %v2578_v49 = vadd.f32 %v2557_v10, %v5632_v3  ;;  %v2463_v12 = vadd.f32 %v2443_v20, %v5617_v39  ;;  %v2559_v28 = vpop.f32.mrb[77].mxu1  ;;  %v2445_v13 = vpop.f32.mrb[78].mxu0  ;;  %v2678_v50 = vpack.c.bf16 %v2668_v1, %v2666_v21  ;;  %3841 = vmatpush3.bf16.msra.mxu0 %v4217_v30  ;;  %v4219_v39 = vld [vmem:[%s6054_s3 + $0x20] sm:$0xff]  }
 0x4b5   : > { %v2579_v0 = vadd.f32 %v2559_v28, %v5625_v42  ;;  %v2464_v5 = vadd.f32 %v2445_v13, %v5628_v24  ;;  %v2561_v38 = vpop.f32.mrb[78].mxu1  ;;  %v2447_v31 = vpop.f32.mrb[79].mxu0  ;;  %v5879_v3 = vadd.f32 %v5721_v16, %v2462_v56  ;;  %2893 = vmatprep.mubr.bf16.mxu0 %v2654_v8  ;;  %3842 = vmatprep.subr.bf16.mxu0 %v4218_v35  ;;  %v4222_v28 = vld [vmem:[%s6054_s3 + $0x70] sm:$0xff]   ;;  %v4224_v8 = vld [vmem:[%s6054_s3 + $0x78] sm:$0xff]  }
 0x4b6   : > { %v5882_v15 = vadd.f32 %v5724_v9, %v2463_v12  ;;  %v2580_v23 = vadd.f32 %v2561_v38, %v5635_v7  ;;  %v2465_v42 = vadd.f32 %v2447_v31, %v5638_v45  ;;  %v2563_v24 = vpop.f32.mrb[79].mxu1  ;;  %3009 = vmatprep.mubr.bf16.mxu1 %v2678_v50  ;;  %2894 = vmatmul.mubr.bf16.gmra.mrb[88].mxu0 %v2653_v36  ;;  %v4221_v12 = vld [vmem:[%s6054_s3 + $0x28] sm:$0xff]   ;;  %v4223_v13 = vld [vmem:[%s6054_s3 + $0x30] sm:$0xff]   ;;  %v4225_v36 = vld [vmem:[%s6054_s3 + $0x38] sm:$0xff]  }
 0x4b7   : > { %v5887_v63 = vadd.f32 %v2579_v0, %v5724_v9  ;;  %v5890_v2 = vadd.f32 %v5721_v16, %v2464_v5  ;;  %v2581_v53 = vadd.f32 %v2563_v24, %v5642_v60  ;;  %v5894_v59 = vadd.f32 %v2578_v49, %v5721_v16  ;;  %3010 = vmatmul.mubr.bf16.gmra.mrb[88].mxu1 %v2677_v46  ;;  %v4220_v49 = vld [vmem:[%s6054_s3 + $0x68] sm:$0xff]  }
 0x4b8   : > { %v5897_v55 = vadd.f32 %v2580_v23, %v5721_v16  ;;  %v5900_v7 = vadd.f32 %v5724_v9, %v2465_v42  ;;  %3881 = vmatpush3.bf16.msra.mxu1 %v4217_v30  ;;  %3843 = vmatpush3.bf16.msra.mxu0 %v4219_v39  ;;  %v2646_v60 = vmax.f32 %v5882_v15, 0.0  ;;  %v2645_v16 = vmax.f32 %v5879_v3, 0.0 }
 0x4b9   : > { %v2647_v45 = vmax.f32 %v5890_v2, 0.0  ;;  %v5904_v47 = vadd.f32 %v2581_v53, %v5724_v9  ;;  %3882 = vmatprep.subr.bf16.mxu1 %v4218_v35  ;;  %v2670_v21 = vmax.f32 %v5887_v63, 0.0  ;;  %v2669_v56 = vmax.f32 %v5894_v59, 0.0  ;;  %3844 = vmatprep.subr.bf16.mxu0 %v4220_v49  ;;  %v3781_v35 = vld [vmem:[%s6053_s2 + $0xa] sm:$0x3] }
 0x4ba   : > { %v2671_v19 = vmax.f32 %v5897_v55, 0.0  ;;  %v2648_v17 = vmax.f32 %v5900_v7, 0.0  ;;  %v5935_v0 = vrot.slane %v3781_v35, %v4621_v41  ;;  %v5938_v38 = vrot.slane %v3781_v35, %v4626_v4 }
 0x4bb   : > { %v2672_v1 = vmax.f32 %v5904_v47, 0.0  ;;  %v2655_v20 = vpack.c.bf16 %v2647_v45, %v2645_v16 }
 0x4bc   : > { %v2656_v10 = vpack.c.bf16 %v2648_v17, %v2646_v60  ;;  %3883 = vmatpush3.bf16.msra.mxu1 %v4219_v39  ;;  %v2679_v30 = vpack.c.bf16 %v2671_v19, %v2669_v56  ;;  %3845 = vmatpush3.bf16.msra.mxu0 %v4221_v12 }
 0x4bd   : > { %v2680_v9 = vpack.c.bf16 %v2672_v1, %v2670_v21  ;;  %3884 = vmatprep.subr.bf16.mxu1 %v4220_v49  ;;  %3846 = vmatprep.subr.bf16.mxu0 %v4222_v28 }
 0x4be   : > { %2903 = vmatprep.mubr.bf16.mxu0 %v2656_v10 }
 0x4bf   : > { %3019 = vmatprep.mubr.bf16.mxu1 %v2680_v9  ;;  %2904 = vmatmul.mubr.bf16.gmra.mrb[92].mxu0 %v2655_v20 }
 0x4c0   : > { %3020 = vmatmul.mubr.bf16.gmra.mrb[92].mxu1 %v2679_v30  ;;  %3847 = vmatpush3.bf16.msra.mxu0 %v4223_v13 }
 0x4c1   : > { %3885 = vmatpush3.bf16.msra.mxu1 %v4221_v12  ;;  %3848 = vmatprep.subr.bf16.mxu0 %v4224_v8 }
 0x4c2   : > { %3886 = vmatprep.subr.bf16.mxu1 %v4222_v28 }
 0x4c4   : > { %3849 = vmatpush3.bf16.msra.mxu0 %v4225_v36 }
 0x4c5   : > { %3887 = vmatpush3.bf16.msra.mxu1 %v4223_v13 }
 0x4c6   : > { %3888 = vmatprep.subr.bf16.mxu1 %v4224_v8 }
 0x4c9   : > { %3889 = vmatpush3.bf16.msra.mxu1 %v4225_v36 }
 0x579   : > { %v2875_v5 = vpop.f32.mrb[80].mxu0 }
 0x57a   : > { %v2914_v31 = vadd.f32 %v2875_v5, %v5730_v33  ;;  %v2991_v50 = vpop.f32.mrb[80].mxu1  ;;  %v2877_v46 = vpop.f32.mrb[81].mxu0 }
 0x57b   : > { %v3030_v39 = vadd.f32 %v2991_v50, %v5735_v48  ;;  %v2915_v23 = vadd.f32 %v2877_v46, %v5738_v26  ;;  %v2993_v42 = vpop.f32.mrb[81].mxu1  ;;  %v2879_v24 = vpop.f32.mrb[82].mxu0 }
 0x57c   : > { %v2941_v53 = vadd.f32 %v5935_v0, %v2914_v31  ;;  %v3031_v45 = vadd.f32 %v2993_v42, %v5743_v54  ;;  %v2916_v41 = vadd.f32 %v2879_v24, %v5746_v58  ;;  %v2995_v60 = vpop.f32.mrb[82].mxu1  ;;  %v2881_v19 = vpop.f32.mrb[83].mxu0 }
 0x57d   : > { %v3046_v4 = vadd.f32 %v3030_v39, %v5935_v0  ;;  %v2942_v33 = vadd.f32 %v5938_v38, %v2915_v23  ;;  %v3032_v17 = vadd.f32 %v2995_v60, %v5750_v32  ;;  %v2917_v48 = vadd.f32 %v2881_v19, %v5753_v34  ;;  %v2997_v16 = vpop.f32.mrb[83].mxu1 }
 0x57e   : > { %v3047_v26 = vadd.f32 %v3031_v45, %v5938_v38  ;;  %v2943_v21 = vadd.f32 %v5935_v0, %v2916_v41  ;;  %v3033_v1 = vadd.f32 %v2997_v16, %v5758_v29  ;;  %v3095_v56 = vmax.f32 %v2941_v53, 0.0 }
 0x57f   : > { %v3048_v54 = vadd.f32 %v3032_v17, %v5935_v0  ;;  %v2944_v58 = vadd.f32 %v5938_v38, %v2917_v48  ;;  %v3119_v20 = vmax.f32 %v3046_v4, 0.0  ;;  %v3096_v30 = vmax.f32 %v2942_v33, 0.0 }
 0x580   : > { %v3097_v10 = vmax.f32 %v2943_v21, 0.0  ;;  %v3049_v9 = vadd.f32 %v3033_v1, %v5938_v38  ;;  %v3120_v12 = vmax.f32 %v3047_v26, 0.0 }
 0x581   : > { %v3121_v32 = vmax.f32 %v3048_v54, 0.0  ;;  %v3098_v49 = vmax.f32 %v2944_v58, 0.0  ;;  %v2885_v34 = vpop.f32.mrb[84].mxu0 }
 0x582   : > { %v3111_v28 = vpack.c.bf16 %v3097_v10, %v3095_v56  ;;  %v3122_v13 = vmax.f32 %v3049_v9, 0.0  ;;  %v2918_v8 = vadd.f32 %v2885_v34, %v5773_v27  ;;  %v3001_v36 = vpop.f32.mrb[84].mxu1  ;;  %v2887_v29 = vpop.f32.mrb[85].mxu0 }
 0x583   : > { %v3135_v35 = vpack.c.bf16 %v3121_v32, %v3119_v20  ;;  %v3034_v5 = vadd.f32 %v3001_v36, %v5781_v40  ;;  %v2919_v31 = vadd.f32 %v2887_v29, %v5784_v62  ;;  %v3003_v50 = vpop.f32.mrb[85].mxu1  ;;  %v2889_v46 = vpop.f32.mrb[86].mxu0  ;;  %v3112_v39 = vpack.c.bf16 %v3098_v49, %v3096_v30 }
 0x584   : > { %v2945_v23 = vadd.f32 %v5935_v0, %v2918_v8  ;;  %v3035_v42 = vadd.f32 %v3003_v50, %v5789_v11  ;;  %v2920_v24 = vadd.f32 %v2889_v46, %v5792_v25  ;;  %v3005_v53 = vpop.f32.mrb[86].mxu1  ;;  %v2891_v45 = vpop.f32.mrb[87].mxu0  ;;  %v3136_v41 = vpack.c.bf16 %v3122_v13, %v3120_v12 }
 0x585   : > { %v3050_v27 = vadd.f32 %v3034_v5, %v5935_v0  ;;  %v2946_v60 = vadd.f32 %v5938_v38, %v2919_v31  ;;  %v3036_v40 = vadd.f32 %v3005_v53, %v5796_v14  ;;  %v2921_v62 = vadd.f32 %v2891_v45, %v5799_v51  ;;  %v3007_v19 = vpop.f32.mrb[87].mxu1  ;;  %3277 = vmatprep.mubr.bf16.mxu0 %v3112_v39 }
 0x586   : > { %v3051_v4 = vadd.f32 %v3035_v42, %v5938_v38  ;;  %v2947_v33 = vadd.f32 %v5935_v0, %v2920_v24  ;;  %v3037_v11 = vadd.f32 %v3007_v19, %v5807_v44  ;;  %3350 = vmatprep.mubr.bf16.mxu1 %v3136_v41  ;;  %3278 = vmatmul.mubr.bf16.vlgmr.msra.gmra.mrb[96].mxu0 %v3111_v28  ;;  %v3099_v48 = vmax.f32 %v2945_v23, 0.0 }
 0x587   : > { %v3052_v25 = vadd.f32 %v3036_v40, %v5935_v0  ;;  %v2948_v17 = vadd.f32 %v5938_v38, %v2921_v62  ;;  %3351 = vmatmul.mubr.bf16.vlgmr.msra.gmra.mrb[96].mxu1 %v3135_v35  ;;  %v3123_v51 = vmax.f32 %v3050_v27, 0.0  ;;  %v3100_v26 = vmax.f32 %v2946_v60, 0.0 }
 0x588   : > { %v3101_v16 = vmax.f32 %v2947_v33, 0.0  ;;  %v3053_v14 = vadd.f32 %v3037_v11, %v5938_v38  ;;  %v3124_v58 = vmax.f32 %v3051_v4, 0.0 }
 0x589   : > { %v3125_v21 = vmax.f32 %v3052_v25, 0.0  ;;  %v3102_v1 = vmax.f32 %v2948_v17, 0.0  ;;  %v2895_v54 = vpop.f32.mrb[88].mxu0 }
 0x58a   : > { %v3126_v56 = vmax.f32 %v3053_v14, 0.0  ;;  %v2922_v44 = vadd.f32 %v2895_v54, %v5822_v18  ;;  %v3011_v10 = vpop.f32.mrb[88].mxu1  ;;  %v2897_v9 = vpop.f32.mrb[89].mxu0  ;;  %v3113_v20 = vpack.c.bf16 %v3101_v16, %v3099_v48 }
 0x58b   : > { %v3038_v30 = vadd.f32 %v3011_v10, %v5830_v52  ;;  %v2923_v32 = vadd.f32 %v2897_v9, %v5833_v43  ;;  %v3013_v49 = vpop.f32.mrb[89].mxu1  ;;  %v2899_v34 = vpop.f32.mrb[90].mxu0  ;;  %v3114_v12 = vpack.c.bf16 %v3102_v1, %v3100_v26  ;;  %v3137_v28 = vpack.c.bf16 %v3125_v21, %v3123_v51 }
 0x58c   : > { %v2949_v13 = vadd.f32 %v5935_v0, %v2922_v44  ;;  %v3039_v8 = vadd.f32 %v3013_v49, %v5841_v22  ;;  %v2924_v36 = vadd.f32 %v2899_v34, %v5844_v37  ;;  %v3015_v29 = vpop.f32.mrb[90].mxu1  ;;  %v2901_v35 = vpop.f32.mrb[91].mxu0  ;;  %v3138_v18 = vpack.c.bf16 %v3126_v56, %v3124_v58 }
 0x58d   : > { %v3054_v5 = vadd.f32 %v3038_v30, %v5935_v0  ;;  %v2950_v31 = vadd.f32 %v5938_v38, %v2923_v32  ;;  %v3040_v52 = vadd.f32 %v3015_v29, %v5848_v6  ;;  %v2925_v43 = vadd.f32 %v2901_v35, %v5851_v61  ;;  %v3017_v50 = vpop.f32.mrb[91].mxu1  ;;  %3285 = vmatprep.mubr.bf16.mxu0 %v3114_v12 }
 0x58e   : > { %v3055_v46 = vadd.f32 %v3039_v8, %v5938_v38  ;;  %v2951_v39 = vadd.f32 %v5935_v0, %v2924_v36  ;;  %v3041_v22 = vadd.f32 %v3017_v50, %v5855_v57  ;;  %3358 = vmatprep.mubr.bf16.mxu1 %v3138_v18  ;;  %3286 = vmatmul.mubr.bf16.gmra.mrb[100].mxu0 %v3113_v20  ;;  %v3103_v42 = vmax.f32 %v2949_v13, 0.0 }
 0x58f   : > { %v3056_v37 = vadd.f32 %v3040_v52, %v5935_v0  ;;  %v2952_v23 = vadd.f32 %v5938_v38, %v2925_v43  ;;  %3359 = vmatmul.mubr.bf16.gmra.mrb[100].mxu1 %v3137_v28  ;;  %v3127_v61 = vmax.f32 %v3054_v5, 0.0  ;;  %v3104_v53 = vmax.f32 %v2950_v31, 0.0 }
 0x590   : > { %v3105_v24 = vmax.f32 %v2951_v39, 0.0  ;;  %v3057_v6 = vadd.f32 %v3041_v22, %v5938_v38  ;;  %v3128_v60 = vmax.f32 %v3055_v46, 0.0 }
 0x591   : > { %v3129_v45 = vmax.f32 %v3056_v37, 0.0  ;;  %v3106_v41 = vmax.f32 %v2952_v23, 0.0 }
 0x592   : > { %v2905_v27 = vpop.f32.mrb[92].mxu0  ;;  %v3130_v40 = vmax.f32 %v3057_v6, 0.0  ;;  %v3115_v4 = vpack.c.bf16 %v3105_v24, %v3103_v42 }
 0x593   : > { %v2926_v57 = vadd.f32 %v2905_v27, %v5879_v3  ;;  %v3021_v62 = vpop.f32.mrb[92].mxu1  ;;  %v2907_v19 = vpop.f32.mrb[93].mxu0  ;;  %v3116_v48 = vpack.c.bf16 %v3106_v41, %v3104_v53  ;;  %v3139_v16 = vpack.c.bf16 %v3129_v45, %v3127_v61 }
 0x594   : > { %v3042_v33 = vadd.f32 %v3021_v62, %v5894_v59  ;;  %v2927_v11 = vadd.f32 %v2907_v19, %v5882_v15  ;;  %v3023_v25 = vpop.f32.mrb[93].mxu1  ;;  %v2909_v17 = vpop.f32.mrb[94].mxu0  ;;  %v3140_v3 = vpack.c.bf16 %v3130_v40, %v3128_v60 }
 0x595   : > { %v2953_v14 = vadd.f32 %v5935_v0, %v2926_v57  ;;  %v3043_v51 = vadd.f32 %v3023_v25, %v5887_v63  ;;  %v2928_v26 = vadd.f32 %v2909_v17, %v5890_v2  ;;  %v3025_v21 = vpop.f32.mrb[94].mxu1  ;;  %v2911_v1 = vpop.f32.mrb[95].mxu0  ;;  %3293 = vmatprep.mubr.bf16.mxu0 %v3116_v48 }
 0x596   : > { %v3058_v54 = vadd.f32 %v3042_v33, %v5935_v0  ;;  %v2954_v58 = vadd.f32 %v5938_v38, %v2927_v11  ;;  %v3044_v59 = vadd.f32 %v3025_v21, %v5897_v55  ;;  %v2929_v15 = vadd.f32 %v2911_v1, %v5900_v7  ;;  %v3027_v56 = vpop.f32.mrb[95].mxu1  ;;  %3366 = vmatprep.mubr.bf16.mxu1 %v3140_v3 }
 0x597   : > { %v3059_v44 = vadd.f32 %v3043_v51, %v5938_v38  ;;  %v2955_v10 = vadd.f32 %v5935_v0, %v2928_v26  ;;  %v3045_v63 = vadd.f32 %v3027_v56, %v5904_v47  ;;  %3294 = vmatmul.mubr.bf16.gmra.mrb[104].mxu0 %v3115_v4  ;;  %3367 = vmatmul.mubr.bf16.gmra.mrb[104].mxu1 %v3139_v16  ;;  %v3107_v20 = vmax.f32 %v2953_v14, 0.0 }
 0x598   : > { %v3060_v2 = vadd.f32 %v3044_v59, %v5935_v0  ;;  %v2956_v9 = vadd.f32 %v5938_v38, %v2929_v15  ;;  %v3131_v7 = vmax.f32 %v3058_v54, 0.0  ;;  %v3108_v32 = vmax.f32 %v2954_v58, 0.0 }
 0x599   : > { %v3109_v30 = vmax.f32 %v2955_v10, 0.0  ;;  %v3061_v55 = vadd.f32 %v3045_v63, %v5938_v38  ;;  %v3132_v12 = vmax.f32 %v3059_v44, 0.0  ;;  %v6007_v38 = vld [vmem:[%s6055_s4] ss:$0 sm:$0xff] }
 0x59a   : > { %v3133_v49 = vmax.f32 %v3060_v2, 0.0  ;;  %v3110_v34 = vmax.f32 %v2956_v9, 0.0 }
 0x59b   : > { %v3134_v28 = vmax.f32 %v3061_v55, 0.0  ;;  %v3117_v13 = vpack.c.bf16 %v3109_v30, %v3107_v20 }
 0x59c   : > { %v3118_v47 = vpack.c.bf16 %v3110_v34, %v3108_v32  ;;  %v3141_v8 = vpack.c.bf16 %v3133_v49, %v3131_v7 }
 0x59d   : > { %v3142_v36 = vpack.c.bf16 %v3134_v28, %v3132_v12 }
 0x59e   : > { %3301 = vmatprep.mubr.bf16.mxu0 %v3118_v47 }
 0x59f   : > { %3374 = vmatprep.mubr.bf16.mxu1 %v3142_v36  ;;  %3302 = vmatmul.mubr.bf16.gmra.mrb[108].mxu0 %v3117_v13 }
 0x5a0   : > { %3375 = vmatmul.mubr.bf16.gmra.mrb[108].mxu1 %v3141_v8 }
 0x659   : > { %v3850_v0 = vpop.f32.mrb[96].mxu0 }
 0x65a   : > { %v3890_v29 = vpop.f32.mrb[96].mxu1  ;;  %v3851_v35 = vpop.f32.mrb[97].mxu0 }
 0x65b   : > { %v3852_v18 = vadd.f32 %v3851_v35, %v3850_v0  ;;  %v3891_v5 = vpop.f32.mrb[97].mxu1  ;;  %v3853_v31 = vpop.f32.mrb[98].mxu0 }
 0x65c   : > { %v3892_v52 = vadd.f32 %v3891_v5, %v3890_v29  ;;  %v3893_v43 = vpop.f32.mrb[98].mxu1  ;;  %v3854_v50 = vpop.f32.mrb[99].mxu0 }
 0x65d   : > { %v3280_v46 = vadd.f32 %v3852_v18, %v6007_v38  ;;  %v3855_v39 = vadd.f32 %v3854_v50, %v3853_v31  ;;  %v3894_v22 = vpop.f32.mrb[99].mxu1 }
 0x65e   : > { %v3353_v37 = vadd.f32 %v3892_v52, %v6007_v38  ;;  %v3895_v23 = vadd.f32 %v3894_v22, %v3893_v43 }
 0x65f   : > { %3310 = vst [vmem:[%s6014_s14] sm:$0xff] %v3280_v46  ;;  %v3283_v42 = vadd.f32 %v3855_v39, %v6007_v38 }
 0x660   : > { %3383 = vst [vmem:[%s6014_s14 + $0x40] sm:$0xff] %v3353_v37  ;;  %v3356_v24 = vadd.f32 %v3895_v23, %v6007_v38 }
 0x661   : > { %3311 = vst [vmem:[%s6014_s14 + $0x8] sm:$0xff] %v3283_v42  ;;  %v3856_v6 = vpop.f32.mrb[100].mxu0 }
 0x662   : > { %3384 = vst [vmem:[%s6014_s14 + $0x48] sm:$0xff] %v3356_v24  ;;  %v3896_v61 = vpop.f32.mrb[100].mxu1  ;;  %v3857_v53 = vpop.f32.mrb[101].mxu0 }
 0x663   : > { %v3858_v45 = vadd.f32 %v3857_v53, %v3856_v6  ;;  %v3897_v41 = vpop.f32.mrb[101].mxu1  ;;  %v3859_v27 = vpop.f32.mrb[102].mxu0 }
 0x664   : > { %v3898_v60 = vadd.f32 %v3897_v41, %v3896_v61  ;;  %v3899_v40 = vpop.f32.mrb[102].mxu1  ;;  %v3860_v57 = vpop.f32.mrb[103].mxu0 }
 0x665   : > { %v3288_v62 = vadd.f32 %v3858_v45, %v6007_v38  ;;  %v3861_v19 = vadd.f32 %v3860_v57, %v3859_v27  ;;  %v3900_v4 = vpop.f32.mrb[103].mxu1 }
 0x666   : > { %v3361_v33 = vadd.f32 %v3898_v60, %v6007_v38  ;;  %v3901_v11 = vadd.f32 %v3900_v4, %v3899_v40 }
 0x667   : > { %3312 = vst [vmem:[%s6014_s14 + $0x10] sm:$0xff] %v3288_v62  ;;  %v3291_v25 = vadd.f32 %v3861_v19, %v6007_v38 }
 0x668   : > { %3385 = vst [vmem:[%s6014_s14 + $0x50] sm:$0xff] %v3361_v33  ;;  %v3364_v17 = vadd.f32 %v3901_v11, %v6007_v38 }
 0x669   : > { %3313 = vst [vmem:[%s6014_s14 + $0x18] sm:$0xff] %v3291_v25 }
 0x66a   : > { %v3862_v48 = vpop.f32.mrb[104].mxu0  ;;  %3386 = vst [vmem:[%s6014_s14 + $0x58] sm:$0xff] %v3364_v17  ;;  %v3902_v16 = vpop.f32.mrb[104].mxu1 }
 0x66b   : > { %v3863_v14 = vpop.f32.mrb[105].mxu0  ;;  %v3903_v26 = vpop.f32.mrb[105].mxu1 }
 0x66c   : > { %v3864_v51 = vadd.f32 %v3863_v14, %v3862_v48  ;;  %v3865_v21 = vpop.f32.mrb[106].mxu0  ;;  %v3904_v1 = vadd.f32 %v3903_v26, %v3902_v16  ;;  %v3905_v3 = vpop.f32.mrb[106].mxu1 }
 0x66d   : > { %v3866_v54 = vpop.f32.mrb[107].mxu0  ;;  %v3906_v15 = vpop.f32.mrb[107].mxu1 }
 0x66e   : > { %v3296_v58 = vadd.f32 %v3864_v51, %v6007_v38  ;;  %v3867_v59 = vadd.f32 %v3866_v54, %v3865_v21  ;;  %v3369_v56 = vadd.f32 %v3904_v1, %v6007_v38  ;;  %v3907_v44 = vadd.f32 %v3906_v15, %v3905_v3 }
 0x670   : > { %3314 = vst [vmem:[%s6014_s14 + $0x20] sm:$0xff] %v3296_v58  ;;  %v3299_v10 = vadd.f32 %v3867_v59, %v6007_v38  ;;  %3387 = vst [vmem:[%s6014_s14 + $0x60] sm:$0xff] %v3369_v56  ;;  %v3372_v63 = vadd.f32 %v3907_v44, %v6007_v38 }
 0x672   : > { %3315 = vst [vmem:[%s6014_s14 + $0x28] sm:$0xff] %v3299_v10  ;;  %v3868_v2 = vpop.f32.mrb[108].mxu0  ;;  %3388 = vst [vmem:[%s6014_s14 + $0x68] sm:$0xff] %v3372_v63 }
 0x673   : > { %v3908_v9 = vpop.f32.mrb[108].mxu1  ;;  %v3869_v20 = vpop.f32.mrb[109].mxu0 }
 0x674   : > { %v3870_v30 = vadd.f32 %v3869_v20, %v3868_v2  ;;  %v3909_v55 = vpop.f32.mrb[109].mxu1  ;;  %v3871_v7 = vpop.f32.mrb[110].mxu0 }
 0x675   : > { %v3910_v32 = vadd.f32 %v3909_v55, %v3908_v9  ;;  %v3911_v49 = vpop.f32.mrb[110].mxu1  ;;  %v3872_v34 = vpop.f32.mrb[111].mxu0 }
 0x676   : > { %v3304_v12 = vadd.f32 %v3870_v30, %v6007_v38  ;;  %v3873_v28 = vadd.f32 %v3872_v34, %v3871_v7  ;;  %v3912_v13 = vpop.f32.mrb[111].mxu1 }
 0x677   : > { %v3377_v47 = vadd.f32 %v3910_v32, %v6007_v38  ;;  %v3913_v8 = vadd.f32 %v3912_v13, %v3911_v49 }
 0x678   : > { %3316 = vst [vmem:[%s6014_s14 + $0x30] sm:$0xff] %v3304_v12  ;;  %v3307_v36 = vadd.f32 %v3873_v28, %v6007_v38 }
 0x679   : > { %3389 = vst [vmem:[%s6014_s14 + $0x70] sm:$0xff] %v3377_v47  ;;  %v3380_v0 = vadd.f32 %v3913_v8, %v6007_v38 }
 0x67a   : > { %3317 = vst [vmem:[%s6014_s14 + $0x38] sm:$0xff] %v3307_v36 }
 0x67b   : > { %3390 = vst [vmem:[%s6014_s14 + $0x78] sm:$0xff] %v3380_v0 }
 0x67c PF: > { %s15_s18 = sadd.s32 1, %s4232_s18  }
 0x67d   : > { %p12_p4 = scmp.ge.s32.totalorder %s15_s18, 4  }
 0x67f   :  { %14 = sbr.rel (!%p12_p4) target bundleno = 1 (0x1), region = 80 }

</bundles_post_ra>
